<compile_context>
chip_gen: v5e
topology: v5e:2x2
jax: 0.10.0
libtpu: 0.0.40
codegen_flags: <defaults>
</compile_context>

<pallas_src>
import jax
import jax.numpy as jnp
from jax.experimental import pallas as pl
from jax.experimental.pallas import tpu as pltpu

# Full-f32 matmul precision for both the in-kernel dots and the XLA reference so
# the 1e-4 comparison is meaningful on the bf16-multiplier MXU.
jax.config.update("jax_default_matmul_precision", "highest")

INPUT_SIZE = 64       # sequence length fed to conv1 (divisible by 8)
OUTPUT_SIZE = 16
BATCH = 2             # BATCH * INPUT_SIZE = 128 -> exactly one vreg lane width

# Fixed channel counts from the PyTorch module.
_C1, _C2, _C3 = 4, 8, 16
_C1P = 8              # conv1 output channels padded to a full sublane tile

# Operand-pack lane layout (all tiny operands live in one (rows, lanes) block).
_B1_COL, _B2_COL, _B3_COL, _FC2B_COL = 0, 1, 2, 3     # bias strips (vertical)
_W1_COL = 4                                           # conv1 taps: lanes 4,5,6
_W2_COL = 8                                           # conv2 fused (C2, 3*C1P)
_W3_COL = _W2_COL + 3 * _C1P                          # conv3 fused (C3, 3*C2)
_PACK_LANES_MIN = _W3_COL + 3 * _C2                   # = 56


# ----------------------------- Pallas kernel --------------------------------------
def _generator_kernel(pack_ref, sel_ref, fc1_ref, fc2_ref, out_ref, rhs_ref):
    f32 = jnp.float32
    lanes = pack_ref.shape[1]          # B * L (batch packed along lanes)
    out_size, B = out_ref.shape
    L = lanes // B
    fl = sel_ref.shape[1] // B         # pooled length per sample (= L // 8)
    z_row = pack_ref.shape[0] - 8      # row of the packed input z

    # Hoisted lane-position-within-sample mask, reused by all three conv layers.
    lm = jax.lax.broadcasted_iota(jnp.int32, (1, lanes), 1) % L

    def shifted(x, d):
        """x[:, p-d] and x[:, p+d] with zero padding at the per-sample edges."""
        xm = jnp.where(lm == 0, 0.0, pltpu.roll(x, d, axis=1))
        xp = jnp.where(lm == L - d, 0.0, pltpu.roll(x, lanes - d, axis=1))
        return xm, xp

    def pool2(h, d):
        """maxpool(2,2) in the lane-dilated layout: valid stride d -> 2*d."""
        return jnp.maximum(h, pltpu.roll(h, lanes - d, axis=1))

    # ---- conv1 (Cin=1) -> ReLU -> pool : pure VPU broadcast path -------------
    x0 = pack_ref[z_row:z_row + 1, :]                      # (1, lanes)
    xm, xp = shifted(x0, 1)
    w1m = pack_ref[0:_C1P, _W1_COL + 0:_W1_COL + 1]        # (8,1), rows 4..7 == 0
    w1c = pack_ref[0:_C1P, _W1_COL + 1:_W1_COL + 2]
    w1p = pack_ref[0:_C1P, _W1_COL + 2:_W1_COL + 3]
    b1 = pack_ref[0:_C1P, _B1_COL:_B1_COL + 1]
    h = jnp.maximum(w1m * xm + w1c * x0 + w1p * xp + b1, 0.0)
    h = pool2(h, 1)                                        # (8, lanes), dilation 2

    # ---- conv2 -> ReLU -> pool : one fused 3-tap MXU matmul ------------------
    xm, xp = shifted(h, 2)
    stk = jnp.concatenate([xm, h, xp], axis=0)             # (24, lanes), 8-aligned
    w2 = pack_ref[0:_C2, _W2_COL:_W2_COL + 3 * _C1P]       # (8, 24)
    b2 = pack_ref[0:_C2, _B2_COL:_B2_COL + 1]
    h = jnp.maximum(jnp.dot(w2, stk, preferred_element_type=f32) + b2, 0.0)
    h = pool2(h, 2)                                        # (8, lanes), dilation 4

    # ---- conv3 -> ReLU -> pool ------------------------------------------------
    xm, xp = shifted(h, 4)
    stk = jnp.concatenate([xm, h, xp], axis=0)             # (24, lanes)
    w3 = pack_ref[0:_C3, _W3_COL:_W3_COL + 3 * _C2]        # (16, 24)
    b3 = pack_ref[0:_C3, _B3_COL:_B3_COL + 1]
    h = jnp.maximum(jnp.dot(w3, stk, preferred_element_type=f32) + b3, 0.0)
    h = pool2(h, 4)                                        # (16, lanes), dilation 8

    # ---- gather dilated conv3 output into a lane-dense fc1 RHS ----------------
    # One selection matmul pulls the scattered valid lanes (s*L + 8*j) into a
    # dense (C3, fl*B) block with column order j*B + s; fl contiguous (C3, B)
    # stores re-tile it into the (C3*fl + 8, B) scratch (row order j*C3 + c).
    g = jnp.dot(h, sel_ref[...], preferred_element_type=f32)   # (16, fl*B)
    for j in range(fl):                                    # static unroll, fl = L//8
        rhs_ref[j * _C3:(j + 1) * _C3, :] = g[:, j * B:(j + 1) * B]
    # Trailing ones-row picks up fc1b (folded into fc1_ref's extra column).
    rhs_ref[fl * _C3:fl * _C3 + 8, :] = (
        jax.lax.broadcasted_iota(jnp.int32, (8, B), 0) == 0).astype(f32)

    # ---- fc1(+bias) -> ReLU -> fc2 -> +bias -> tanh ---------------------------
    y = jnp.dot(fc1_ref[...], rhs_ref[...], preferred_element_type=f32)   # (256, B)
    y = jnp.maximum(y, 0.0)
    fc2b = pack_ref[0:out_size, _FC2B_COL:_FC2B_COL + 1]
    out_ref[...] = jnp.tanh(
        jnp.dot(fc2_ref[...], y, preferred_element_type=f32) + fc2b)


# ----------------------------- wrapper / glue --------------------------------------
@jax.jit
def generator_forward(z, params):
    (w1, b1, w2, b2, w3, b3, fc1w, fc1b, fc2w, fc2b) = params
    f32 = jnp.float32
    B, cin, L = z.shape
    out_size = fc2w.shape[0]
    lanes = B * L
    fl = L // 8                       # pooled length after 3x (same-conv + pool2)
    n1 = fc1w.shape[0]

    # Layout assumptions of the kernel (batch packed along lanes).
    assert cin == 1 and L % 8 == 0 and fl >= 1
    assert w1.shape == (_C1, 1, 3) and w2.shape == (_C2, _C1, 3) and w3.shape == (_C3, _C2, 3)
    assert fc1w.shape[1] == _C3 * fl
    assert lanes % 128 == 0 and lanes >= _PACK_LANES_MIN

    pack_rows = max(24, 8 * ((out_size + 7) // 8) + 8)
    z_row = pack_rows - 8

    # Fused conv tap weights, columns ordered [tap0 | tap1 | tap2] = [x[p-1], x[p], x[p+1]].
    # conv2's input channels are zero-padded 4 -> 8 so the in-kernel sublane concat
    # of (xm, x, xp) stays 8-aligned.
    w2p = jnp.pad(w2, ((0, 0), (0, _C1P - _C1), (0, 0)))              # (8, 8, 3)
    w2f = jnp.transpose(w2p, (0, 2, 1)).reshape(_C2, 3 * _C1P)        # (8, 24)
    w3f = jnp.transpose(w3, (0, 2, 1)).reshape(_C3, 3 * _C2)          # (16, 24)

    # One small operand pack (1 DMA) holding z + conv weights + all short biases.
    pack = jnp.zeros((pack_rows, lanes), f32)
    pack = pack.at[:_C1, _B1_COL].set(b1)
    pack = pack.at[:_C2, _B2_COL].set(b2)
    pack = pack.at[:_C3, _B3_COL].set(b3)
    pack = pack.at[:out_size, _FC2B_COL].set(fc2b)
    pack = pack.at[:_C1, _W1_COL:_W1_COL + 3].set(w1[:, 0, :])
    pack = pack.at[:_C2, _W2_COL:_W2_COL + 3 * _C1P].set(w2f)
    pack = pack.at[:_C3, _W3_COL:_W3_COL + 3 * _C2].set(w3f)
    pack = pack.at[z_row, :].set(z.reshape(lanes).astype(f32))

    # Selection matrix: one MXU op gathers the dilated conv3/pool3 output
    # (valid lanes s*L + 8*j) into a dense (C3, fl*B) block, column order j*B + s.
    p_idx = jnp.arange(lanes, dtype=jnp.int32)[:, None]
    col = jnp.arange(fl * B, dtype=jnp.int32)[None, :]
    sel = (p_idx == (col % B) * L + (col // B) * 8).astype(f32)       # (lanes, fl*B)

    # fc1 weights permuted to the kernel's RHS row order j*C3 + c (PyTorch flatten
    # index is c*fl + j) and augmented with fc1b as an extra column, picked up by
    # the kernel's trailing ones-row (fc1 bias costs no extra DMA or add).
    fc1wp = jnp.transpose(fc1w.reshape(n1, _C3, fl), (0, 2, 1)).reshape(n1, _C3 * fl)
    fc1aug = jnp.concatenate(
        [fc1wp, fc1b[:, None], jnp.zeros((n1, 7), f32)], axis=1)      # (256, C3*fl + 8)

    # No grid / no pipelining: total residency is << VMEM on v5e/v6e/v7x.
    # bf16 weight cast (v6e/v7x item) intentionally skipped: 1e-4 tolerance.
    out = pl.pallas_call(
        _generator_kernel,
        out_shape=jax.ShapeDtypeStruct((out_size, B), f32),
        in_specs=[pl.BlockSpec(memory_space=pltpu.MemorySpace.VMEM)] * 4,
        out_specs=pl.BlockSpec(memory_space=pltpu.MemorySpace.VMEM),
        scratch_shapes=[pltpu.VMEM((_C3 * fl + 8, B), f32)],
    )(pack, sel, fc1aug, fc2w)
    return out.T                      # (B, output_size); trivial 32-element transpose


# ----------------------------- reference + params ----------------------------------
def init_params(key, input_size, output_size):
    fl = input_size // 8
    ks = jax.random.split(key, 10)

    def u(k, shape, scale):
        return jax.random.uniform(k, shape, jnp.float32, -1.0, 1.0) * scale

    w1 = u(ks[0], (4, 1, 3), 0.5);   b1 = u(ks[1], (4,), 0.5)
    w2 = u(ks[2], (8, 4, 3), 0.3);   b2 = u(ks[3], (8,), 0.3)
    w3 = u(ks[4], (16, 8, 3), 0.2);  b3 = u(ks[5], (16,), 0.2)
    fc1w = u(ks[6], (256, 16 * fl), 0.1); fc1b = u(ks[7], (256,), 0.1)
    fc2w = u(ks[8], (output_size, 256), 0.1); fc2b = u(ks[9], (output_size,), 0.1)
    return (w1, b1, w2, b2, w3, b3, fc1w, fc1b, fc2w, fc2b)


def reference_forward(z, params):
    (w1, b1, w2, b2, w3, b3, fc1w, fc1b, fc2w, fc2b) = params

    def conv1d(x, w, b):
        L = x.shape[-1]
        xp = jnp.pad(x, ((0, 0), (0, 0), (1, 1)))
        out = sum(jnp.einsum('oc,bcl->bol', w[:, :, k], xp[:, :, k:k + L]) for k in range(3))
        return out + b[None, :, None]

    def pool(x):
        B, C, L = x.shape
        return jnp.max(x.reshape(B, C, L // 2, 2), axis=-1)

    h = pool(jax.nn.relu(conv1d(z, w1, b1)))
    h = pool(jax.nn.relu(conv1d(h, w2, b2)))
    h = pool(jax.nn.relu(conv1d(h, w3, b3)))
    flat = h.reshape(h.shape[0], -1)
    y = jax.nn.relu(flat @ fc1w.T + fc1b)
    return jnp.tanh(y @ fc2w.T + fc2b)


if __name__ == "__main__":
    key = jax.random.PRNGKey(0)
    pkey, zkey = jax.random.split(key)
    params = init_params(pkey, INPUT_SIZE, OUTPUT_SIZE)
    z = jax.random.normal(zkey, (BATCH, 1, INPUT_SIZE), jnp.float32)

    out = jax.block_until_ready(generator_forward(z, params))
    ref = reference_forward(z, params)

    assert out.shape == (BATCH, OUTPUT_SIZE)
    max_err = float(jnp.max(jnp.abs(out - ref)))
    if not jnp.allclose(out, ref, atol=1e-4, rtol=1e-4):
        raise AssertionError(f"Pallas output mismatch, max abs err = {max_err}")
    print("KERNEL_OK")
</pallas_src>

<mosaic_0001>
module attributes {stable_mosaic.version = 11 : i64} {
  func.func @_generator_kernel(%arg0: memref<24x128xf32, #tpu.memory_space<vmem>>, %arg1: memref<128x16xf32, #tpu.memory_space<vmem>>, %arg2: memref<256x136xf32, #tpu.memory_space<vmem>>, %arg3: memref<16x256xf32, #tpu.memory_space<vmem>>, %arg4: memref<16x2xf32, #tpu.memory_space<vmem>>, %arg5: memref<136x2xf32, #tpu.memory_space<vmem>>) attributes {dimension_semantics = [], scalar_prefetch = 0 : i64, scratch_operands = 1 : i64, tpu.core_type = #tpu.core_type<tc>} {
    %0 = tpu.iota {dimensions = array<i32: 1>} : vector<1x128xi32>
    %c64_i32 = arith.constant 64 : i32
    %c0_i32 = arith.constant 0 : i32
    %1 = arith.cmpi eq, %c64_i32, %c0_i32 : i32
    %c1_i32 = arith.constant 1 : i32
    %2 = arith.select %1, %c1_i32, %c64_i32 : i32
    %3 = vector.broadcast %2 : i32 to vector<1x128xi32>
    %4 = arith.remsi %0, %3 : vector<1x128xi32>
    %c0_i32_0 = arith.constant 0 : i32
    %5 = vector.broadcast %c0_i32_0 : i32 to vector<1x128xi32>
    %6 = arith.cmpi ne, %4, %5 : vector<1x128xi32>
    %c0_i32_1 = arith.constant 0 : i32
    %7 = vector.broadcast %c0_i32_1 : i32 to vector<1x128xi32>
    %8 = arith.cmpi slt, %4, %7 : vector<1x128xi32>
    %c0_i32_2 = arith.constant 0 : i32
    %9 = arith.cmpi slt, %2, %c0_i32_2 : i32
    %10 = vector.broadcast %9 : i1 to vector<1x128xi1>
    %11 = vector.broadcast %10 : vector<1x128xi1> to vector<1x128xi1>
    %12 = arith.xori %8, %11 : vector<1x128xi1>
    %13 = arith.andi %12, %6 : vector<1x128xi1>
    %14 = vector.broadcast %2 : i32 to vector<1x128xi32>
    %15 = arith.addi %4, %14 : vector<1x128xi32>
    %16 = arith.select %13, %15, %4 : vector<1x128xi1>, vector<1x128xi32>
    %c16 = arith.constant 16 : index
    %c0 = arith.constant 0 : index
    %17 = vector.load %arg0[%c16, %c0] : memref<24x128xf32, #tpu.memory_space<vmem>>, vector<1x128xf32>
    %c0_i32_3 = arith.constant 0 : i32
    %18 = vector.broadcast %c0_i32_3 : i32 to vector<1x128xi32>
    %19 = arith.cmpi eq, %16, %18 : vector<1x128xi32>
    %c1_i32_4 = arith.constant 1 : i32
    %20 = tpu.dynamic_rotate %17 by %c1_i32_4 dim 1 : vector<1x128xf32>, i32 -> vector<1x128xf32>
    %cst = arith.constant 0.000000e+00 : f32
    %21 = vector.broadcast %cst : f32 to vector<1x128xf32>
    %22 = arith.select %19, %21, %20 : vector<1x128xi1>, vector<1x128xf32>
    %c63_i32 = arith.constant 63 : i32
    %23 = vector.broadcast %c63_i32 : i32 to vector<1x128xi32>
    %24 = arith.cmpi eq, %16, %23 : vector<1x128xi32>
    %c127_i32 = arith.constant 127 : i32
    %25 = tpu.dynamic_rotate %17 by %c127_i32 dim 1 : vector<1x128xf32>, i32 -> vector<1x128xf32>
    %cst_5 = arith.constant 0.000000e+00 : f32
    %26 = vector.broadcast %cst_5 : f32 to vector<1x128xf32>
    %27 = arith.select %24, %26, %25 : vector<1x128xi1>, vector<1x128xf32>
    %c0_6 = arith.constant 0 : index
    %c4 = arith.constant 4 : index
    %28 = vector.load %arg0[%c0_6, %c4] : memref<24x128xf32, #tpu.memory_space<vmem>>, vector<8x1xf32>
    %c0_7 = arith.constant 0 : index
    %c5 = arith.constant 5 : index
    %29 = vector.load %arg0[%c0_7, %c5] : memref<24x128xf32, #tpu.memory_space<vmem>>, vector<8x1xf32>
    %c0_8 = arith.constant 0 : index
    %c6 = arith.constant 6 : index
    %30 = vector.load %arg0[%c0_8, %c6] : memref<24x128xf32, #tpu.memory_space<vmem>>, vector<8x1xf32>
    %c0_9 = arith.constant 0 : index
    %c0_10 = arith.constant 0 : index
    %31 = vector.load %arg0[%c0_9, %c0_10] : memref<24x128xf32, #tpu.memory_space<vmem>>, vector<8x1xf32>
    %32 = vector.broadcast %28 : vector<8x1xf32> to vector<8x128xf32>
    %33 = vector.broadcast %22 : vector<1x128xf32> to vector<8x128xf32>
    %34 = arith.mulf %32, %33 : vector<8x128xf32>
    %35 = vector.broadcast %29 : vector<8x1xf32> to vector<8x128xf32>
    %36 = vector.broadcast %17 : vector<1x128xf32> to vector<8x128xf32>
    %37 = arith.mulf %35, %36 : vector<8x128xf32>
    %38 = arith.addf %34, %37 : vector<8x128xf32>
    %39 = vector.broadcast %30 : vector<8x1xf32> to vector<8x128xf32>
    %40 = vector.broadcast %27 : vector<1x128xf32> to vector<8x128xf32>
    %41 = arith.mulf %39, %40 : vector<8x128xf32>
    %42 = arith.addf %38, %41 : vector<8x128xf32>
    %43 = vector.broadcast %31 : vector<8x1xf32> to vector<8x128xf32>
    %44 = arith.addf %42, %43 : vector<8x128xf32>
    %cst_11 = arith.constant 0.000000e+00 : f32
    %45 = vector.broadcast %cst_11 : f32 to vector<8x128xf32>
    %46 = arith.maximumf %44, %45 : vector<8x128xf32>
    %c127_i32_12 = arith.constant 127 : i32
    %47 = tpu.dynamic_rotate %46 by %c127_i32_12 dim 1 : vector<8x128xf32>, i32 -> vector<8x128xf32>
    %48 = arith.maximumf %46, %47 : vector<8x128xf32>
    %c0_i32_13 = arith.constant 0 : i32
    %49 = vector.broadcast %c0_i32_13 : i32 to vector<1x128xi32>
    %50 = arith.cmpi eq, %16, %49 : vector<1x128xi32>
    %c2_i32 = arith.constant 2 : i32
    %51 = tpu.dynamic_rotate %48 by %c2_i32 dim 1 : vector<8x128xf32>, i32 -> vector<8x128xf32>
    %cst_14 = arith.constant 0.000000e+00 : f32
    %52 = vector.shape_cast %50 : vector<1x128xi1> to vector<1x128xi1>
    %53 = vector.broadcast %52 : vector<1x128xi1> to vector<8x128xi1>
    %54 = vector.broadcast %cst_14 : f32 to vector<8x128xf32>
    %55 = arith.select %53, %54, %51 : vector<8x128xi1>, vector<8x128xf32>
    %c62_i32 = arith.constant 62 : i32
    %56 = vector.broadcast %c62_i32 : i32 to vector<1x128xi32>
    %57 = arith.cmpi eq, %16, %56 : vector<1x128xi32>
    %c126_i32 = arith.constant 126 : i32
    %58 = tpu.dynamic_rotate %48 by %c126_i32 dim 1 : vector<8x128xf32>, i32 -> vector<8x128xf32>
    %cst_15 = arith.constant 0.000000e+00 : f32
    %59 = vector.shape_cast %57 : vector<1x128xi1> to vector<1x128xi1>
    %60 = vector.broadcast %59 : vector<1x128xi1> to vector<8x128xi1>
    %61 = vector.broadcast %cst_15 : f32 to vector<8x128xf32>
    %62 = arith.select %60, %61, %58 : vector<8x128xi1>, vector<8x128xf32>
    %63 = tpu.concatenate %55, %48, %62 in 0 : vector<8x128xf32>, vector<8x128xf32>, vector<8x128xf32> -> vector<24x128xf32>
    %c0_16 = arith.constant 0 : index
    %c8 = arith.constant 8 : index
    %64 = vector.load %arg0[%c0_16, %c8] : memref<24x128xf32, #tpu.memory_space<vmem>>, vector<8x24xf32>
    %c0_17 = arith.constant 0 : index
    %c1 = arith.constant 1 : index
    %65 = vector.load %arg0[%c0_17, %c1] : memref<24x128xf32, #tpu.memory_space<vmem>>, vector<8x1xf32>
    %cst_18 = arith.constant dense<0.000000e+00> : vector<8x128xf32>
    %66 = tpu.matmul %64, %63, %cst_18 {dimension_numbers = #tpu.dot_dimension_numbers<[1], [0], [0], [1], [0, 0, 1, 1], [], []>, precision = #tpu.contract_precision<fp32>} : vector<8x24xf32>, vector<24x128xf32>, vector<8x128xf32> -> vector<8x128xf32>
    %67 = vector.broadcast %65 : vector<8x1xf32> to vector<8x128xf32>
    %68 = arith.addf %66, %67 : vector<8x128xf32>
    %cst_19 = arith.constant 0.000000e+00 : f32
    %69 = vector.broadcast %cst_19 : f32 to vector<8x128xf32>
    %70 = arith.maximumf %68, %69 : vector<8x128xf32>
    %c126_i32_20 = arith.constant 126 : i32
    %71 = tpu.dynamic_rotate %70 by %c126_i32_20 dim 1 : vector<8x128xf32>, i32 -> vector<8x128xf32>
    %72 = arith.maximumf %70, %71 : vector<8x128xf32>
    %c0_i32_21 = arith.constant 0 : i32
    %73 = vector.broadcast %c0_i32_21 : i32 to vector<1x128xi32>
    %74 = arith.cmpi eq, %16, %73 : vector<1x128xi32>
    %c4_i32 = arith.constant 4 : i32
    %75 = tpu.dynamic_rotate %72 by %c4_i32 dim 1 : vector<8x128xf32>, i32 -> vector<8x128xf32>
    %cst_22 = arith.constant 0.000000e+00 : f32
    %76 = vector.shape_cast %74 : vector<1x128xi1> to vector<1x128xi1>
    %77 = vector.broadcast %76 : vector<1x128xi1> to vector<8x128xi1>
    %78 = vector.broadcast %cst_22 : f32 to vector<8x128xf32>
    %79 = arith.select %77, %78, %75 : vector<8x128xi1>, vector<8x128xf32>
    %c60_i32 = arith.constant 60 : i32
    %80 = vector.broadcast %c60_i32 : i32 to vector<1x128xi32>
    %81 = arith.cmpi eq, %16, %80 : vector<1x128xi32>
    %c124_i32 = arith.constant 124 : i32
    %82 = tpu.dynamic_rotate %72 by %c124_i32 dim 1 : vector<8x128xf32>, i32 -> vector<8x128xf32>
    %cst_23 = arith.constant 0.000000e+00 : f32
    %83 = vector.shape_cast %81 : vector<1x128xi1> to vector<1x128xi1>
    %84 = vector.broadcast %83 : vector<1x128xi1> to vector<8x128xi1>
    %85 = vector.broadcast %cst_23 : f32 to vector<8x128xf32>
    %86 = arith.select %84, %85, %82 : vector<8x128xi1>, vector<8x128xf32>
    %87 = tpu.concatenate %79, %72, %86 in 0 : vector<8x128xf32>, vector<8x128xf32>, vector<8x128xf32> -> vector<24x128xf32>
    %c0_24 = arith.constant 0 : index
    %c32 = arith.constant 32 : index
    %88 = vector.load %arg0[%c0_24, %c32] : memref<24x128xf32, #tpu.memory_space<vmem>>, vector<16x24xf32>
    %c0_25 = arith.constant 0 : index
    %c2 = arith.constant 2 : index
    %89 = vector.load %arg0[%c0_25, %c2] : memref<24x128xf32, #tpu.memory_space<vmem>>, vector<16x1xf32>
    %cst_26 = arith.constant dense<0.000000e+00> : vector<16x128xf32>
    %90 = tpu.matmul %88, %87, %cst_26 {dimension_numbers = #tpu.dot_dimension_numbers<[1], [0], [0], [1], [0, 0, 1, 1], [], []>, precision = #tpu.contract_precision<fp32>} : vector<16x24xf32>, vector<24x128xf32>, vector<16x128xf32> -> vector<16x128xf32>
    %91 = vector.broadcast %89 : vector<16x1xf32> to vector<16x128xf32>
    %92 = arith.addf %90, %91 : vector<16x128xf32>
    %cst_27 = arith.constant 0.000000e+00 : f32
    %93 = vector.broadcast %cst_27 : f32 to vector<16x128xf32>
    %94 = arith.maximumf %92, %93 : vector<16x128xf32>
    %c124_i32_28 = arith.constant 124 : i32
    %95 = tpu.dynamic_rotate %94 by %c124_i32_28 dim 1 : vector<16x128xf32>, i32 -> vector<16x128xf32>
    %96 = arith.maximumf %94, %95 : vector<16x128xf32>
    %c0_29 = arith.constant 0 : index
    %c0_30 = arith.constant 0 : index
    %97 = vector.load %arg1[%c0_29, %c0_30] : memref<128x16xf32, #tpu.memory_space<vmem>>, vector<128x16xf32>
    %cst_31 = arith.constant dense<0.000000e+00> : vector<16x16xf32>
    %98 = tpu.matmul %96, %97, %cst_31 {dimension_numbers = #tpu.dot_dimension_numbers<[1], [0], [0], [1], [0, 0, 1, 1], [], []>, precision = #tpu.contract_precision<fp32>} : vector<16x128xf32>, vector<128x16xf32>, vector<16x16xf32> -> vector<16x16xf32>
    %99 = vector.extract_strided_slice %98 {offsets = [0, 0], sizes = [16, 2], strides = [1, 1]} : vector<16x16xf32> to vector<16x2xf32>
    %c0_32 = arith.constant 0 : index
    %c0_33 = arith.constant 0 : index
    %100 = vector.load %arg5[%c0_32, %c0_33] : memref<136x2xf32, #tpu.memory_space<vmem>>, vector<16x2xf32>
    tpu.vector_store %arg5[%c0_32, %c0_33], %99 {strides = array<i32>} : memref<136x2xf32, #tpu.memory_space<vmem>>, vector<16x2xf32>,
    %101 = vector.extract_strided_slice %98 {offsets = [0, 2], sizes = [16, 2], strides = [1, 1]} : vector<16x16xf32> to vector<16x2xf32>
    %c16_34 = arith.constant 16 : index
    %c0_35 = arith.constant 0 : index
    %102 = vector.load %arg5[%c16_34, %c0_35] : memref<136x2xf32, #tpu.memory_space<vmem>>, vector<16x2xf32>
    tpu.vector_store %arg5[%c16_34, %c0_35], %101 {strides = array<i32>} : memref<136x2xf32, #tpu.memory_space<vmem>>, vector<16x2xf32>,
    %103 = vector.extract_strided_slice %98 {offsets = [0, 4], sizes = [16, 2], strides = [1, 1]} : vector<16x16xf32> to vector<16x2xf32>
    %c32_36 = arith.constant 32 : index
    %c0_37 = arith.constant 0 : index
    %104 = vector.load %arg5[%c32_36, %c0_37] : memref<136x2xf32, #tpu.memory_space<vmem>>, vector<16x2xf32>
    tpu.vector_store %arg5[%c32_36, %c0_37], %103 {strides = array<i32>} : memref<136x2xf32, #tpu.memory_space<vmem>>, vector<16x2xf32>,
    %105 = vector.extract_strided_slice %98 {offsets = [0, 6], sizes = [16, 2], strides = [1, 1]} : vector<16x16xf32> to vector<16x2xf32>
    %c48 = arith.constant 48 : index
    %c0_38 = arith.constant 0 : index
    %106 = vector.load %arg5[%c48, %c0_38] : memref<136x2xf32, #tpu.memory_space<vmem>>, vector<16x2xf32>
    tpu.vector_store %arg5[%c48, %c0_38], %105 {strides = array<i32>} : memref<136x2xf32, #tpu.memory_space<vmem>>, vector<16x2xf32>,
    %107 = vector.extract_strided_slice %98 {offsets = [0, 8], sizes = [16, 2], strides = [1, 1]} : vector<16x16xf32> to vector<16x2xf32>
    %c64 = arith.constant 64 : index
    %c0_39 = arith.constant 0 : index
    %108 = vector.load %arg5[%c64, %c0_39] : memref<136x2xf32, #tpu.memory_space<vmem>>, vector<16x2xf32>
    tpu.vector_store %arg5[%c64, %c0_39], %107 {strides = array<i32>} : memref<136x2xf32, #tpu.memory_space<vmem>>, vector<16x2xf32>,
    %109 = vector.extract_strided_slice %98 {offsets = [0, 10], sizes = [16, 2], strides = [1, 1]} : vector<16x16xf32> to vector<16x2xf32>
    %c80 = arith.constant 80 : index
    %c0_40 = arith.constant 0 : index
    %110 = vector.load %arg5[%c80, %c0_40] : memref<136x2xf32, #tpu.memory_space<vmem>>, vector<16x2xf32>
    tpu.vector_store %arg5[%c80, %c0_40], %109 {strides = array<i32>} : memref<136x2xf32, #tpu.memory_space<vmem>>, vector<16x2xf32>,
    %111 = vector.extract_strided_slice %98 {offsets = [0, 12], sizes = [16, 2], strides = [1, 1]} : vector<16x16xf32> to vector<16x2xf32>
    %c96 = arith.constant 96 : index
    %c0_41 = arith.constant 0 : index
    %112 = vector.load %arg5[%c96, %c0_41] : memref<136x2xf32, #tpu.memory_space<vmem>>, vector<16x2xf32>
    tpu.vector_store %arg5[%c96, %c0_41], %111 {strides = array<i32>} : memref<136x2xf32, #tpu.memory_space<vmem>>, vector<16x2xf32>,
    %113 = vector.extract_strided_slice %98 {offsets = [0, 14], sizes = [16, 2], strides = [1, 1]} : vector<16x16xf32> to vector<16x2xf32>
    %c112 = arith.constant 112 : index
    %c0_42 = arith.constant 0 : index
    %114 = vector.load %arg5[%c112, %c0_42] : memref<136x2xf32, #tpu.memory_space<vmem>>, vector<16x2xf32>
    tpu.vector_store %arg5[%c112, %c0_42], %113 {strides = array<i32>} : memref<136x2xf32, #tpu.memory_space<vmem>>, vector<16x2xf32>,
    %115 = tpu.iota {dimensions = array<i32: 0>} : vector<8x2xi32>
    %c0_i32_43 = arith.constant 0 : i32
    %116 = vector.broadcast %c0_i32_43 : i32 to vector<8x2xi32>
    %117 = arith.cmpi eq, %115, %116 : vector<8x2xi32>
    %118 = arith.extui %117 : vector<8x2xi1> to vector<8x2xi32>
    %119 = arith.sitofp %118 : vector<8x2xi32> to vector<8x2xf32>
    %c128 = arith.constant 128 : index
    %c0_44 = arith.constant 0 : index
    %120 = vector.load %arg5[%c128, %c0_44] : memref<136x2xf32, #tpu.memory_space<vmem>>, vector<8x2xf32>
    tpu.vector_store %arg5[%c128, %c0_44], %119 {strides = array<i32>} : memref<136x2xf32, #tpu.memory_space<vmem>>, vector<8x2xf32>,
    %c0_45 = arith.constant 0 : index
    %c0_46 = arith.constant 0 : index
    %121 = vector.load %arg2[%c0_45, %c0_46] : memref<256x136xf32, #tpu.memory_space<vmem>>, vector<256x136xf32>
    %c0_47 = arith.constant 0 : index
    %c0_48 = arith.constant 0 : index
    %122 = vector.load %arg5[%c0_47, %c0_48] : memref<136x2xf32, #tpu.memory_space<vmem>>, vector<136x2xf32>
    %cst_49 = arith.constant dense<0.000000e+00> : vector<256x2xf32>
    %123 = tpu.matmul %121, %122, %cst_49 {dimension_numbers = #tpu.dot_dimension_numbers<[1], [0], [0], [1], [0, 0, 1, 1], [], []>, precision = #tpu.contract_precision<fp32>} : vector<256x136xf32>, vector<136x2xf32>, vector<256x2xf32> -> vector<256x2xf32>
    %cst_50 = arith.constant 0.000000e+00 : f32
    %124 = vector.broadcast %cst_50 : f32 to vector<256x2xf32>
    %125 = arith.maximumf %123, %124 : vector<256x2xf32>
    %c0_51 = arith.constant 0 : index
    %c3 = arith.constant 3 : index
    %126 = vector.load %arg0[%c0_51, %c3] : memref<24x128xf32, #tpu.memory_space<vmem>>, vector<16x1xf32>
    %c0_52 = arith.constant 0 : index
    %c0_53 = arith.constant 0 : index
    %127 = vector.load %arg3[%c0_52, %c0_53] : memref<16x256xf32, #tpu.memory_space<vmem>>, vector<16x256xf32>
    %cst_54 = arith.constant dense<0.000000e+00> : vector<16x2xf32>
    %128 = tpu.matmul %127, %125, %cst_54 {dimension_numbers = #tpu.dot_dimension_numbers<[1], [0], [0], [1], [0, 0, 1, 1], [], []>, precision = #tpu.contract_precision<fp32>} : vector<16x256xf32>, vector<256x2xf32>, vector<16x2xf32> -> vector<16x2xf32>
    %129 = vector.broadcast %126 : vector<16x1xf32> to vector<16x2xf32>
    %130 = arith.addf %128, %129 : vector<16x2xf32>
    %131 = math.tanh %130 : vector<16x2xf32>
    %c0_55 = arith.constant 0 : index
    %c0_56 = arith.constant 0 : index
    %132 = vector.load %arg4[%c0_55, %c0_56] : memref<16x2xf32, #tpu.memory_space<vmem>>, vector<16x2xf32>
    tpu.vector_store %arg4[%c0_55, %c0_56], %131 {strides = array<i32>} : memref<16x2xf32, #tpu.memory_space<vmem>>, vector<16x2xf32>,
    return
  }
}

</mosaic_0001>

<bundles_post_ra>
// kernel: generator_forward.1
= control target key start
LH: loop header
LB: loop body
LE: loop exit
PB: predicated region body
PF: predicated region fallthrough
CT: control target
= control target key end

     0   :  { %v4384_v0 = vmov 4   ;;  %v4385_v3 = vmov 6   ;;  %s4386_s19 = smov 1   ;;  %v4387_v4 = vmov 5   ;;  %s4388_s20 = smov 127   ;;  %v4389_v5 = vmov 0   ;;  %s6767_s0 = inlined_call_operand.vmem [shape: f32[24,128], index: 0, kind: input, shape index: {}]   ;;  %s6768_s1 = inlined_call_operand.vmem [shape: f32[128,16], index: 1, kind: input, shape index: {}]   ;;  %s6769_s2 = inlined_call_operand.vmem [shape: f32[256,136], index: 2, kind: input, shape index: {}]   ;;  %s6770_s3 = inlined_call_operand.vmem [shape: f32[16,256], index: 3, kind: input, shape index: {}]   ;;  %s6771_s4 = inlined_call_operand.vmem [shape: f32[16,2], index: 4, kind: output, shape index: {}]  }
   0x1   :  { %4370 = vset.pattern.permute.xlu1 %v4384_v0  ;;  %v4432_v1 = vld [vmem:[%s6767_s0] sm:$0xff]  ;;  %v31_v2 = vld [vmem:[%s6767_s0 + $0x10] sm:$0x1]  ;;  %4372 = vset.pattern.permute.xlu2 %v4385_v3  ;;  %v17_v6 = vlaneseq  ;;  %vm895_vm1 = vcmask 15360   ;;  %v4390_v8 = vmov 0.0   ;;  %s4391_s21 = smov 120  }
   0x2   :  { %43 = vperm.xlu1 %4370, %v4432_v1   ;;  %33 = vrot.lane.b32.xlu0 %v31_v2, %s4386_s19  ;;  %v52_v17 = vperm.slane %v31_v2, 0  ;;  %s4392_s22 = smov 2   ;;  %s4393_s23 = smov 126   ;;  %vm88_vm4 = vcmask 195584   ;;  %v4394_v36 = vmov 1   ;;  %vm1043_vm7 = vcmask 64512  }
   0x3   :  { %56 = vperm.xlu2 %4372, %v4432_v1   ;;  %v957_v7 = vshrl.u32 %v17_v6, 7  ;;  %v18_v10 = vand.u32 127, %v17_v6  ;;  %s4395_s24 = smov 96   ;;  %s4396_s25 = smov 4  }
   0x4   :  { %s4397_s26 = smov 124   ;;  %s4400_s12 = smov 114  }
   0x5   :  { %vm958_vm0 = vcmp.eq.s32.totalorder %v957_v7, 0  ;;  %v4443_v11 = vand.u32 63, %v18_v10  ;;  %s4401_s13 = smov 118   ;;  %s4402_s14 = smov 122  }
   0x6   :  { %v4349_v9 = vsel %vm958_vm0, 1.0, %v4390_v8 }
   0x7   :  { %961 = vst.msk [vmem:[#allocation2 + $0x80] sm:$0xff] %vm895_vm1, %v4349_v9  ;;  %vm32_vm2 = vcmp.eq.s32.totalorder %v4443_v11, 0  ;;  %vm36_vm3 = vcmp.eq.s32.totalorder %v4443_v11, 63  ;;  %vm76_vm5 = vcmp.eq.s32.totalorder %v4443_v11, 62  ;;  %vm270_vm6 = vcmp.eq.s32.totalorder %v4443_v11, 60 }
   0xa   :  { %4371 = vset.pattern.permute.xlu1 %v4387_v4  ;;  %37 = vrot.lane.b32.xlu0 %v31_v2, %s4388_s20 }
   0xb   :  { %49 = vperm.xlu1 %4371, %v4432_v1   ;;  %4373 = vset.pattern.permute.xlu2 %v4389_v5 }
   0xc   :  { %63 = vperm.xlu2 %4373, %v4432_v1  }
  0x13   :  { %4374 = vset.pattern.permute.xlu1 %v4394_v36 }
  0x14   :  { %86 = vrot.lane.b32.xlu2 %v4432_v1, %s4391_s21 }
  0x5d   :  { %v57_v15 = vpop.permute.xlu2 %56 }
  0x66   :  { %v64_v26 = vpop.permute.xlu2 %63 }
  0x6e   :  { %v87_v32 = vpop.permute.xlu2 %86 }
  0x6f   :  { %v89_v33 = vsel %vm88_vm4, %v87_v32, 0 }
  0x70   :  { %v110_v34 = vand.u32 4294901760, %v89_v33 }
  0x72   :  { %v111_v35 = vsub.f32 %v89_v33, %v110_v34 }
  0x74   :  { %v44_v12 = vpop.permute.xlu1 %43  ;;  %v34_v13 = vpop.permute.xlu0 %33  ;;  %v112_v38 = vand.u32 4294901760, %v111_v35 }
  0x75   :  { %v35_v14 = vsel %vm32_vm2, 0.0, %v34_v13  ;;  %v277_v13 = vld [vmem:[%s6767_s0 + $0x8] sm:$0xff] }
  0x76   :  { %v46_v16 = vperm.slane %v35_v14, 0  ;;  %v113_v43 = vsub.f32 %v111_v35, %v112_v38 }
  0x78   :  { %v47_v21 = vmul.f32 %v46_v16, %v44_v12  ;;  %v114_v49 = vand.u32 4294901760, %v113_v43 }
  0x7c   :  { %v38_v18 = vpop.permute.xlu0 %37 }
  0x7d   :  { %v39_v19 = vsel %vm36_vm3, 0.0, %v38_v18  ;;  %v50_v20 = vpop.permute.xlu1 %49  ;;  %v4398_v18 = vmov 2  }
  0x7e   :  { %v59_v22 = vperm.slane %v39_v19, 0  ;;  %v53_v23 = vmul.f32 %v52_v17, %v50_v20  ;;  %4376 = vset.pattern.permute.xlu2 %v4398_v18 }
  0x80   :  { %v60_v24 = vmul.f32 %v59_v22, %v57_v15  ;;  %v54_v25 = vadd.f32 %v53_v23, %v47_v21 }
  0x82   :  { %v61_v27 = vadd.f32 %v60_v24, %v54_v25 }
  0x84   :  { %v66_v28 = vadd.f32 %v64_v26, %v61_v27 }
  0x86   :  { %v67_v29 = vmax.f32 %v66_v28, 0.0 }
  0x88   :  { %68 = vrot.lane.b32.xlu0 %v67_v29, %s4388_s20 }
  0xfa   :  { %v69_v30 = vpop.permute.xlu0 %68 }
  0xfb   :  { %v70_v31 = vmax.f32 %v67_v29, %v69_v30 }
  0xfd   :  { %71 = vrot.lane.b32.xlu0 %v70_v31, %s4392_s22  ;;  %77 = vrot.lane.b32.xlu1 %v70_v31, %s4393_s23  ;;  %v106_v37 = vand.u32 4294901760, %v70_v31 }
  0xff   :  { %v139_v44 = vsub.f32 %v70_v31, %v106_v37 }
 0x101   :  { %v140_v50 = vand.u32 4294901760, %v139_v44 }
 0x103   :  { %v141_v54 = vsub.f32 %v139_v44, %v140_v50 }
 0x105   :  { %83 = vperm.xlu1 %4374, %v4432_v1   ;;  %v142_v57 = vand.u32 4294901760, %v141_v54  ;;  %v518_v54 = vld [vmem:[%s6768_s1 + $0x58] sm:$0xff] }
 0x10d   :  { %288 = vrot.lane.b32.xlu1 %v4432_v1, %s4395_s24 }
 0x10e   :  { %4375 = vset.pattern.permute.xlu1 %v4398_v18  ;;  %v515_v18 = vld [vmem:[%s6768_s1 + $0x40] sm:$0xff] }
 0x115   :  { %280 = vperm.xlu1 %4375, %v4432_v1  }
 0x16f   :  { %v72_v39 = vpop.permute.xlu0 %71  ;;  %v78_v40 = vpop.permute.xlu1 %77 }
 0x170   :  { %v75_v41 = vsel %vm32_vm2, 0.0, %v72_v39  ;;  %v81_v42 = vsel %vm76_vm5, 0.0, %v78_v40 }
 0x171   :  { %v108_v45 = vand.u32 4294901760, %v75_v41  ;;  %v104_v46 = vand.u32 4294901760, %v81_v42 }
 0x173   :  { %v145_v47 = vsub.f32 %v75_v41, %v108_v45  ;;  %v133_v48 = vsub.f32 %v81_v42, %v104_v46  ;;  %105 = vmatpush.msra.mxu2 %v104_v46  ;;  %253 = vmatpush.msra.mxu1 %v104_v46 }
 0x175   :  { %107 = vmatpush.msra.mxu2 %v106_v37  ;;  %255 = vmatpush.msra.mxu1 %v106_v37  ;;  %v134_v51 = vand.u32 4294901760, %v133_v48  ;;  %v146_v52 = vand.u32 4294901760, %v145_v47 }
 0x177   :  { %109 = vmatpush.msra.mxu2 %v108_v45  ;;  %225 = vmatpush.msra.mxu0 %v134_v51  ;;  %v135_v53 = vsub.f32 %v133_v48, %v134_v51  ;;  %v147_v56 = vsub.f32 %v145_v47, %v146_v52  ;;  %v84_v60 = vpop.permute.xlu1 %83 }
 0x178   :  { %257 = vmatpush.msra.mxu1 %v108_v45  ;;  %115 = vmatmul.f32.vlgmr.msra.gmra.mxu2 %v114_v49  ;;  %v520_v49 = vld [vmem:[%s6768_s1 + $0x68] sm:$0xff] }
 0x179   :  { %170 = vmatpush.msrb.mxu2 %v133_v48  ;;  %259 = vmatmul.f32.vlgmr.msra.gmra.mxu1 %v110_v34  ;;  %v136_v55 = vand.u32 4294901760, %v135_v53  ;;  %v148_v58 = vand.u32 4294901760, %v147_v56  ;;  %v521_v48 = vld [vmem:[%s6768_s1 + $0x70] sm:$0xff]  ;;  %v519_v53 = vld [vmem:[%s6768_s1 + $0x60] sm:$0xff] }
 0x17a   :  { %229 = vmatpush.msra.mxu0 %v140_v50  ;;  %v4487_v51 = vand.u32 4294901760, %v521_v48  ;;  %v4500_v56 = vand.u32 4294901760, %v519_v53 }
 0x17b   :  { %173 = vmatpush.msrb.mxu2 %v139_v44  ;;  %137 = vmatpush.msra.mxu3 %v136_v55  ;;  %v517_v55 = vld [vmem:[%s6768_s1 + $0x50] sm:$0xff] }
 0x17c   :  { %233 = vmatpush.msra.mxu0 %v146_v52  ;;  %v4489_v52 = vand.u32 4294901760, %v520_v49 }
 0x17d   :  { %176 = vmatpush.msrb.mxu2 %v145_v47  ;;  %235 = vmatmul.f32.vlgmr.msra.gmra.mxu0 %v110_v34  ;;  %v522_v47 = vld [vmem:[%s6768_s1 + $0x78] sm:$0xff] }
 0x17e   :  { %143 = vmatpush.msra.mxu3 %v142_v57  ;;  %v4485_v50 = vand.u32 4294901760, %v522_v47  ;;  %v4502_v57 = vand.u32 4294901760, %v518_v54 }
 0x17f   :  { %v289_v14 = vpop.permute.xlu1 %288 }
 0x180   :  { %149 = vmatpush.msra.mxu3 %v148_v58  ;;  %179 = vmatmul.f32.vlgmr.msrb.gmra.mxu2 %v111_v35  ;;  %v292_v15 = vsel %vm88_vm4, %v289_v14, 0  ;;  %v4504_v58 = vand.u32 4294901760, %v517_v55 }
 0x181   :  { %151 = vmatmul.f32.vlgmr.msra.gmra.mxu3 %v110_v34  ;;  %v4465_v16 = vand.u32 4294901760, %v292_v15 }
 0x182   :  { %197 = vmatpush.msrb.mxu3 %v104_v46 }
 0x183   :  { %v316_v20 = vsub.f32 %v292_v15, %v4465_v16 }
 0x184   :  { %199 = vmatpush.msrb.mxu3 %v106_v37 }
 0x185   :  { %v317_v23 = vand.u32 4294901760, %v316_v20 }
 0x186   :  { %201 = vmatpush.msrb.mxu3 %v108_v45 }
 0x187   :  { %v318_v29 = vsub.f32 %v316_v20, %v317_v23 }
 0x189   :  { %205 = vmatmul.f32.vlgmr.msrb.gmra.mxu3 %v112_v38  ;;  %v319_v33 = vand.u32 4294901760, %v318_v29 }
 0x1f6   :  { %v260_v7 = vpop.f32.mrf.mxu1 }
 0x1fa   :  { %v236_v5 = vpop.f32.mrf.mxu0 }
 0x1fb   :  { %v116_v59 = vpop.f32.mrf.mxu2 }
 0x1fc   :  { %v117_v62 = vadd.f32 %v116_v59, %v84_v60  ;;  %v516_v59 = vld [vmem:[%s6768_s1 + $0x48] sm:$0xff]  ;;  %v281_v60 = vpop.permute.xlu1 %280 }
 0x203   :  { %v180_v0 = vpop.f32.mrf.mxu2 }
 0x204   :  { %v152_v61 = vpop.f32.mrf.mxu3 }
 0x205   :  { %v153_v63 = vadd.f32 %v152_v61, %v117_v62  ;;  %v4510_v62 = vsub.f32 %v522_v47, %v4485_v50 }
 0x207   :  { %v181_v2 = vadd.f32 %v180_v0, %v153_v63  ;;  %v4513_v63 = vsub.f32 %v521_v48, %v4487_v51  ;;  %v4516_v0 = vsub.f32 %v520_v49, %v4489_v52  ;;  %v509_v49 = vld [vmem:[%s6768_s1 + $0x10] sm:$0xff] }
 0x20c   :  { %v206_v3 = vpop.f32.mrf.mxu3 }
 0x20d   :  { %v207_v4 = vadd.f32 %v206_v3, %v181_v2  ;;  %v4519_v2 = vand.u32 4294901760, %v516_v59  ;;  %v4523_v3 = vsub.f32 %v519_v53, %v4500_v56 }
 0x20f   :  { %v237_v6 = vadd.f32 %v236_v5, %v207_v4  ;;  %v4526_v4 = vsub.f32 %v518_v54, %v4502_v57  ;;  %v574_v5 = vand.u32 4294901760, %v4510_v62  ;;  %v4539_v14 = vsub.f32 %v516_v59, %v4519_v2 }
 0x211   :  { %v261_v8 = vadd.f32 %v260_v7, %v237_v6  ;;  %v580_v6 = vand.u32 4294901760, %v4513_v63  ;;  %v586_v7 = vand.u32 4294901760, %v4516_v0  ;;  %v575_v15 = vsub.f32 %v4510_v62, %v574_v5 }
 0x213   :  { %v263_v9 = vmax.f32 %v261_v8, 0.0  ;;  %v4533_v8 = vsub.f32 %v517_v55, %v4504_v58 }
 0x215   :  { %264 = vrot.lane.b32.xlu2 %v263_v9, %s4393_s23 }
 0x26f   :  { %v265_v10 = vpop.permute.xlu2 %264 }
 0x270   :  { %v266_v12 = vmax.f32 %v263_v9, %v265_v10 }
 0x272   :  { %267 = vrot.lane.b32.xlu2 %v266_v12, %s4396_s25  ;;  %271 = vrot.lane.b32.xlu0 %v266_v12, %s4397_s26  ;;  %v311_v21 = vand.u32 4294901760, %v266_v12 }
 0x274   :  { %v352_v25 = vsub.f32 %v266_v12, %v311_v21  ;;  %v592_v12 = vand.u32 4294901760, %v4523_v3 }
 0x276   :  { %v353_v31 = vand.u32 4294901760, %v352_v25 }
 0x278   :  { %v354_v11 = vsub.f32 %v352_v25, %v353_v31 }
 0x27a   :  { %290 = vrot.lane.b32.xlu0 %v277_v13, %s4395_s24  ;;  %285 = vperm.xlu2 %4376, %v277_v13   ;;  %v355_v41 = vand.u32 4294901760, %v354_v11  ;;  %v598_v13 = vand.u32 4294901760, %v4526_v4 }
 0x27c   :  { %v599_v29 = vsub.f32 %v4526_v4, %v598_v13 }
 0x27e   :  { %v600_v53 = vand.u32 4294901760, %v599_v29 }
 0x2cc   :  { %v268_v17 = vpop.permute.xlu2 %267 }
 0x2cd   :  { %v269_v19 = vsel %vm32_vm2, 0.0, %v268_v17  ;;  %v587_v17 = vsub.f32 %v4516_v0, %v586_v7 }
 0x2ce   :  { %v313_v22 = vand.u32 4294901760, %v269_v19 }
 0x2d0   :  { %v358_v27 = vsub.f32 %v269_v19, %v313_v22 }
 0x2d2   :  { %v359_v1 = vand.u32 4294901760, %v358_v27 }
 0x2d4   :  { %v360_v39 = vsub.f32 %v358_v27, %v359_v1 }
 0x2d6   :  { %v361_v42 = vand.u32 4294901760, %v360_v39  ;;  %v510_v39 = vld [vmem:[%s6768_s1 + $0x18] sm:$0xff] }
 0x2d7   :  { %v4622_v59 = vand.u32 4294901760, %v510_v39 }
 0x2e4   :  { %v272_v24 = vpop.permute.xlu0 %271 }
 0x2e5   :  { %v275_v26 = vsel %vm270_vm6, 0.0, %v272_v24  ;;  %v576_v24 = vand.u32 4294901760, %v575_v15 }
 0x2e6   :  { %v309_v28 = vand.u32 4294901760, %v275_v26 }
 0x2e8   :  { %v346_v30 = vsub.f32 %v275_v26, %v309_v28  ;;  %310 = vmatpush.msra.mxu2 %v309_v28  ;;  %419 = vmatpush.msrb.mxu1 %v309_v28  ;;  %v593_v26 = vsub.f32 %v4523_v3, %v592_v12 }
 0x2ea   :  { %v347_v32 = vand.u32 4294901760, %v346_v30  ;;  %312 = vmatpush.msra.mxu2 %v311_v21  ;;  %387 = vmatpush.msrb.mxu0 %v346_v30 }
 0x2eb   :  { %421 = vmatpush.msrb.mxu1 %v311_v21 }
 0x2ec   :  { %v348_v34 = vsub.f32 %v346_v30, %v347_v32  ;;  %v291_v35 = vpop.permute.xlu0 %290  ;;  %314 = vmatpush.msra.mxu2 %v313_v22  ;;  %390 = vmatpush.msrb.mxu0 %v352_v25  ;;  %v610_v30 = vand.u32 4294901760, %v4539_v14 }
 0x2ed   :  { %v294_v36 = vsel %vm88_vm4, %v291_v35, 0  ;;  %423 = vmatpush.msrb.mxu1 %v313_v22  ;;  %320 = vmatmul.f32.vlgmr.msra.gmra.mxu2 %v319_v33  ;;  %v588_v33 = vand.u32 4294901760, %v587_v17 }
 0x2ee   :  { %453 = vmatpush.msrb.mxu2 %v347_v32  ;;  %v349_v37 = vand.u32 4294901760, %v348_v34  ;;  %v323_v38 = vand.u32 4294901760, %v294_v36  ;;  %427 = vmatmul.f32.vlgmr.msrb.gmra.mxu1 %v317_v23  ;;  %v286_v32 = vpop.permute.xlu2 %285  ;;  %v611_v47 = vsub.f32 %v4539_v14, %v610_v30 }
 0x2ef   :  { %393 = vmatpush.msrb.mxu0 %v358_v27  ;;  %v604_v27 = vand.u32 4294901760, %v4533_v8  ;;  %577 = vmatpush.msra.mxu1 %v576_v24 }
 0x2f0   :  { %396 = vmatmul.f32.vlgmr.msrb.gmra.mxu0 %v316_v20  ;;  %v324_v40 = vsub.f32 %v294_v36, %v323_v38  ;;  %457 = vmatpush.msrb.mxu2 %v353_v31  ;;  %v514_v20 = vld [vmem:[%s6768_s1 + $0x38] sm:$0xff]  ;;  %v4578_v31 = vand.u32 4294901760, %v515_v18 }
 0x2f1   :  { %350 = vmatpush.msra.mxu3 %v349_v37  ;;  %524 = vmatpush.msra.mxu0 %v4485_v50  ;;  %v4582_v34 = vand.u32 4294901760, %v514_v20 }
 0x2f2   :  { %461 = vmatpush.msrb.mxu2 %v359_v1  ;;  %v325_v43 = vand.u32 4294901760, %v324_v40  ;;  %v4589_v37 = vsub.f32 %v515_v18, %v4578_v31  ;;  %v4637_v18 = vand.u32 4294901760, %v509_v49 }
 0x2f3   :  { %356 = vmatpush.msra.mxu3 %v355_v41  ;;  %526 = vmatpush.msra.mxu0 %v4487_v51  ;;  %v594_v41 = vand.u32 4294901760, %v593_v26  ;;  %v4650_v26 = vsub.f32 %v510_v39, %v4622_v59 }
 0x2f4   :  { %v326_v44 = vsub.f32 %v324_v40, %v325_v43  ;;  %679 = vmatpush.msra.mxu2 %v4510_v62  ;;  %v616_v48 = vand.u32 4294901760, %v4589_v37  ;;  %v4664_v39 = vsub.f32 %v509_v49, %v4637_v18 }
 0x2f5   :  { %362 = vmatpush.msra.mxu3 %v361_v42  ;;  %528 = vmatpush.msra.mxu0 %v4489_v52  ;;  %v605_v42 = vsub.f32 %v4533_v8, %v604_v27 }
 0x2f6   :  { %364 = vmatmul.f32.vlgmr.msra.gmra.mxu3 %v4465_v16  ;;  %433 = vmatmul.f32.gmra.mxu1 %v325_v43  ;;  %v327_v45 = vand.u32 4294901760, %v326_v44  ;;  %v4602_v43 = vsub.f32 %v514_v20, %v4582_v34  ;;  %v612_v20 = vand.u32 4294901760, %v611_v47 }
 0x2f7   :  { %485 = vmatpush.msrb.mxu3 %v309_v28  ;;  %682 = vmatpush.msra.mxu2 %v4513_v63  ;;  %v511_v28 = vld [vmem:[%s6768_s1 + $0x20] sm:$0xff]  ;;  %v606_v15 = vand.u32 4294901760, %v605_v42 }
 0x2f8   :  { %401 = vmatmul.f32.gmra.mxu0 %v324_v40  ;;  %328 = vmatmul.f32.gmra.mxu2 %v327_v45  ;;  %v622_v54 = vand.u32 4294901760, %v4602_v43 }
 0x2f9   :  { %487 = vmatpush.msrb.mxu3 %v311_v21  ;;  %v513_v21 = vld [vmem:[%s6768_s1 + $0x30] sm:$0xff]  ;;  %530 = vmatpush.msra.mxu0 %v4500_v56 }
 0x2fa   :  { %685 = vmatpush.msra.mxu2 %v4516_v0  ;;  %v4584_v35 = vand.u32 4294901760, %v513_v21  ;;  %v623_v24 = vsub.f32 %v4602_v43, %v622_v54 }
 0x2fb   :  { %489 = vmatpush.msrb.mxu3 %v313_v22  ;;  %v512_v22 = vld [vmem:[%s6768_s1 + $0x28] sm:$0xff]  ;;  %532 = vmatpush.msra.mxu0 %v4502_v57 }
 0x2fc   :  { %v4586_v11 = vand.u32 4294901760, %v512_v22  ;;  %688 = vmatpush.msra.mxu2 %v4523_v3  ;;  %v4606_v44 = vsub.f32 %v513_v21, %v4584_v35  ;;  %v507_v21 = vld [vmem:[%s6768_s1] sm:$0xff] }
 0x2fd   :  { %737 = vmatpush.msra.mxu3 %v4485_v50  ;;  %534 = vmatpush.msra.mxu0 %v4504_v58 }
 0x2fe   :  { %368 = vmatmul.f32.gmra.mxu3 %v323_v38  ;;  %691 = vmatpush.msra.mxu2 %v4526_v4  ;;  %v4620_v55 = vsub.f32 %v512_v22, %v4586_v11  ;;  %v628_v17 = vand.u32 4294901760, %v4606_v44 }
 0x2ff   :  { %739 = vmatpush.msra.mxu3 %v4487_v51  ;;  %536 = vmatpush.msra.mxu0 %v4519_v2 }
 0x300   :  { %463 = vmatmul.f32.vlgmr.msrb.gmra.mxu2 %v4465_v16 }
 0x301   :  { %741 = vmatpush.msra.mxu3 %v4489_v52  ;;  %694 = vmatpush.msra.mxu2 %v4533_v8 }
 0x302   :  { %538 = vmatpush.msra.mxu0 %v4578_v31 }
 0x303   :  { %743 = vmatpush.msra.mxu3 %v4500_v56  ;;  %697 = vmatpush.msra.mxu2 %v4539_v14 }
 0x304   :  { %540 = vmatpush.msra.mxu0 %v4582_v34 }
 0x305   :  { %745 = vmatpush.msra.mxu3 %v4502_v57  ;;  %700 = vmatpush.msra.mxu2 %v4589_v37 }
 0x306   :  { %491 = vmatmul.f32.vlgmr.msrb.gmra.mxu3 %v4465_v16  ;;  %v581_v16 = vsub.f32 %v4513_v63, %v580_v6  ;;  %542 = vmatpush.msra.mxu0 %v4584_v35 }
 0x307   :  { %747 = vmatpush.msra.mxu3 %v4504_v58  ;;  %703 = vmatpush.msra.mxu2 %v4602_v43 }
 0x308   :  { %467 = vmatmul.f32.gmra.mxu2 %v323_v38  ;;  %v582_v25 = vand.u32 4294901760, %v581_v16  ;;  %v617_v16 = vsub.f32 %v4589_v37, %v616_v48  ;;  %544 = vmatpush.msra.mxu0 %v4586_v11 }
 0x309   :  { %749 = vmatpush.msra.mxu3 %v4519_v2  ;;  %706 = vmatpush.msra.mxu2 %v4606_v44 }
 0x30a   :  { %583 = vmatpush.msra.mxu1 %v582_v25  ;;  %v634_v25 = vand.u32 4294901760, %v4620_v55 }
 0x30b   :  { %751 = vmatpush.msra.mxu3 %v4578_v31  ;;  %709 = vmatpush.msra.mxu2 %v4620_v55 }
 0x30c   :  { %589 = vmatpush.msra.mxu1 %v588_v33  ;;  %v618_v33 = vand.u32 4294901760, %v617_v16  ;;  %v635_v47 = vsub.f32 %v4620_v55, %v634_v25  ;;  %v652_v16 = vand.u32 4294901760, %v4664_v39 }
 0x30d   :  { %753 = vmatpush.msra.mxu3 %v4582_v34 }
 0x30e   :  { %495 = vmatmul.f32.gmra.mxu3 %v323_v38  ;;  %v4591_v38 = vand.u32 4294901760, %v511_v28  ;;  %595 = vmatpush.msra.mxu1 %v594_v41 }
 0x30f   :  { %755 = vmatpush.msra.mxu3 %v4584_v35 }
 0x310   :  { %601 = vmatpush.msra.mxu1 %v600_v53  ;;  %v646_v53 = vand.u32 4294901760, %v4650_v26  ;;  %546 = vmatpush.msra.mxu0 %v4591_v38 }
 0x311   :  { %757 = vmatpush.msra.mxu3 %v4586_v11 }
 0x312   :  { %607 = vmatpush.msra.mxu1 %v606_v15  ;;  %548 = vmatpush.msra.mxu0 %v4622_v59 }
 0x313   :  { %759 = vmatpush.msra.mxu3 %v4591_v38 }
 0x314   :  { %613 = vmatpush.msra.mxu1 %v612_v20  ;;  %550 = vmatpush.msra.mxu0 %v4637_v18 }
 0x315   :  { %761 = vmatpush.msra.mxu3 %v4622_v59 }
 0x316   :  { %619 = vmatpush.msra.mxu1 %v618_v33  ;;  %v653_v33 = vsub.f32 %v4664_v39, %v652_v16 }
 0x317   :  { %763 = vmatpush.msra.mxu3 %v4637_v18 }
 0x36b   :  { %v428_v40 = vpop.f32.mrf.mxu1 }
 0x36d   :  { %v397_v23 = vpop.f32.mrf.mxu0 }
 0x370   :  { %v321_v46 = vpop.f32.mrf.mxu2 }
 0x371   :  { %v322_v9 = vadd.f32 %v321_v46, %v281_v60 }
 0x373   :  { %v434_v42 = vpop.f32.mrf.mxu1 }
 0x375   :  { %v402_v22 = vpop.f32.mrf.mxu0 }
 0x379   :  { %v365_v61 = vpop.f32.mrf.mxu3 }
 0x37a   :  { %v366_v19 = vadd.f32 %v365_v61, %v322_v9  ;;  %v4625_v9 = vsub.f32 %v511_v28, %v4591_v38 }
 0x37b   :  { %v329_v10 = vpop.f32.mrf.mxu2 }
 0x37c   :  { %v398_v36 = vadd.f32 %v397_v23, %v366_v19  ;;  %v330_v45 = vadd.f32 %v329_v10, %v286_v32  ;;  %v508_v10 = vld [vmem:[%s6768_s1 + $0x8] sm:$0xff]  ;;  %712 = vmatpush.msra.mxu2 %v4625_v9  ;;  %s4399_s1 = smov 116  }
 0x37d   :  { %v4652_v28 = vand.u32 4294901760, %v508_v10 }
 0x37e   :  { %v429_v61 = vadd.f32 %v428_v40, %v398_v36  ;;  %v629_v36 = vsub.f32 %v4606_v44, %v628_v17  ;;  %v4666_v40 = vand.u32 4294901760, %v507_v21  ;;  %715 = vmatpush.msra.mxu2 %v4650_v26 }
 0x37f   :  { %v4677_v49 = vsub.f32 %v508_v10, %v4652_v28  ;;  %552 = vmatpush.msra.mxu0 %v4652_v28  ;;  %765 = vmatpush.msra.mxu3 %v4652_v28 }
 0x380   :  { %v4689_v10 = vsub.f32 %v507_v21, %v4666_v40  ;;  %718 = vmatpush.msra.mxu2 %v4664_v39 }
 0x381   :  { %v369_v1 = vpop.f32.mrf.mxu3  ;;  %554 = vmatpush.msra.mxu0 %v4666_v40  ;;  %767 = vmatpush.msra.mxu3 %v4666_v40 }
 0x382   :  { %v370_v60 = vadd.f32 %v369_v1, %v330_v45  ;;  %v640_v1 = vand.u32 4294901760, %v4625_v9  ;;  %721 = vmatpush.msra.mxu2 %v4677_v49 }
 0x383   :  { %v464_v46 = vpop.f32.mrf.mxu2  ;;  %784 = vmatpush.msrb.mxu0 %v574_v5 }
 0x384   :  { %v465_v19 = vadd.f32 %v464_v46, %v429_v61  ;;  %v403_v29 = vadd.f32 %v402_v22, %v370_v60  ;;  %v624_v46 = vand.u32 4294901760, %v623_v24  ;;  %v630_v61 = vand.u32 4294901760, %v629_v36  ;;  %724 = vmatpush.msra.mxu2 %v4689_v10 }
 0x385   :  { %v641_v15 = vsub.f32 %v4625_v9, %v640_v1  ;;  %v636_v22 = vand.u32 4294901760, %v635_v47  ;;  %v658_v24 = vand.u32 4294901760, %v4677_v49  ;;  %v664_v36 = vand.u32 4294901760, %v4689_v10  ;;  %788 = vmatpush.msrb.mxu0 %v580_v6 }
 0x386   :  { %v435_v60 = vadd.f32 %v434_v42, %v403_v29  ;;  %625 = vmatpush.msra.mxu1 %v624_v46  ;;  %v654_v47 = vand.u32 4294901760, %v653_v33 }
 0x387   :  { %v642_v21 = vand.u32 4294901760, %v641_v15  ;;  %v659_v46 = vsub.f32 %v4677_v49, %v658_v24  ;;  %792 = vmatpush.msrb.mxu0 %v586_v7 }
 0x388   :  { %631 = vmatpush.msra.mxu1 %v630_v61 }
 0x389   :  { %v492_v23 = vpop.f32.mrf.mxu3  ;;  %v660_v61 = vand.u32 4294901760, %v659_v46  ;;  %796 = vmatpush.msrb.mxu0 %v592_v12 }
 0x38a   :  { %v4654_v32 = vadd.f32 %v492_v23, %v465_v19  ;;  %v647_v23 = vsub.f32 %v4650_v26, %v646_v53  ;;  %637 = vmatpush.msra.mxu1 %v636_v22 }
 0x38b   :  { %v468_v45 = vpop.f32.mrf.mxu2  ;;  %800 = vmatpush.msrb.mxu0 %v598_v13 }
 0x38c   :  { %v499_v41 = vmax.f32 %v4654_v32, 0.0  ;;  %v469_v19 = vadd.f32 %v468_v45, %v435_v60  ;;  %v648_v45 = vand.u32 4294901760, %v647_v23  ;;  %643 = vmatpush.msra.mxu1 %v642_v21  ;;  %v665_v60 = vsub.f32 %v4689_v10, %v664_v36 }
 0x38d   :  { %804 = vmatpush.msrb.mxu0 %v604_v27 }
 0x38e   :  { %501 = vrot.lane.b32.xlu0 %v499_v41, %s4397_s26  ;;  %649 = vmatpush.msra.mxu1 %v648_v45  ;;  %v666_v15 = vand.u32 4294901760, %v665_v60 }
 0x38f   :  { %808 = vmatpush.msrb.mxu0 %v610_v30 }
 0x390   :  { %655 = vmatpush.msra.mxu1 %v654_v47 }
 0x391   :  { %v496_v20 = vpop.f32.mrf.mxu3  ;;  %812 = vmatpush.msrb.mxu0 %v616_v48 }
 0x392   :  { %v4698_v29 = vadd.f32 %v496_v20, %v469_v19  ;;  %661 = vmatpush.msra.mxu1 %v660_v61 }
 0x393   :  { %816 = vmatpush.msrb.mxu0 %v622_v54 }
 0x394   :  { %v500_v42 = vmax.f32 %v4698_v29, 0.0  ;;  %667 = vmatpush.msra.mxu1 %v666_v15 }
 0x395   :  { %820 = vmatpush.msrb.mxu0 %v628_v17 }
 0x396   :  { %503 = vrot.lane.b32.xlu1 %v500_v42, %s4397_s26  ;;  %855 = vmatpush.msrb.mxu1 %v4485_v50 }
 0x397   :  { %824 = vmatpush.msrb.mxu0 %v634_v25 }
 0x398   :  { %857 = vmatpush.msrb.mxu1 %v4487_v51 }
 0x399   :  { %828 = vmatpush.msrb.mxu0 %v640_v1 }
 0x39a   :  { %859 = vmatpush.msrb.mxu1 %v4489_v52 }
 0x39b   :  { %832 = vmatpush.msrb.mxu0 %v646_v53 }
 0x39c   :  { %861 = vmatpush.msrb.mxu1 %v4500_v56 }
 0x39d   :  { %836 = vmatpush.msrb.mxu0 %v652_v16 }
 0x39e   :  { %863 = vmatpush.msrb.mxu1 %v4502_v57 }
 0x39f   :  { %840 = vmatpush.msrb.mxu0 %v658_v24 }
 0x3a0   :  { %865 = vmatpush.msrb.mxu1 %v4504_v58 }
 0x3a1   :  { %844 = vmatpush.msrb.mxu0 %v664_v36 }
 0x3a2   :  { %867 = vmatpush.msrb.mxu1 %v4519_v2 }
 0x3a4   :  { %869 = vmatpush.msrb.mxu1 %v4578_v31 }
 0x3a6   :  { %871 = vmatpush.msrb.mxu1 %v4582_v34 }
 0x3a8   :  { %873 = vmatpush.msrb.mxu1 %v4584_v35 }
 0x3aa   :  { %875 = vmatpush.msrb.mxu1 %v4586_v11 }
 0x3ac   :  { %877 = vmatpush.msrb.mxu1 %v4591_v38 }
 0x3ae   :  { %879 = vmatpush.msrb.mxu1 %v4622_v59 }
 0x3b0   :  { %881 = vmatpush.msrb.mxu1 %v4637_v18 }
 0x3b2   :  { %883 = vmatpush.msrb.mxu1 %v4652_v28 }
 0x3b4   :  { %885 = vmatpush.msrb.mxu1 %v4666_v40 }
 0x400   :  { %v502_v50 = vpop.permute.xlu0 %501 }
 0x401   :  { %v505_v51 = vmax.f32 %v499_v41, %v502_v50 }
 0x403   :  { %v555_v52 = vand.u32 4294901760, %v505_v51 }
 0x405   :  { %v556_v56 = vsub.f32 %v505_v51, %v555_v52  ;;  %669 = vmatmul.f32.vlgmr.msra.gmra.mxu1 %v555_v52 }
 0x407   :  { %v557_v57 = vand.u32 4294901760, %v556_v56  ;;  %727 = vmatmul.f32.vlgmr.msra.gmra.mxu2 %v556_v56 }
 0x408   :  { %v504_v58 = vpop.permute.xlu1 %503 }
 0x409   :  { %v558_v62 = vsub.f32 %v556_v56, %v557_v57  ;;  %v506_v63 = vmax.f32 %v500_v42, %v504_v58  ;;  %771 = vmatmul.f32.vlgmr.msra.gmra.mxu3 %v557_v57 }
 0x40b   :  { %v563_v0 = vand.u32 4294901760, %v506_v63  ;;  %v559_v2 = vand.u32 4294901760, %v558_v62 }
 0x40d   :  { %v564_v3 = vsub.f32 %v506_v63, %v563_v0  ;;  %560 = vmatmul.f32.vlgmr.msra.gmra.mxu0 %v559_v2  ;;  %673 = vmatmul.f32.gmra.mxu1 %v563_v0 }
 0x40f   :  { %732 = vmatmul.f32.gmra.mxu2 %v564_v3  ;;  %v565_v4 = vand.u32 4294901760, %v564_v3 }
 0x411   :  { %777 = vmatmul.f32.gmra.mxu3 %v565_v4  ;;  %v566_v5 = vsub.f32 %v564_v3, %v565_v4 }
 0x413   :  { %v567_v6 = vand.u32 4294901760, %v566_v5 }
 0x415   :  { %568 = vmatmul.f32.gmra.mxu0 %v567_v6  ;;  %887 = vmatmul.f32.vlgmr.msrb.gmra.mxu1 %v555_v52 }
 0x41d   :  { %846 = vmatmul.f32.vlgmr.msrb.gmra.mxu0 %v555_v52  ;;  %891 = vmatmul.f32.gmra.mxu1 %v563_v0 }
 0x425   :  { %850 = vmatmul.f32.gmra.mxu0 %v563_v0 }
 0x482   :  { %v670_v7 = vpop.f32.mrf.mxu1 }
 0x48a   :  { %v561_v8 = vpop.f32.mrf.mxu0  ;;  %v674_v12 = vpop.f32.mrf.mxu1 }
 0x48b   :  { %v671_v13 = vadd.f32 %v670_v7, %v561_v8  ;;  %v728_v14 = vpop.f32.mrf.mxu2 }
 0x48c   :  { %v772_v31 = vpop.f32.mrf.mxu3 }
 0x48d   :  { %v729_v30 = vadd.f32 %v728_v14, %v671_v13 }
 0x48f   :  { %v773_v34 = vadd.f32 %v772_v31, %v729_v30 }
 0x492   :  { %v569_v27 = vpop.f32.mrf.mxu0  ;;  %v888_v11 = vpop.f32.mrf.mxu1 }
 0x493   :  { %v675_v35 = vadd.f32 %v674_v12, %v569_v27  ;;  %v733_v43 = vpop.f32.mrf.mxu2 }
 0x494   :  { %v778_v54 = vpop.f32.mrf.mxu3 }
 0x495   :  { %v734_v44 = vadd.f32 %v733_v43, %v675_v35 }
 0x497   :  { %v779_v55 = vadd.f32 %v778_v54, %v734_v44  ;;  %v962_v44 = vld [vmem:[%s6769_s2] sm:$0xff] }
 0x49a   :  { %v847_v37 = vpop.f32.mrf.mxu0  ;;  %v892_v17 = vpop.f32.mrf.mxu1 }
 0x49b   :  { %v848_v38 = vadd.f32 %v847_v37, %v773_v34 }
 0x49d   :  { %v889_v48 = vadd.f32 %v888_v11, %v848_v38 }
 0x49f   :  { %896 = vst.msk [vmem:[#allocation2] sm:$0xff] %vm895_vm1, %v889_v48  ;;  %940 = vrot.lane.b32.xlu2 %v889_v48, %s4399_s1  ;;  %948 = vrot.lane.b32.xlu0 %v889_v48, %s4400_s12 }
 0x4a2   :  { %v851_v59 = vpop.f32.mrf.mxu0 }
 0x4a3   :  { %v852_v9 = vadd.f32 %v851_v59, %v779_v55 }
 0x4a5   :  { %v893_v18 = vadd.f32 %v892_v17, %v852_v9 }
 0x4a7   :  { %897 = vst.msk [vmem:[#allocation2 + $0x8] sm:$0xff] %vm895_vm1, %v893_v18  ;;  %934 = vrot.lane.b32.xlu0 %v893_v18, %s4401_s13  ;;  %942 = vrot.lane.b32.xlu1 %v893_v18, %s4399_s1 }
 0x4a8   :  { %950 = vrot.lane.b32.xlu2 %v893_v18, %s4400_s12 }
 0x4af   :  { %924 = vrot.lane.b32.xlu0 %v889_v48, %s4391_s21  ;;  %932 = vrot.lane.b32.xlu1 %v889_v48, %s4401_s13 }
 0x4b0   :  { %926 = vrot.lane.b32.xlu2 %v893_v18, %s4391_s21 }
 0x4b7   :  { %910 = vrot.lane.b32.xlu0 %v893_v18, %s4397_s26  ;;  %918 = vrot.lane.b32.xlu1 %v893_v18, %s4402_s14 }
 0x4b8   :  { %916 = vrot.lane.b32.xlu2 %v889_v48, %s4402_s14 }
 0x4bf   :  { %900 = vrot.lane.b32.xlu0 %v889_v48, %s4393_s23  ;;  %908 = vrot.lane.b32.xlu1 %v889_v48, %s4397_s26 }
 0x4c0   :  { %902 = vrot.lane.b32.xlu2 %v893_v18, %s4393_s23 }
 0x4f9   :  { %v941_v25 = vpop.permute.xlu2 %940 }
 0x4fa   :  { %946 = vst.msk [vmem:[#allocation2 + $0x60] sm:$0xff] %vm895_vm1, %v941_v25 }
 0x501   :  { %v1038_v24 = vld [vmem:[#allocation2 + $0x60] sm:$0xff] }
 0x502   :  { %v951_v26 = vpop.permute.xlu2 %950  ;;  %v4807_v21 = vand.u32 4294901760, %v1038_v24 }
 0x503   :  { %955 = vst.msk [vmem:[#allocation2 + $0x78] sm:$0xff] %vm895_vm1, %v951_v26 }
 0x504   :  { %v4815_v47 = vsub.f32 %v1038_v24, %v4807_v21 }
 0x506   :  { %v1449_v58 = vand.u32 4294901760, %v4815_v47 }
 0x508   :  { %v1450_v4 = vsub.f32 %v4815_v47, %v1449_v58 }
 0x50a   :  { %v927_v28 = vpop.permute.xlu2 %926  ;;  %v1041_v32 = vld [vmem:[#allocation2 + $0x78] sm:$0xff]  ;;  %v1451_v31 = vand.u32 4294901760, %v1450_v4 }
 0x50b   :  { %931 = vst.msk [vmem:[#allocation2 + $0x48] sm:$0xff] %vm895_vm1, %v927_v28  ;;  %v4783_v1 = vand.u32 4294901760, %v1041_v32  ;;  %v4895_v28 = vand.u32 4294901760, %v962_v44 }
 0x50d   :  { %1141 = vmatpush.msrb.mxu2 %v4783_v1  ;;  %1864 = vmatpush.msra.mxu1 %v4783_v1  ;;  %v4788_v39 = vsub.f32 %v1041_v32, %v4783_v1  ;;  %v4916_v24 = vsub.f32 %v962_v44, %v4895_v28 }
 0x50f   :  { %1656 = vmatpush.msra.mxu0 %v4788_v39  ;;  %v1431_v40 = vand.u32 4294901760, %v4788_v39 }
 0x511   :  { %v949_v41 = vpop.permute.xlu0 %948  ;;  %v1432_v53 = vsub.f32 %v4788_v39, %v1431_v40 }
 0x512   :  { %954 = vst.msk [vmem:[#allocation2 + $0x70] sm:$0xff] %vm895_vm1, %v949_v41  ;;  %v917_v49 = vpop.permute.xlu2 %916  ;;  %v1035_v50 = vld [vmem:[#allocation2 + $0x48] sm:$0xff] }
 0x513   :  { %922 = vst.msk [vmem:[#allocation2 + $0x30] sm:$0xff] %vm895_vm1, %v917_v49  ;;  %v1433_v16 = vand.u32 4294901760, %v1432_v53  ;;  %v4831_v57 = vand.u32 4294901760, %v1035_v50 }
 0x515   :  { %1434 = vmatpush.msrb.mxu3 %v1433_v16  ;;  %v4848_v6 = vsub.f32 %v1035_v50, %v4831_v57 }
 0x517   :  { %v1467_v11 = vand.u32 4294901760, %v4848_v6 }
 0x519   :  { %v935_v10 = vpop.permute.xlu0 %934  ;;  %v943_v19 = vpop.permute.xlu1 %942  ;;  %v1040_v20 = vld [vmem:[#allocation2 + $0x70] sm:$0xff]  ;;  %v1468_v59 = vsub.f32 %v4848_v6, %v1467_v11 }
 0x51a   :  { %939 = vst.msk [vmem:[#allocation2 + $0x58] sm:$0xff] %vm895_vm1, %v935_v10  ;;  %v903_v22 = vpop.permute.xlu2 %902  ;;  %v4798_v23 = vand.u32 4294901760, %v1040_v20  ;;  %v1032_v12 = vld [vmem:[#allocation2 + $0x30] sm:$0xff] }
 0x51b   :  { %947 = vst.msk [vmem:[#allocation2 + $0x68] sm:$0xff] %vm895_vm1, %v943_v19  ;;  %v4868_v35 = vand.u32 4294901760, %v1032_v12  ;;  %v1469_v16 = vand.u32 4294901760, %v1468_v59 }
 0x51c   :  { %907 = vst.msk [vmem:[#allocation2 + $0x18] sm:$0xff] %vm895_vm1, %v903_v22  ;;  %1143 = vmatpush.msrb.mxu2 %v4798_v23  ;;  %1866 = vmatpush.msra.mxu1 %v4798_v23  ;;  %v4805_v29 = vsub.f32 %v1040_v20, %v4798_v23  ;;  %v1027_v22 = vld [vmem:[#allocation2 + $0x8] sm:$0xff] }
 0x51d   :  { %v4888_v17 = vsub.f32 %v1032_v12, %v4868_v35  ;;  %v1174_v12 = vand.u32 4294901760, %v4916_v24 }
 0x51e   :  { %1659 = vmatpush.msra.mxu0 %v4805_v29  ;;  %v1437_v33 = vand.u32 4294901760, %v4805_v29 }
 0x51f   :  { %v1485_v20 = vand.u32 4294901760, %v4888_v17 }
 0x520   :  { %v1438_v36 = vsub.f32 %v4805_v29, %v1437_v33 }
 0x521   :  { %v925_v42 = vpop.permute.xlu0 %924  ;;  %v933_v45 = vpop.permute.xlu1 %932  ;;  %v1037_v46 = vld [vmem:[#allocation2 + $0x58] sm:$0xff]  ;;  %v1486_v50 = vsub.f32 %v4888_v17, %v1485_v20 }
 0x522   :  { %930 = vst.msk [vmem:[#allocation2 + $0x40] sm:$0xff] %vm895_vm1, %v925_v42  ;;  %v1039_v60 = vld [vmem:[#allocation2 + $0x68] sm:$0xff]  ;;  %v1439_v61 = vand.u32 4294901760, %v1438_v36  ;;  %v4818_v15 = vand.u32 4294901760, %v1037_v46 }
 0x523   :  { %938 = vst.msk [vmem:[#allocation2 + $0x50] sm:$0xff] %vm895_vm1, %v933_v45  ;;  %v4821_v51 = vand.u32 4294901760, %v1039_v60  ;;  %v1029_v26 = vld [vmem:[#allocation2 + $0x18] sm:$0xff] }
 0x524   :  { %1440 = vmatpush.msrb.mxu3 %v1439_v61  ;;  %v4824_v52 = vsub.f32 %v1037_v46, %v4818_v15  ;;  %v4911_v19 = vand.u32 4294901760, %v1029_v26  ;;  %v1026_v46 = vld [vmem:[#allocation2] sm:$0xff] }
 0x525   :  { %1145 = vmatpush.msrb.mxu2 %v4821_v51  ;;  %1868 = vmatpush.msra.mxu1 %v4821_v51  ;;  %v4829_v56 = vsub.f32 %v1039_v60, %v4821_v51  ;;  %v964_v60 = vld [vmem:[%s6769_s2 + $0x10] sm:$0xff] }
 0x526   :  { %v1455_v63 = vand.u32 4294901760, %v4824_v52 }
 0x527   :  { %1147 = vmatpush.msrb.mxu2 %v4807_v21  ;;  %1662 = vmatpush.msra.mxu0 %v4829_v56  ;;  %v1443_v62 = vand.u32 4294901760, %v4829_v56 }
 0x528   :  { %1870 = vmatpush.msra.mxu1 %v4807_v21  ;;  %v1456_v27 = vsub.f32 %v4824_v52, %v1455_v63 }
 0x529   :  { %1149 = vmatpush.msrb.mxu2 %v4818_v15  ;;  %1665 = vmatpush.msra.mxu0 %v4815_v47  ;;  %v911_v0 = vpop.permute.xlu0 %910  ;;  %v919_v2 = vpop.permute.xlu1 %918  ;;  %v1444_v3 = vsub.f32 %v4829_v56, %v1443_v62  ;;  %v1034_v5 = vld [vmem:[#allocation2 + $0x40] sm:$0xff] }
 0x52a   :  { %1872 = vmatpush.msra.mxu1 %v4818_v15  ;;  %915 = vst.msk [vmem:[#allocation2 + $0x28] sm:$0xff] %vm895_vm1, %v911_v0  ;;  %v1036_v7 = vld [vmem:[#allocation2 + $0x50] sm:$0xff]  ;;  %v4852_v8 = vand.u32 4294901760, %v1034_v5  ;;  %v1457_v37 = vand.u32 4294901760, %v1456_v27 }
 0x52b   :  { %923 = vst.msk [vmem:[#allocation2 + $0x38] sm:$0xff] %vm895_vm1, %v919_v2  ;;  %1668 = vmatpush.msra.mxu0 %v4824_v52  ;;  %v4856_v13 = vand.u32 4294901760, %v1036_v7  ;;  %v1445_v14 = vand.u32 4294901760, %v1444_v3  ;;  %v4934_v2 = vsub.f32 %v1029_v26, %v4911_v19  ;;  %v4936_v3 = vand.u32 4294901760, %v1027_v22  ;;  %v972_v52 = vld [vmem:[%s6769_s2 + $0x50] sm:$0xff] }
 0x52c   :  { %v4862_v30 = vsub.f32 %v1034_v5, %v4852_v8 }
 0x52d   :  { %1151 = vmatpush.msrb.mxu2 %v4856_v13  ;;  %1446 = vmatpush.msrb.mxu3 %v1445_v14  ;;  %v4866_v34 = vsub.f32 %v1036_v7, %v4856_v13  ;;  %v4942_v7 = vand.u32 4294901760, %v1026_v46  ;;  %v6773_v59 = vand.u32 4294901760, %v4934_v2 }
 0x52e   :  { %1874 = vmatpush.msra.mxu1 %v4856_v13  ;;  %v1473_v43 = vand.u32 4294901760, %v4862_v30 }
 0x52f   :  { %1153 = vmatpush.msrb.mxu2 %v4831_v57  ;;  %1452 = vmatpush.msrb.mxu3 %v1451_v31  ;;  %v1461_v38 = vand.u32 4294901760, %v4866_v34 }
 0x530   :  { %1671 = vmatpush.msra.mxu0 %v4866_v34  ;;  %1876 = vmatpush.msra.mxu1 %v4831_v57  ;;  %v1474_v53 = vsub.f32 %v4862_v30, %v1473_v43 }
 0x531   :  { %1155 = vmatpush.msrb.mxu2 %v4852_v8  ;;  %1458 = vmatpush.msrb.mxu3 %v1457_v37  ;;  %v901_v48 = vpop.permute.xlu0 %900  ;;  %v909_v54 = vpop.permute.xlu1 %908  ;;  %v1462_v55 = vsub.f32 %v4866_v34, %v1461_v38  ;;  %v1031_v9 = vld [vmem:[#allocation2 + $0x28] sm:$0xff]  ;;  %v4950_v37 = vand.u32 4294901760, %v964_v60 }
 0x532   :  { %1674 = vmatpush.msra.mxu0 %v4848_v6  ;;  %1878 = vmatpush.msra.mxu1 %v4852_v8  ;;  %906 = vst.msk [vmem:[#allocation2 + $0x10] sm:$0xff] %vm895_vm1, %v901_v48  ;;  %v1033_v18 = vld [vmem:[#allocation2 + $0x38] sm:$0xff]  ;;  %v4893_v25 = vand.u32 4294901760, %v1031_v9  ;;  %v1475_v36 = vand.u32 4294901760, %v1474_v53  ;;  %v1487_v48 = vand.u32 4294901760, %v1486_v50  ;;  %v974_v6 = vld [vmem:[%s6769_s2 + $0x60] sm:$0xff] }
 0x533   :  { %914 = vst.msk [vmem:[#allocation2 + $0x20] sm:$0xff] %vm895_vm1, %v909_v54  ;;  %v4898_v32 = vand.u32 4294901760, %v1033_v18  ;;  %v1463_v41 = vand.u32 4294901760, %v1462_v55  ;;  %v4961_v55 = vsub.f32 %v1027_v22, %v4936_v3  ;;  %v966_v22 = vld [vmem:[%s6769_s2 + $0x20] sm:$0xff]  ;;  %v5072_v34 = vand.u32 4294901760, %v974_v6 }
 0x534   :  { %1677 = vmatpush.msra.mxu0 %v4862_v30  ;;  %v4905_v49 = vsub.f32 %v1031_v9, %v4893_v25  ;;  %v1175_v9 = vsub.f32 %v4916_v24, %v1174_v12 }
 0x535   :  { %1157 = vmatpush.msrb.mxu2 %v4898_v32  ;;  %1464 = vmatpush.msrb.mxu3 %v1463_v41  ;;  %v4909_v10 = vsub.f32 %v1033_v18, %v4898_v32  ;;  %v4967_v18 = vsub.f32 %v1026_v46, %v4942_v7  ;;  %v1504_v46 = vsub.f32 %v4934_v2, %v6773_v59 }
 0x536   :  { %1880 = vmatpush.msra.mxu1 %v4898_v32  ;;  %v1491_v45 = vand.u32 4294901760, %v4905_v49 }
 0x537   :  { %1159 = vmatpush.msrb.mxu2 %v4868_v35  ;;  %1470 = vmatpush.msrb.mxu3 %v1469_v16  ;;  %v1479_v42 = vand.u32 4294901760, %v4909_v10  ;;  %v1181_v16 = vsub.f32 %v964_v60, %v4950_v37  ;;  %v1515_v60 = vand.u32 4294901760, %v4961_v55  ;;  %v1521_v50 = vand.u32 4294901760, %v4967_v18 }
 0x538   :  { %1680 = vmatpush.msra.mxu0 %v4909_v10  ;;  %1882 = vmatpush.msra.mxu1 %v4868_v35  ;;  %v1492_v31 = vsub.f32 %v4905_v49, %v1491_v45 }
 0x539   :  { %1161 = vmatpush.msrb.mxu2 %v4893_v25  ;;  %1476 = vmatpush.msrb.mxu3 %v1475_v36  ;;  %v1480_v61 = vsub.f32 %v4909_v10, %v1479_v42  ;;  %v1028_v0 = vld [vmem:[#allocation2 + $0x10] sm:$0xff]  ;;  %v978_v10 = vld [vmem:[%s6769_s2 + $0x80] sm:$0xff] }
 0x53a   :  { %1683 = vmatpush.msra.mxu0 %v4888_v17  ;;  %1884 = vmatpush.msra.mxu1 %v4893_v25  ;;  %v1030_v4 = vld [vmem:[#allocation2 + $0x20] sm:$0xff]  ;;  %v4940_v5 = vand.u32 4294901760, %v1028_v0  ;;  %v1493_v26 = vand.u32 4294901760, %v1492_v31  ;;  %v4993_v31 = vand.u32 4294901760, %v966_v22 }
 0x53b   :  { %v4945_v14 = vand.u32 4294901760, %v1030_v4  ;;  %v1481_v27 = vand.u32 4294901760, %v1480_v61  ;;  %v1176_v61 = vand.u32 4294901760, %v1175_v9  ;;  %v1516_v9 = vsub.f32 %v4961_v55, %v1515_v60 }
 0x53c   :  { %1686 = vmatpush.msra.mxu0 %v4905_v49  ;;  %v4954_v44 = vsub.f32 %v1028_v0, %v4940_v5  ;;  %v1189_v59 = vsub.f32 %v966_v22, %v4993_v31 }
 0x53d   :  { %1163 = vmatpush.msrb.mxu2 %v4945_v14  ;;  %1482 = vmatpush.msrb.mxu3 %v1481_v27  ;;  %v4958_v54 = vsub.f32 %v1030_v4, %v4945_v14  ;;  %v1182_v27 = vand.u32 4294901760, %v1181_v16 }
 0x53e   :  { %1886 = vmatpush.msra.mxu1 %v4945_v14  ;;  %v6772_v53 = vand.u32 4294901760, %v4954_v44 }
 0x53f   :  { %1165 = vmatpush.msrb.mxu2 %v4911_v19  ;;  %1488 = vmatpush.msrb.mxu3 %v1487_v48  ;;  %v1497_v41 = vand.u32 4294901760, %v4958_v54  ;;  %v1505_v48 = vand.u32 4294901760, %v1504_v46  ;;  %v968_v46 = vld [vmem:[%s6769_s2 + $0x30] sm:$0xff] }
 0x540   :  { %1689 = vmatpush.msra.mxu0 %v4958_v54  ;;  %1888 = vmatpush.msra.mxu1 %v4911_v19  ;;  %v1510_v4 = vsub.f32 %v4954_v44, %v6772_v53  ;;  %v1183_v53 = vsub.f32 %v1181_v16, %v1182_v27  ;;  %v5016_v39 = vand.u32 4294901760, %v968_v46 }
 0x541   :  { %1167 = vmatpush.msrb.mxu2 %v4940_v5  ;;  %1494 = vmatpush.msrb.mxu3 %v1493_v26  ;;  %v1498_v36 = vsub.f32 %v4958_v54, %v1497_v41 }
 0x542   :  { %1692 = vmatpush.msra.mxu0 %v4934_v2  ;;  %1890 = vmatpush.msra.mxu1 %v4940_v5  ;;  %v1511_v26 = vand.u32 4294901760, %v1510_v4  ;;  %v1184_v22 = vand.u32 4294901760, %v1183_v53  ;;  %v1190_v4 = vand.u32 4294901760, %v1189_v59  ;;  %v1197_v29 = vsub.f32 %v968_v46, %v5016_v39  ;;  %v984_v53 = vld [vmem:[%s6769_s2 + $0xb0] sm:$0xff] }
 0x543   :  { %1169 = vmatpush.msrb.mxu2 %v4936_v3  ;;  %v1499_v0 = vand.u32 4294901760, %v1498_v36  ;;  %v1522_v36 = vsub.f32 %v4967_v18, %v1521_v50 }
 0x544   :  { %1695 = vmatpush.msra.mxu0 %v4954_v44  ;;  %1892 = vmatpush.msra.mxu1 %v4936_v3  ;;  %v1198_v47 = vand.u32 4294901760, %v1197_v29 }
 0x545   :  { %1171 = vmatpush.msrb.mxu2 %v4942_v7  ;;  %1500 = vmatpush.msrb.mxu3 %v1499_v0  ;;  %v1523_v0 = vand.u32 4294901760, %v1522_v36 }
 0x546   :  { %1698 = vmatpush.msra.mxu0 %v4961_v55  ;;  %1894 = vmatpush.msra.mxu1 %v4942_v7 }
 0x547   :  { %1177 = vmatmul.f32.vlgmr.msrb.gmra.mxu2 %v1176_v61  ;;  %1506 = vmatpush.msrb.mxu3 %v1505_v48  ;;  %v1517_v61 = vand.u32 4294901760, %v1516_v9  ;;  %v986_v9 = vld [vmem:[%s6769_s2 + $0xc0] sm:$0xff] }
 0x548   :  { %2091 = vmatpush.msra.mxu2 %v1431_v40  ;;  %1701 = vmatpush.msra.mxu0 %v4967_v18  ;;  %v1191_v40 = vsub.f32 %v1189_v59, %v1190_v4  ;;  %v5123_v46 = vand.u32 4294901760, %v986_v9 }
 0x549   :  { %1512 = vmatpush.msrb.mxu3 %v1511_v26  ;;  %1704 = vmatmul.f32.vlgmr.msra.gmra.mxu0 %v4916_v24  ;;  %v5095_v24 = vand.u32 4294901760, %v978_v10 }
 0x54a   :  { %2095 = vmatpush.msra.mxu2 %v1437_v33  ;;  %1898 = vmatmul.f32.vlgmr.msra.gmra.mxu1 %v1174_v12  ;;  %v970_v33 = vld [vmem:[%s6769_s2 + $0x40] sm:$0xff] }
 0x54b   :  { %1518 = vmatpush.msrb.mxu3 %v1517_v61  ;;  %v5034_v56 = vand.u32 4294901760, %v970_v33 }
 0x54c   :  { %2099 = vmatpush.msra.mxu2 %v1443_v62 }
 0x54d   :  { %1524 = vmatpush.msrb.mxu3 %v1523_v0  ;;  %v1269_v0 = vsub.f32 %v986_v9, %v5123_v46 }
 0x54e   :  { %2103 = vmatpush.msra.mxu2 %v1449_v58  ;;  %1526 = vmatmul.f32.vlgmr.msrb.gmra.mxu3 %v4895_v28  ;;  %v5053_v58 = vand.u32 4294901760, %v972_v52 }
 0x54f   :  { %1185 = vmatmul.f32.gmra.mxu2 %v1184_v22  ;;  %2282 = vmatpush.msra.mxu3 %v4783_v1  ;;  %v1192_v1 = vand.u32 4294901760, %v1191_v40  ;;  %v988_v22 = vld [vmem:[%s6769_s2 + $0xd0] sm:$0xff]  ;;  %v1270_v40 = vand.u32 4294901760, %v1269_v0 }
 0x550   :  { %2107 = vmatpush.msra.mxu2 %v1455_v63  ;;  %v6914_v63 = vand.u32 4294901760, %v4934_v2  ;;  %v980_v2 = vld [vmem:[%s6769_s2 + $0x90] sm:$0xff] }
 0x551   :  { %2284 = vmatpush.msra.mxu3 %v4798_v23  ;;  %1709 = vmatmul.f32.gmra.mxu0 %v1181_v16  ;;  %v1199_v23 = vsub.f32 %v1197_v29, %v1198_v47 }
 0x552   :  { %2111 = vmatpush.msra.mxu2 %v1461_v38  ;;  %1904 = vmatmul.f32.gmra.mxu1 %v1182_v27  ;;  %v976_v38 = vld [vmem:[%s6769_s2 + $0x70] sm:$0xff] }
 0x553   :  { %2286 = vmatpush.msra.mxu3 %v4821_v51  ;;  %v1205_v51 = vsub.f32 %v970_v33, %v5034_v56  ;;  %v1271_v33 = vsub.f32 %v1269_v0, %v1270_v40 }
 0x554   :  { %2115 = vmatpush.msra.mxu2 %v1467_v11  ;;  %v1221_v11 = vsub.f32 %v974_v6, %v5072_v34 }
 0x555   :  { %2288 = vmatpush.msra.mxu3 %v4807_v21  ;;  %v1200_v21 = vand.u32 4294901760, %v1199_v23  ;;  %v1272_v23 = vand.u32 4294901760, %v1271_v33 }
 0x556   :  { %2119 = vmatpush.msra.mxu2 %v1473_v43  ;;  %1530 = vmatmul.f32.gmra.mxu3 %v4950_v37  ;;  %v1222_v17 = vand.u32 4294901760, %v1221_v11 }
 0x557   :  { %1193 = vmatmul.f32.gmra.mxu2 %v1192_v1  ;;  %2290 = vmatpush.msra.mxu3 %v4818_v15  ;;  %v1206_v15 = vand.u32 4294901760, %v1205_v51 }
 0x558   :  { %2123 = vmatpush.msra.mxu2 %v1479_v42 }
 0x559   :  { %2292 = vmatpush.msra.mxu3 %v4856_v13  ;;  %1714 = vmatmul.f32.gmra.mxu0 %v1189_v59  ;;  %v1207_v62 = vsub.f32 %v1205_v51, %v1206_v15 }
 0x55a   :  { %2127 = vmatpush.msra.mxu2 %v1485_v20  ;;  %1910 = vmatmul.f32.gmra.mxu1 %v1190_v4 }
 0x55b   :  { %2294 = vmatpush.msra.mxu3 %v4831_v57  ;;  %v1213_v57 = vsub.f32 %v972_v52, %v5053_v58  ;;  %v1208_v13 = vand.u32 4294901760, %v1207_v62  ;;  %v992_v62 = vld [vmem:[%s6769_s2 + $0xf0] sm:$0xff] }
 0x55c   :  { %2131 = vmatpush.msra.mxu2 %v1491_v45  ;;  %v1237_v45 = vsub.f32 %v978_v10, %v5095_v24  ;;  %v5144_v6 = vand.u32 4294901760, %v992_v62 }
 0x55d   :  { %2296 = vmatpush.msra.mxu3 %v4852_v8  ;;  %v6915_v8 = vand.u32 4294901760, %v4954_v44  ;;  %v1214_v30 = vand.u32 4294901760, %v1213_v57  ;;  %v982_v44 = vld [vmem:[%s6769_s2 + $0xa0] sm:$0xff] }
 0x55e   :  { %2135 = vmatpush.msra.mxu2 %v1497_v41  ;;  %1534 = vmatmul.f32.gmra.mxu3 %v4993_v31  ;;  %v5109_v59 = vand.u32 4294901760, %v982_v44 }
 0x55f   :  { %1201 = vmatmul.f32.gmra.mxu2 %v1200_v21  ;;  %2298 = vmatpush.msra.mxu3 %v4898_v32  ;;  %v1223_v32 = vsub.f32 %v1221_v11, %v1222_v17 }
 0x560   :  { %2139 = vmatpush.msra.mxu2 %v6914_v63  ;;  %v1253_v41 = vsub.f32 %v982_v44, %v5109_v59  ;;  %v998_v44 = vld [vmem:[%s6769_s2 + $0x120] sm:$0xff] }
 0x561   :  { %2300 = vmatpush.msra.mxu3 %v4868_v35  ;;  %1719 = vmatmul.f32.gmra.mxu0 %v1197_v29  ;;  %v1215_v35 = vsub.f32 %v1213_v57, %v1214_v30  ;;  %v5130_v29 = vand.u32 4294901760, %v988_v22 }
 0x562   :  { %2143 = vmatpush.msra.mxu2 %v6915_v8  ;;  %1916 = vmatmul.f32.gmra.mxu1 %v1198_v47  ;;  %v990_v47 = vld [vmem:[%s6769_s2 + $0xe0] sm:$0xff] }
 0x563   :  { %2302 = vmatpush.msra.mxu3 %v4893_v25  ;;  %v1216_v43 = vand.u32 4294901760, %v1215_v35  ;;  %v5087_v25 = vand.u32 4294901760, %v976_v38  ;;  %v1277_v1 = vsub.f32 %v988_v22, %v5130_v29  ;;  %v5137_v52 = vand.u32 4294901760, %v990_v47  ;;  %v1042_v35 = vld [vmem:[#allocation2 + $0x80] sm:$0xff] }
 0x564   :  { %2147 = vmatpush.msra.mxu2 %v1515_v60  ;;  %v1254_v60 = vand.u32 4294901760, %v1253_v41 }
 0x565   :  { %2304 = vmatpush.msra.mxu3 %v4945_v14  ;;  %v1229_v49 = vsub.f32 %v976_v38, %v5087_v25 }
 0x566   :  { %2151 = vmatpush.msra.mxu2 %v1521_v50  ;;  %1538 = vmatmul.f32.gmra.mxu3 %v5016_v39  ;;  %v5116_v50 = vand.u32 4294901760, %v984_v53  ;;  %v1255_v27 = vsub.f32 %v1253_v41, %v1254_v60 }
 0x567   :  { %1209 = vmatmul.f32.gmra.mxu2 %v1208_v13  ;;  %2306 = vmatpush.msra.mxu3 %v4911_v19  ;;  %v1224_v19 = vand.u32 4294901760, %v1223_v32  ;;  %v1230_v20 = vand.u32 4294901760, %v1229_v49  ;;  %v1293_v13 = vsub.f32 %v992_v62, %v5144_v6 }
 0x568   :  { %v1261_v48 = vsub.f32 %v984_v53, %v5116_v50  ;;  %v1256_v26 = vand.u32 4294901760, %v1255_v27  ;;  %v1000_v27 = vld [vmem:[%s6769_s2 + $0x130] sm:$0xff] }
 0x569   :  { %2308 = vmatpush.msra.mxu3 %v4940_v5  ;;  %1724 = vmatmul.f32.gmra.mxu0 %v1205_v51  ;;  %v1231_v42 = vsub.f32 %v1229_v49, %v1230_v20  ;;  %v1238_v5 = vand.u32 4294901760, %v1237_v45  ;;  %v1278_v51 = vand.u32 4294901760, %v1277_v1  ;;  %v1294_v38 = vand.u32 4294901760, %v1293_v13 }
 0x56a   :  { %1922 = vmatmul.f32.gmra.mxu1 %v1206_v15  ;;  %v1262_v36 = vand.u32 4294901760, %v1261_v48  ;;  %v1285_v15 = vsub.f32 %v990_v47, %v5137_v52 }
 0x56b   :  { %2310 = vmatpush.msra.mxu3 %v4936_v3  ;;  %v1232_v3 = vand.u32 4294901760, %v1231_v42  ;;  %v1239_v12 = vsub.f32 %v1237_v45, %v1238_v5  ;;  %v1279_v21 = vsub.f32 %v1277_v1, %v1278_v51 }
 0x56c   :  { %v1263_v61 = vsub.f32 %v1261_v48, %v1262_v36  ;;  %v1286_v63 = vand.u32 4294901760, %v1285_v15 }
 0x56d   :  { %2312 = vmatpush.msra.mxu3 %v4942_v7  ;;  %v5102_v7 = vand.u32 4294901760, %v980_v2  ;;  %v1240_v54 = vand.u32 4294901760, %v1239_v12 }
 0x56e   :  { %1542 = vmatmul.f32.gmra.mxu3 %v5034_v56  ;;  %v1264_v4 = vand.u32 4294901760, %v1263_v61  ;;  %v1287_v8 = vsub.f32 %v1285_v15, %v1286_v63 }
 0x56f   :  { %1217 = vmatmul.f32.gmra.mxu2 %v1216_v43  ;;  %v1245_v14 = vsub.f32 %v980_v2, %v5102_v7 }
 0x571   :  { %1729 = vmatmul.f32.gmra.mxu0 %v1213_v57  ;;  %v1246_v55 = vand.u32 4294901760, %v1245_v14  ;;  %v1280_v57 = vand.u32 4294901760, %v1279_v21 }
 0x572   :  { %1928 = vmatmul.f32.gmra.mxu1 %v1214_v30  ;;  %v994_v30 = vld [vmem:[%s6769_s2 + $0x100] sm:$0xff] }
 0x573   :  { %v1247_v18 = vsub.f32 %v1245_v14, %v1246_v55  ;;  %v5151_v43 = vand.u32 4294901760, %v994_v30 }
 0x575   :  { %v1248_v16 = vand.u32 4294901760, %v1247_v18  ;;  %v1301_v10 = vsub.f32 %v994_v30, %v5151_v43  ;;  %v5165_v18 = vand.u32 4294901760, %v998_v44  ;;  %v1004_v30 = vld [vmem:[%s6769_s2 + $0x150] sm:$0xff] }
 0x576   :  { %1546 = vmatmul.f32.gmra.mxu3 %v5053_v58 }
 0x577   :  { %1225 = vmatmul.f32.gmra.mxu2 %v1224_v19  ;;  %v1302_v2 = vand.u32 4294901760, %v1301_v10 }
 0x579   :  { %1734 = vmatmul.f32.gmra.mxu0 %v1221_v11  ;;  %v1288_v11 = vand.u32 4294901760, %v1287_v8  ;;  %v1303_v12 = vsub.f32 %v1301_v10, %v1302_v2 }
 0x57a   :  { %1934 = vmatmul.f32.gmra.mxu1 %v1222_v17  ;;  %v2457_v17 = vand.u32 4294901760, %v1042_v35 }
 0x57c   :  { %2458 = vmatpush.msrb.mxu0 %v2457_v17  ;;  %v2732_v32 = vsub.f32 %v1042_v35, %v2457_v17  ;;  %3061 = vmatpush.msrb.mxu3 %v2457_v17 }
 0x57e   :  { %1550 = vmatmul.f32.gmra.mxu3 %v5072_v34  ;;  %v2733_v19 = vand.u32 4294901760, %v2732_v32  ;;  %2883 = vmatpush.msrb.mxu2 %v2732_v32 }
 0x57f   :  { %1233 = vmatmul.f32.gmra.mxu2 %v1232_v3 }
 0x580   :  { %v2734_v42 = vsub.f32 %v2732_v32, %v2733_v19  ;;  %3273 = vmatpush.msra.mxu0 %v2733_v19 }
 0x581   :  { %1739 = vmatmul.f32.gmra.mxu0 %v1229_v49  ;;  %v1295_v49 = vsub.f32 %v1293_v13, %v1294_v38 }
 0x582   :  { %1940 = vmatmul.f32.gmra.mxu1 %v1230_v20  ;;  %v996_v20 = vld [vmem:[%s6769_s2 + $0x110] sm:$0xff] }
 0x583   :  { %v5158_v3 = vand.u32 4294901760, %v996_v20 }
 0x586   :  { %1554 = vmatmul.f32.gmra.mxu3 %v5087_v25 }
 0x587   :  { %1241 = vmatmul.f32.gmra.mxu2 %v1240_v54  ;;  %v1304_v54 = vand.u32 4294901760, %v1303_v12 }
 0x589   :  { %1744 = vmatmul.f32.gmra.mxu0 %v1237_v45  ;;  %v1296_v45 = vand.u32 4294901760, %v1295_v49  ;;  %v5188_v49 = vand.u32 4294901760, %v1004_v30 }
 0x58a   :  { %1946 = vmatmul.f32.gmra.mxu1 %v1238_v5  ;;  %v2735_v5 = vand.u32 4294901760, %v2734_v42 }
 0x58c   :  { %2736 = vmatpush.msrb.mxu1 %v2735_v5  ;;  %v1006_v5 = vld [vmem:[%s6769_s2 + $0x160] sm:$0xff] }
 0x58e   :  { %1558 = vmatmul.f32.gmra.mxu3 %v5095_v24  ;;  %3419 = vmatpush.msra.mxu1 %v2457_v17 }
 0x58f   :  { %1249 = vmatmul.f32.gmra.mxu2 %v1248_v16 }
 0x591   :  { %1749 = vmatmul.f32.gmra.mxu0 %v1245_v14  ;;  %v1309_v14 = vsub.f32 %v996_v20, %v5158_v3 }
 0x592   :  { %1952 = vmatmul.f32.gmra.mxu1 %v1246_v55 }
 0x593   :  { %v1310_v55 = vand.u32 4294901760, %v1309_v14 }
 0x595   :  { %v1311_v53 = vsub.f32 %v1309_v14, %v1310_v55 }
 0x596   :  { %1562 = vmatmul.f32.gmra.mxu3 %v5102_v7 }
 0x597   :  { %1257 = vmatmul.f32.gmra.mxu2 %v1256_v26  ;;  %v1312_v9 = vand.u32 4294901760, %v1311_v53 }
 0x599   :  { %1754 = vmatmul.f32.gmra.mxu0 %v1253_v41 }
 0x59a   :  { %1958 = vmatmul.f32.gmra.mxu1 %v1254_v60  ;;  %v1317_v60 = vsub.f32 %v998_v44, %v5165_v18 }
 0x59c   :  { %v1318_v26 = vand.u32 4294901760, %v1317_v60 }
 0x59e   :  { %1566 = vmatmul.f32.gmra.mxu3 %v5109_v59 }
 0x59f   :  { %1265 = vmatmul.f32.gmra.mxu2 %v1264_v4 }
 0x5a1   :  { %1759 = vmatmul.f32.gmra.mxu0 %v1261_v48 }
 0x5a2   :  { %1964 = vmatmul.f32.gmra.mxu1 %v1262_v36  ;;  %v5172_v36 = vand.u32 4294901760, %v1000_v27 }
 0x5a4   :  { %v1325_v4 = vsub.f32 %v1000_v27, %v5172_v36 }
 0x5a6   :  { %1570 = vmatmul.f32.gmra.mxu3 %v5116_v50 }
 0x5a7   :  { %1273 = vmatmul.f32.gmra.mxu2 %v1272_v23 }
 0x5a9   :  { %1764 = vmatmul.f32.gmra.mxu0 %v1269_v0  ;;  %v1319_v0 = vsub.f32 %v1317_v60, %v1318_v26 }
 0x5aa   :  { %1970 = vmatmul.f32.gmra.mxu1 %v1270_v40  ;;  %v1002_v40 = vld [vmem:[%s6769_s2 + $0x140] sm:$0xff] }
 0x5ab   :  { %v1320_v23 = vand.u32 4294901760, %v1319_v0  ;;  %v5179_v21 = vand.u32 4294901760, %v1002_v40 }
 0x5ae   :  { %1574 = vmatmul.f32.gmra.mxu3 %v5123_v46 }
 0x5af   :  { %1281 = vmatmul.f32.gmra.mxu2 %v1280_v57 }
 0x5b1   :  { %1769 = vmatmul.f32.gmra.mxu0 %v1277_v1 }
 0x5b2   :  { %1976 = vmatmul.f32.gmra.mxu1 %v1278_v51  ;;  %v1326_v51 = vand.u32 4294901760, %v1325_v4 }
 0x5b6   :  { %1578 = vmatmul.f32.gmra.mxu3 %v5130_v29 }
 0x5b7   :  { %1289 = vmatmul.f32.gmra.mxu2 %v1288_v11 }
 0x5b9   :  { %1774 = vmatmul.f32.gmra.mxu0 %v1285_v15 }
 0x5ba   :  { %1982 = vmatmul.f32.gmra.mxu1 %v1286_v63  ;;  %v1327_v63 = vsub.f32 %v1325_v4, %v1326_v51 }
 0x5bc   :  { %v1328_v17 = vand.u32 4294901760, %v1327_v63  ;;  %v1010_v63 = vld [vmem:[%s6769_s2 + $0x180] sm:$0xff] }
 0x5be   :  { %1582 = vmatmul.f32.gmra.mxu3 %v5137_v52 }
 0x5bf   :  { %1297 = vmatmul.f32.gmra.mxu2 %v1296_v45 }
 0x5c1   :  { %1779 = vmatmul.f32.gmra.mxu0 %v1293_v13  ;;  %v1333_v13 = vsub.f32 %v1002_v40, %v5179_v21 }
 0x5c2   :  { %1988 = vmatmul.f32.gmra.mxu1 %v1294_v38 }
 0x5c3   :  { %v1334_v32 = vand.u32 4294901760, %v1333_v13 }
 0x5c5   :  { %v1335_v42 = vsub.f32 %v1333_v13, %v1334_v32 }
 0x5c6   :  { %1586 = vmatmul.f32.gmra.mxu3 %v5144_v6  ;;  %v1705_v41 = vpop.f32.mrf.mxu0 }
 0x5c7   :  { %1305 = vmatmul.f32.gmra.mxu2 %v1304_v54  ;;  %v1899_v16 = vpop.f32.mrf.mxu1  ;;  %v1336_v54 = vand.u32 4294901760, %v1335_v42 }
 0x5c9   :  { %1784 = vmatmul.f32.gmra.mxu0 %v1301_v10 }
 0x5ca   :  { %v1178_v48 = vpop.f32.mrf.mxu2  ;;  %1994 = vmatmul.f32.gmra.mxu1 %v1302_v2  ;;  %v1341_v2 = vsub.f32 %v1004_v30, %v5188_v49 }
 0x5ce   :  { %1590 = vmatmul.f32.gmra.mxu3 %v5151_v43  ;;  %v1710_v61 = vpop.f32.mrf.mxu0 }
 0x5cf   :  { %1313 = vmatmul.f32.gmra.mxu2 %v1312_v9  ;;  %v1905_v22 = vpop.f32.mrf.mxu1 }
 0x5d1   :  { %v1527_v33 = vpop.f32.mrf.mxu3  ;;  %1789 = vmatmul.f32.gmra.mxu0 %v1309_v14 }
 0x5d2   :  { %v1186_v1 = vpop.f32.mrf.mxu2  ;;  %v1528_v47 = vadd.f32 %v1527_v33, %v1178_v48  ;;  %2000 = vmatmul.f32.gmra.mxu1 %v1310_v55  ;;  %v1342_v55 = vand.u32 4294901760, %v1341_v2 }
 0x5d4   :  { %v1706_v15 = vadd.f32 %v1705_v41, %v1528_v47  ;;  %v5197_v41 = vand.u32 4294901760, %v1006_v5  ;;  %v1343_v27 = vsub.f32 %v1341_v2, %v1342_v55 }
 0x5d6   :  { %v5181_v62 = vadd.f32 %v1899_v16, %v1706_v15  ;;  %1594 = vmatmul.f32.gmra.mxu3 %v5158_v3  ;;  %v1715_v57 = vpop.f32.mrf.mxu0  ;;  %v1349_v9 = vsub.f32 %v1006_v5, %v5197_v41 }
 0x5d7   :  { %1321 = vmatmul.f32.gmra.mxu2 %v1320_v23  ;;  %v1911_v8 = vpop.f32.mrf.mxu1 }
 0x5d8   :  { %v1350_v40 = vand.u32 4294901760, %v1349_v9 }
 0x5d9   :  { %v1531_v35 = vpop.f32.mrf.mxu3  ;;  %1794 = vmatmul.f32.gmra.mxu0 %v1317_v60 }
 0x5da   :  { %v1194_v11 = vpop.f32.mrf.mxu2  ;;  %v1532_v38 = vadd.f32 %v1531_v35, %v1186_v1  ;;  %2006 = vmatmul.f32.gmra.mxu1 %v1318_v26  ;;  %v1008_v26 = vld [vmem:[%s6769_s2 + $0x170] sm:$0xff] }
 0x5db   :  { %v5206_v33 = vand.u32 4294901760, %v1008_v26 }
 0x5dc   :  { %v1711_v10 = vadd.f32 %v1710_v61, %v1532_v38  ;;  %v5215_v38 = vand.u32 4294901760, %v1010_v63 }
 0x5de   :  { %v5190_v19 = vadd.f32 %v1905_v22, %v1711_v10  ;;  %1598 = vmatmul.f32.gmra.mxu3 %v5165_v18  ;;  %v1720_v20 = vpop.f32.mrf.mxu0 }
 0x5df   :  { %1329 = vmatmul.f32.gmra.mxu2 %v1328_v17  ;;  %v1917_v45 = vpop.f32.mrf.mxu1 }
 0x5e1   :  { %v1535_v12 = vpop.f32.mrf.mxu3  ;;  %1799 = vmatmul.f32.gmra.mxu0 %v1325_v4  ;;  %v1344_v4 = vand.u32 4294901760, %v1343_v27 }
 0x5e2   :  { %v1202_v14 = vpop.f32.mrf.mxu2  ;;  %v1536_v44 = vadd.f32 %v1535_v12, %v1194_v11  ;;  %2012 = vmatmul.f32.gmra.mxu1 %v1326_v51  ;;  %v1351_v51 = vsub.f32 %v1349_v9, %v1350_v40 }
 0x5e4   :  { %v1716_v53 = vadd.f32 %v1715_v57, %v1536_v44  ;;  %v1357_v57 = vsub.f32 %v1008_v26, %v5206_v33  ;;  %v1352_v35 = vand.u32 4294901760, %v1351_v51 }
 0x5e6   :  { %v5199_v16 = vadd.f32 %v1911_v8, %v1716_v53  ;;  %1602 = vmatmul.f32.gmra.mxu3 %v5172_v36  ;;  %v1725_v60 = vpop.f32.mrf.mxu0  ;;  %v1358_v11 = vand.u32 4294901760, %v1357_v57 }
 0x5e7   :  { %1337 = vmatmul.f32.gmra.mxu2 %v1336_v54  ;;  %v1923_v48 = vpop.f32.mrf.mxu1 }
 0x5e9   :  { %v1539_v61 = vpop.f32.mrf.mxu3  ;;  %1804 = vmatmul.f32.gmra.mxu0 %v1333_v13 }
 0x5ea   :  { %v1210_v0 = vpop.f32.mrf.mxu2  ;;  %v1540_v22 = vadd.f32 %v1539_v61, %v1202_v14  ;;  %2018 = vmatmul.f32.gmra.mxu1 %v1334_v32 }
 0x5ec   :  { %v1721_v1 = vadd.f32 %v1720_v20, %v1540_v22  ;;  %v1359_v20 = vsub.f32 %v1357_v57, %v1358_v11 }
 0x5ee   :  { %v5208_v47 = vadd.f32 %v1917_v45, %v1721_v1  ;;  %1606 = vmatmul.f32.gmra.mxu3 %v5179_v21  ;;  %v1730_v23 = vpop.f32.mrf.mxu0  ;;  %v1365_v45 = vsub.f32 %v1010_v63, %v5215_v38  ;;  %v1360_v44 = vand.u32 4294901760, %v1359_v20 }
 0x5ef   :  { %1345 = vmatmul.f32.gmra.mxu2 %v1344_v4  ;;  %v1929_v15 = vpop.f32.mrf.mxu1 }
 0x5f0   :  { %v1366_v54 = vand.u32 4294901760, %v1365_v45 }
 0x5f1   :  { %v1543_v8 = vpop.f32.mrf.mxu3  ;;  %1809 = vmatmul.f32.gmra.mxu0 %v1341_v2  ;;  %v1012_v2 = vld [vmem:[%s6769_s2 + $0x190] sm:$0xff] }
 0x5f2   :  { %v1218_v13 = vpop.f32.mrf.mxu2  ;;  %v1544_v30 = vadd.f32 %v1543_v8, %v1210_v0  ;;  %2024 = vmatmul.f32.gmra.mxu1 %v1342_v55  ;;  %v5224_v55 = vand.u32 4294901760, %v1012_v2 }
 0x5f4   :  { %v1726_v17 = vadd.f32 %v1725_v60, %v1544_v30  ;;  %v1373_v61 = vsub.f32 %v1012_v2, %v5224_v55 }
 0x5f6   :  { %v5217_v32 = vadd.f32 %v1923_v48, %v1726_v17  ;;  %1610 = vmatmul.f32.gmra.mxu3 %v5188_v49  ;;  %v1735_v10 = vpop.f32.mrf.mxu0  ;;  %v1367_v48 = vsub.f32 %v1365_v45, %v1366_v54  ;;  %v1374_v1 = vand.u32 4294901760, %v1373_v61 }
 0x5f7   :  { %1353 = vmatmul.f32.gmra.mxu2 %v1352_v35  ;;  %v1935_v42 = vpop.f32.mrf.mxu1 }
 0x5f8   :  { %v1375_v8 = vsub.f32 %v1373_v61, %v1374_v1 }
 0x5f9   :  { %v1547_v5 = vpop.f32.mrf.mxu3  ;;  %1814 = vmatmul.f32.gmra.mxu0 %v1349_v9  ;;  %v1014_v9 = vld [vmem:[%s6769_s2 + $0x1a0] sm:$0xff] }
 0x5fa   :  { %v1226_v12 = vpop.f32.mrf.mxu2  ;;  %v1548_v14 = vadd.f32 %v1547_v5, %v1218_v13  ;;  %2030 = vmatmul.f32.gmra.mxu1 %v1350_v40  ;;  %v1368_v40 = vand.u32 4294901760, %v1367_v48 }
 0x5fc   :  { %v1731_v53 = vadd.f32 %v1730_v23, %v1548_v14  ;;  %v5233_v23 = vand.u32 4294901760, %v1014_v9 }
 0x5fe   :  { %v5226_v60 = vadd.f32 %v1929_v15, %v1731_v53  ;;  %1614 = vmatmul.f32.gmra.mxu3 %v5197_v41  ;;  %v1740_v27 = vpop.f32.mrf.mxu0  ;;  %v1381_v30 = vsub.f32 %v1014_v9, %v5233_v23 }
 0x5ff   :  { %1361 = vmatmul.f32.gmra.mxu2 %v1360_v44  ;;  %v1941_v26 = vpop.f32.mrf.mxu1 }
 0x600   :  { %v1382_v20 = vand.u32 4294901760, %v1381_v30 }
 0x601   :  { %v1551_v0 = vpop.f32.mrf.mxu3  ;;  %1819 = vmatmul.f32.gmra.mxu0 %v1357_v57  ;;  %v1016_v57 = vld [vmem:[%s6769_s2 + $0x1b0] sm:$0xff] }
 0x602   :  { %v1234_v22 = vpop.f32.mrf.mxu2  ;;  %v1552_v4 = vadd.f32 %v1551_v0, %v1226_v12  ;;  %2036 = vmatmul.f32.gmra.mxu1 %v1358_v11  ;;  %v1383_v14 = vsub.f32 %v1381_v30, %v1382_v20 }
 0x604   :  { %v1736_v51 = vadd.f32 %v1735_v10, %v1552_v4  ;;  %v1376_v10 = vand.u32 4294901760, %v1375_v8 }
 0x606   :  { %v5235_v15 = vadd.f32 %v1935_v42, %v1736_v51  ;;  %1618 = vmatmul.f32.gmra.mxu3 %v5206_v33  ;;  %v1745_v63 = vpop.f32.mrf.mxu0  ;;  %v5242_v42 = vand.u32 4294901760, %v1016_v57 }
 0x607   :  { %1369 = vmatmul.f32.gmra.mxu2 %v1368_v40  ;;  %v1947_v13 = vpop.f32.mrf.mxu1 }
 0x608   :  { %6916 = vst [vmem:[#allocation3_spill] sm:$0xff] %v5242_v42  ;;  %v1389_v53 = vsub.f32 %v1016_v57, %v5242_v42 }
 0x609   :  { %v1555_v35 = vpop.f32.mrf.mxu3  ;;  %1824 = vmatmul.f32.gmra.mxu0 %v1365_v45  ;;  %v1018_v45 = vld [vmem:[%s6769_s2 + $0x1c0] sm:$0xff] }
 0x60a   :  { %v1242_v11 = vpop.f32.mrf.mxu2  ;;  %v1556_v17 = vadd.f32 %v1555_v35, %v1234_v22  ;;  %2042 = vmatmul.f32.gmra.mxu1 %v1366_v54  ;;  %v5251_v0 = vand.u32 4294901760, %v1018_v45 }
 0x60c   :  { %v1741_v2 = vadd.f32 %v1740_v27, %v1556_v17  ;;  %v1384_v27 = vand.u32 4294901760, %v1383_v14  ;;  %6917 = vst [vmem:[#allocation4_spill] sm:$0xff] %v5251_v0  ;;  %v1397_v57 = vsub.f32 %v1018_v45, %v5251_v0 }
 0x60e   :  { %v5244_v5 = vadd.f32 %v1941_v26, %v1741_v2  ;;  %1622 = vmatmul.f32.gmra.mxu3 %v5215_v38  ;;  %v1750_v12 = vpop.f32.mrf.mxu0  ;;  %v1390_v26 = vand.u32 4294901760, %v1389_v53 }
 0x60f   :  { %1377 = vmatmul.f32.gmra.mxu2 %v1376_v10  ;;  %v1953_v44 = vpop.f32.mrf.mxu1 }
 0x610   :  { %v1391_v51 = vsub.f32 %v1389_v53, %v1390_v26 }
 0x611   :  { %v1559_v54 = vpop.f32.mrf.mxu3  ;;  %1829 = vmatmul.f32.gmra.mxu0 %v1373_v61  ;;  %v1020_v61 = vld [vmem:[%s6769_s2 + $0x1d0] sm:$0xff] }
 0x612   :  { %v1250_v48 = vpop.f32.mrf.mxu2  ;;  %v1560_v9 = vadd.f32 %v1559_v54, %v1242_v11  ;;  %2048 = vmatmul.f32.gmra.mxu1 %v1374_v1  ;;  %v5260_v17 = vand.u32 4294901760, %v1020_v61 }
 0x614   :  { %v1746_v22 = vadd.f32 %v1745_v63, %v1560_v9  ;;  %v1392_v63 = vand.u32 4294901760, %v1391_v51  ;;  %6918 = vst [vmem:[#allocation5_spill] sm:$0xff] %v5260_v17  ;;  %v1405_v9 = vsub.f32 %v1020_v61, %v5260_v17 }
 0x616   :  { %v5253_v4 = vadd.f32 %v1947_v13, %v1746_v22  ;;  %1626 = vmatmul.f32.gmra.mxu3 %v5224_v55  ;;  %v1755_v40 = vpop.f32.mrf.mxu0  ;;  %v1398_v13 = vand.u32 4294901760, %v1397_v57 }
 0x617   :  { %1385 = vmatmul.f32.gmra.mxu2 %v1384_v27  ;;  %v1959_v8 = vpop.f32.mrf.mxu1 }
 0x618   :  { %v1399_v45 = vsub.f32 %v1397_v57, %v1398_v13 }
 0x619   :  { %v1563_v1 = vpop.f32.mrf.mxu3  ;;  %1834 = vmatmul.f32.gmra.mxu0 %v1381_v30  ;;  %v1022_v30 = vld [vmem:[%s6769_s2 + $0x1e0] sm:$0xff] }
 0x61a   :  { %v1258_v35 = vpop.f32.mrf.mxu2  ;;  %v1564_v11 = vadd.f32 %v1563_v1, %v1250_v48  ;;  %2054 = vmatmul.f32.gmra.mxu1 %v1382_v20  ;;  %v5269_v22 = vand.u32 4294901760, %v1022_v30 }
 0x61c   :  { %v1751_v10 = vadd.f32 %v1750_v12, %v1564_v11  ;;  %v1400_v12 = vand.u32 4294901760, %v1399_v45  ;;  %6919 = vst [vmem:[#allocation6_spill] sm:$0xff] %v5269_v22 }
 0x61e   :  { %v5262_v2 = vadd.f32 %v1953_v44, %v1751_v10  ;;  %1630 = vmatmul.f32.gmra.mxu3 %v5233_v23  ;;  %v1760_v14 = vpop.f32.mrf.mxu0  ;;  %v1406_v44 = vand.u32 4294901760, %v1405_v9  ;;  %v1413_v10 = vsub.f32 %v1022_v30, %v5269_v22 }
 0x61f   :  { %1393 = vmatmul.f32.gmra.mxu2 %v1392_v63  ;;  %v1965_v54 = vpop.f32.mrf.mxu1 }
 0x620   :  { %v1407_v61 = vsub.f32 %v1405_v9, %v1406_v44 }
 0x621   :  { %v1567_v20 = vpop.f32.mrf.mxu3  ;;  %1839 = vmatmul.f32.gmra.mxu0 %v1389_v53  ;;  %v1024_v53 = vld [vmem:[%s6769_s2 + $0x1f0] sm:$0xff] }
 0x622   :  { %v1266_v48 = vpop.f32.mrf.mxu2  ;;  %v1568_v27 = vadd.f32 %v1567_v20, %v1258_v35  ;;  %2060 = vmatmul.f32.gmra.mxu1 %v1390_v26  ;;  %v5278_v20 = vand.u32 4294901760, %v1024_v53 }
 0x624   :  { %v1756_v51 = vadd.f32 %v1755_v40, %v1568_v27  ;;  %v1408_v40 = vand.u32 4294901760, %v1407_v61 }
 0x626   :  { %v5271_v1 = vadd.f32 %v1959_v8, %v1756_v51  ;;  %1634 = vmatmul.f32.gmra.mxu3 %v5242_v42  ;;  %v1765_v11 = vpop.f32.mrf.mxu0  ;;  %v1414_v8 = vand.u32 4294901760, %v1413_v10 }
 0x627   :  { %1401 = vmatmul.f32.gmra.mxu2 %v1400_v12  ;;  %v1971_v63 = vpop.f32.mrf.mxu1 }
 0x628   :  { %6920 = vst [vmem:[#allocation7_spill] sm:$0xff] %v5271_v1  ;;  %v1415_v30 = vsub.f32 %v1413_v10, %v1414_v8  ;;  %v1421_v1 = vsub.f32 %v1024_v53, %v5278_v20 }
 0x629   :  { %v1571_v26 = vpop.f32.mrf.mxu3  ;;  %1844 = vmatmul.f32.gmra.mxu0 %v1397_v57  ;;  %v963_v57 = vld [vmem:[%s6769_s2 + $0x8] sm:$0xff] }
 0x62a   :  { %v1274_v35 = vpop.f32.mrf.mxu2  ;;  %v1572_v45 = vadd.f32 %v1571_v26, %v1266_v48  ;;  %2066 = vmatmul.f32.gmra.mxu1 %v1398_v13  ;;  %v1422_v26 = vand.u32 4294901760, %v1421_v1 }
 0x62c   :  { %v1761_v27 = vadd.f32 %v1760_v14, %v1572_v45  ;;  %v1045_v14 = vsel %vm1043_vm7, %v963_v57, 0 }
 0x62e   :  { %v5280_v51 = vadd.f32 %v1965_v54, %v1761_v27  ;;  %1638 = vmatmul.f32.gmra.mxu3 %v5251_v0  ;;  %v1770_v12 = vpop.f32.mrf.mxu0  ;;  %v1416_v54 = vand.u32 4294901760, %v1415_v30  ;;  %v1423_v0 = vsub.f32 %v1421_v1, %v1422_v26 }
 0x62f   :  { %1409 = vmatmul.f32.gmra.mxu2 %v1408_v40  ;;  %v1977_v42 = vpop.f32.mrf.mxu1  ;;  %v5288_v40 = vand.u32 4294901760, %v1045_v14 }
 0x630   :  { %6921 = vst [vmem:[#allocation8_spill] sm:$0xff] %v5280_v51  ;;  %v1424_v57 = vand.u32 4294901760, %v1423_v0 }
 0x631   :  { %v1575_v13 = vpop.f32.mrf.mxu3  ;;  %1849 = vmatmul.f32.gmra.mxu0 %v1405_v9  ;;  %6922 = vst [vmem:[#allocation9_spill] sm:$0xff] %v5288_v40  ;;  %v965_v9 = vld [vmem:[%s6769_s2 + $0x18] sm:$0xff] }
 0x632   :  { %v1282_v48 = vpop.f32.mrf.mxu2  ;;  %v1576_v61 = vadd.f32 %v1575_v13, %v1274_v35  ;;  %2072 = vmatmul.f32.gmra.mxu1 %v1406_v44  ;;  %v5297_v35 = vsub.f32 %v1045_v14, %v5288_v40 }
 0x634   :  { %v1766_v45 = vadd.f32 %v1765_v11, %v1576_v61  ;;  %6923 = vst [vmem:[#allocation10_spill] sm:$0xff] %v5297_v35  ;;  %v6782_v61 = vand.u32 4294901760, %v5297_v35 }
 0x636   :  { %v5290_v27 = vadd.f32 %v1971_v63, %v1766_v45  ;;  %1642 = vmatmul.f32.gmra.mxu3 %v5260_v17  ;;  %v1775_v53 = vpop.f32.mrf.mxu0  ;;  %v1048_v63 = vsel %vm1043_vm7, %v965_v9, 0  ;;  %v2462_v0 = vsub.f32 %v5297_v35, %v6782_v61 }
 0x637   :  { %1417 = vmatmul.f32.gmra.mxu2 %v1416_v54  ;;  %v1983_v51 = vpop.f32.mrf.mxu1  ;;  %v5301_v54 = vand.u32 4294901760, %v1048_v63 }
 0x639   :  { %v1579_v44 = vpop.f32.mrf.mxu3  ;;  %1854 = vmatmul.f32.gmra.mxu0 %v1413_v10  ;;  %6924 = vst [vmem:[#allocation11_spill] sm:$0xff] %v5301_v54 }
 0x63a   :  { %v1290_v11 = vpop.f32.mrf.mxu2  ;;  %v1580_v30 = vadd.f32 %v1579_v44, %v1282_v48  ;;  %2078 = vmatmul.f32.gmra.mxu1 %v1414_v8  ;;  %v967_v48 = vld [vmem:[%s6769_s2 + $0x28] sm:$0xff] }
 0x63b   :  { %v1051_v9 = vsel %vm1043_vm7, %v967_v48, 0 }
 0x63c   :  { %v1771_v13 = vadd.f32 %v1770_v12, %v1580_v30  ;;  %v5313_v12 = vsub.f32 %v1048_v63, %v5301_v54  ;;  %v2463_v30 = vand.u32 4294901760, %v2462_v0 }
 0x63e   :  { %v5303_v45 = vadd.f32 %v1977_v42, %v1771_v13  ;;  %1646 = vmatmul.f32.gmra.mxu3 %v5269_v22  ;;  %v1780_v17 = vpop.f32.mrf.mxu0  ;;  %6925 = vst [vmem:[#allocation12_spill] sm:$0xff] %v5313_v12  ;;  %v5317_v13 = vand.u32 4294901760, %v1051_v9 }
 0x63f   :  { %1425 = vmatmul.f32.gmra.mxu2 %v1424_v57  ;;  %v1989_v10 = vpop.f32.mrf.mxu1  ;;  %v6785_v57 = vand.u32 4294901760, %v5313_v12 }
 0x640   :  { %6926 = vst [vmem:[#allocation13_spill] sm:$0xff] %v5317_v13  ;;  %v5330_v48 = vsub.f32 %v1051_v9, %v5317_v13 }
 0x641   :  { %v1583_v8 = vpop.f32.mrf.mxu3  ;;  %1859 = vmatmul.f32.gmra.mxu0 %v1421_v1 }
 0x642   :  { %v1298_v42 = vpop.f32.mrf.mxu2  ;;  %v1584_v14 = vadd.f32 %v1583_v8, %v1290_v11  ;;  %2084 = vmatmul.f32.gmra.mxu1 %v1422_v26  ;;  %v969_v26 = vld [vmem:[%s6769_s2 + $0x38] sm:$0xff]  ;;  %6927 = vst [vmem:[#allocation14_spill] sm:$0xff] %v5330_v48  ;;  %v6790_v61 = vand.u32 4294901760, %v5330_v48 }
 0x643   :  { %v1054_v0 = vsel %vm1043_vm7, %v969_v26, 0 }
 0x644   :  { %v1776_v44 = vadd.f32 %v1775_v53, %v1584_v14  ;;  %v2470_v53 = vsub.f32 %v5313_v12, %v6785_v57  ;;  %v5335_v35 = vand.u32 4294901760, %v1054_v0 }
 0x646   :  { %v5319_v22 = vadd.f32 %v1983_v51, %v1776_v44  ;;  %1650 = vmatmul.f32.gmra.mxu3 %v5278_v20  ;;  %v1785_v1 = vpop.f32.mrf.mxu0  ;;  %v2471_v44 = vand.u32 4294901760, %v2470_v53  ;;  %6928 = vst [vmem:[#allocation15_spill] sm:$0xff] %v5335_v35  ;;  %v5348_v26 = vsub.f32 %v1054_v0, %v5335_v35 }
 0x647   :  { %2153 = vmatmul.f32.vlgmr.msra.gmra.mxu2 %v4895_v28  ;;  %v1995_v63 = vpop.f32.mrf.mxu1 }
 0x648   :  { %6929 = vst [vmem:[#allocation16_spill] sm:$0xff] %v5348_v26  ;;  %v6795_v12 = vand.u32 4294901760, %v5348_v26 }
 0x649   :  { %v1587_v11 = vpop.f32.mrf.mxu3  ;;  %2464 = vmatmul.f32.vlgmr.msrb.gmra.mxu0 %v2463_v30 }
 0x64a   :  { %v1306_v51 = vpop.f32.mrf.mxu2  ;;  %v1588_v8 = vadd.f32 %v1587_v11, %v1298_v42  ;;  %2738 = vmatmul.f32.vlgmr.msrb.gmra.mxu1 %v5288_v40  ;;  %v971_v42 = vld [vmem:[%s6769_s2 + $0x48] sm:$0xff] }
 0x64c   :  { %v1781_v14 = vadd.f32 %v1780_v17, %v1588_v8  ;;  %v2478_v17 = vsub.f32 %v5330_v48, %v6790_v61 }
 0x64e   :  { %v5337_v30 = vadd.f32 %v1989_v10, %v1781_v14  ;;  %2314 = vmatmul.f32.vlgmr.msra.gmra.mxu3 %v4895_v28  ;;  %v1790_v57 = vpop.f32.mrf.mxu0  ;;  %v1057_v28 = vsel %vm1043_vm7, %v971_v42, 0  ;;  %v2479_v14 = vand.u32 4294901760, %v2478_v17 }
 0x64f   :  { %2157 = vmatmul.f32.gmra.mxu2 %v4950_v37  ;;  %v2001_v9 = vpop.f32.mrf.mxu1  ;;  %v5353_v40 = vand.u32 4294901760, %v1057_v28 }
 0x651   :  { %v1591_v11 = vpop.f32.mrf.mxu3  ;;  %2472 = vmatmul.f32.gmra.mxu0 %v2471_v44  ;;  %6930 = vst [vmem:[#allocation17_spill] sm:$0xff] %v5353_v40  ;;  %v5366_v42 = vsub.f32 %v1057_v28, %v5353_v40 }
 0x652   :  { %v1314_v10 = vpop.f32.mrf.mxu2  ;;  %v1592_v53 = vadd.f32 %v1591_v11, %v1306_v51  ;;  %2742 = vmatmul.f32.gmra.mxu1 %v5301_v54  ;;  %v973_v51 = vld [vmem:[%s6769_s2 + $0x58] sm:$0xff] }
 0x653   :  { %6931 = vst [vmem:[#allocation18_spill] sm:$0xff] %v5366_v42  ;;  %v6800_v48 = vand.u32 4294901760, %v5366_v42 }
 0x654   :  { %v1786_v8 = vadd.f32 %v1785_v1, %v1592_v53  ;;  %v2486_v1 = vsub.f32 %v5348_v26, %v6795_v12 }
 0x656   :  { %v5355_v44 = vadd.f32 %v1995_v63, %v1786_v8  ;;  %2318 = vmatmul.f32.gmra.mxu3 %v4950_v37  ;;  %v1795_v61 = vpop.f32.mrf.mxu0  ;;  %v1060_v37 = vsel %vm1043_vm7, %v973_v51, 0  ;;  %v2487_v8 = vand.u32 4294901760, %v2486_v1 }
 0x657   :  { %2161 = vmatmul.f32.gmra.mxu2 %v4993_v31  ;;  %v2007_v0 = vpop.f32.mrf.mxu1  ;;  %v5371_v54 = vand.u32 4294901760, %v1060_v37 }
 0x659   :  { %v1595_v11 = vpop.f32.mrf.mxu3  ;;  %2480 = vmatmul.f32.gmra.mxu0 %v2479_v14  ;;  %6932 = vst [vmem:[#allocation19_spill] sm:$0xff] %v5371_v54  ;;  %v5384_v51 = vsub.f32 %v1060_v37, %v5371_v54 }
 0x65a   :  { %v1322_v63 = vpop.f32.mrf.mxu2  ;;  %v1596_v17 = vadd.f32 %v1595_v11, %v1314_v10  ;;  %2746 = vmatmul.f32.gmra.mxu1 %v5317_v13  ;;  %v975_v10 = vld [vmem:[%s6769_s2 + $0x68] sm:$0xff] }
 0x65b   :  { %6933 = vst [vmem:[#allocation20_spill] sm:$0xff] %v5384_v51  ;;  %v6805_v26 = vand.u32 4294901760, %v5384_v51 }
 0x65c   :  { %v1791_v53 = vadd.f32 %v1790_v57, %v1596_v17  ;;  %v2494_v57 = vsub.f32 %v5366_v42, %v6800_v48 }
 0x65e   :  { %v5373_v14 = vadd.f32 %v2001_v9, %v1791_v53  ;;  %2322 = vmatmul.f32.gmra.mxu3 %v4993_v31  ;;  %v1800_v12 = vpop.f32.mrf.mxu0  ;;  %v1063_v31 = vsel %vm1043_vm7, %v975_v10, 0  ;;  %v2495_v53 = vand.u32 4294901760, %v2494_v57 }
 0x65f   :  { %2165 = vmatmul.f32.gmra.mxu2 %v5016_v39  ;;  %v2013_v28 = vpop.f32.mrf.mxu1  ;;  %v5389_v13 = vand.u32 4294901760, %v1063_v31 }
 0x661   :  { %v1599_v11 = vpop.f32.mrf.mxu3  ;;  %2488 = vmatmul.f32.gmra.mxu0 %v2487_v8  ;;  %6934 = vst [vmem:[#allocation21_spill] sm:$0xff] %v5389_v13  ;;  %v5402_v10 = vsub.f32 %v1063_v31, %v5389_v13 }
 0x662   :  { %v1330_v9 = vpop.f32.mrf.mxu2  ;;  %v1600_v1 = vadd.f32 %v1599_v11, %v1322_v63  ;;  %2750 = vmatmul.f32.gmra.mxu1 %v5335_v35  ;;  %v977_v63 = vld [vmem:[%s6769_s2 + $0x78] sm:$0xff] }
 0x663   :  { %6935 = vst [vmem:[#allocation22_spill] sm:$0xff] %v5402_v10  ;;  %v6810_v42 = vand.u32 4294901760, %v5402_v10 }
 0x664   :  { %v1796_v17 = vadd.f32 %v1795_v61, %v1600_v1  ;;  %v2502_v61 = vsub.f32 %v5384_v51, %v6805_v26 }
 0x666   :  { %v5391_v8 = vadd.f32 %v2007_v0, %v1796_v17  ;;  %2326 = vmatmul.f32.gmra.mxu3 %v5016_v39  ;;  %v1805_v48 = vpop.f32.mrf.mxu0  ;;  %v1066_v39 = vsel %vm1043_vm7, %v977_v63, 0  ;;  %v2503_v17 = vand.u32 4294901760, %v2502_v61 }
 0x667   :  { %2169 = vmatmul.f32.gmra.mxu2 %v5034_v56  ;;  %v2019_v37 = vpop.f32.mrf.mxu1  ;;  %v5407_v35 = vand.u32 4294901760, %v1066_v39 }
 0x669   :  { %v1603_v11 = vpop.f32.mrf.mxu3  ;;  %2496 = vmatmul.f32.gmra.mxu0 %v2495_v53  ;;  %6936 = vst [vmem:[#allocation23_spill] sm:$0xff] %v5407_v35  ;;  %v5420_v63 = vsub.f32 %v1066_v39, %v5407_v35 }
 0x66a   :  { %v1338_v0 = vpop.f32.mrf.mxu2  ;;  %v1604_v57 = vadd.f32 %v1603_v11, %v1330_v9  ;;  %2754 = vmatmul.f32.gmra.mxu1 %v5353_v40  ;;  %v979_v9 = vld [vmem:[%s6769_s2 + $0x88] sm:$0xff] }
 0x66b   :  { %6937 = vst [vmem:[#allocation24_spill] sm:$0xff] %v5420_v63  ;;  %v6815_v51 = vand.u32 4294901760, %v5420_v63 }
 0x66c   :  { %v1801_v1 = vadd.f32 %v1800_v12, %v1604_v57  ;;  %v2510_v12 = vsub.f32 %v5402_v10, %v6810_v42 }
 0x66e   :  { %v5409_v53 = vadd.f32 %v2013_v28, %v1801_v1  ;;  %2330 = vmatmul.f32.gmra.mxu3 %v5034_v56  ;;  %v1810_v26 = vpop.f32.mrf.mxu0  ;;  %v1069_v56 = vsel %vm1043_vm7, %v979_v9, 0  ;;  %v2511_v1 = vand.u32 4294901760, %v2510_v12 }
 0x66f   :  { %2173 = vmatmul.f32.gmra.mxu2 %v5053_v58  ;;  %v2025_v31 = vpop.f32.mrf.mxu1  ;;  %v5425_v40 = vand.u32 4294901760, %v1069_v56 }
 0x671   :  { %v1607_v11 = vpop.f32.mrf.mxu3  ;;  %2504 = vmatmul.f32.gmra.mxu0 %v2503_v17  ;;  %6938 = vst [vmem:[#allocation25_spill] sm:$0xff] %v5425_v40  ;;  %v5438_v9 = vsub.f32 %v1069_v56, %v5425_v40 }
 0x672   :  { %v1346_v28 = vpop.f32.mrf.mxu2  ;;  %v1608_v61 = vadd.f32 %v1607_v11, %v1338_v0  ;;  %2758 = vmatmul.f32.gmra.mxu1 %v5371_v54  ;;  %v981_v0 = vld [vmem:[%s6769_s2 + $0x98] sm:$0xff] }
 0x673   :  { %6939 = vst [vmem:[#allocation26_spill] sm:$0xff] %v5438_v9  ;;  %v6820_v10 = vand.u32 4294901760, %v5438_v9 }
 0x674   :  { %v1806_v57 = vadd.f32 %v1805_v48, %v1608_v61  ;;  %v2518_v48 = vsub.f32 %v5420_v63, %v6815_v51 }
 0x676   :  { %v5427_v17 = vadd.f32 %v2019_v37, %v1806_v57  ;;  %2334 = vmatmul.f32.gmra.mxu3 %v5053_v58  ;;  %v1815_v42 = vpop.f32.mrf.mxu0  ;;  %v1072_v58 = vsel %vm1043_vm7, %v981_v0, 0  ;;  %v2519_v57 = vand.u32 4294901760, %v2518_v48 }
 0x677   :  { %2177 = vmatmul.f32.gmra.mxu2 %v5072_v34  ;;  %v2031_v39 = vpop.f32.mrf.mxu1  ;;  %v5443_v54 = vand.u32 4294901760, %v1072_v58 }
 0x679   :  { %v1611_v11 = vpop.f32.mrf.mxu3  ;;  %2512 = vmatmul.f32.gmra.mxu0 %v2511_v1  ;;  %6940 = vst [vmem:[#allocation27_spill] sm:$0xff] %v5443_v54  ;;  %v5456_v0 = vsub.f32 %v1072_v58, %v5443_v54 }
 0x67a   :  { %v1354_v37 = vpop.f32.mrf.mxu2  ;;  %v1612_v12 = vadd.f32 %v1611_v11, %v1346_v28  ;;  %2762 = vmatmul.f32.gmra.mxu1 %v5389_v13  ;;  %v983_v28 = vld [vmem:[%s6769_s2 + $0xa8] sm:$0xff] }
 0x67b   :  { %6941 = vst [vmem:[#allocation28_spill] sm:$0xff] %v5456_v0  ;;  %v6825_v63 = vand.u32 4294901760, %v5456_v0 }
 0x67c   :  { %v1811_v61 = vadd.f32 %v1810_v26, %v1612_v12  ;;  %v2526_v26 = vsub.f32 %v5438_v9, %v6820_v10 }
 0x67e   :  { %v5445_v1 = vadd.f32 %v2025_v31, %v1811_v61  ;;  %2338 = vmatmul.f32.gmra.mxu3 %v5072_v34  ;;  %v1820_v51 = vpop.f32.mrf.mxu0  ;;  %v1075_v34 = vsel %vm1043_vm7, %v983_v28, 0  ;;  %v2527_v61 = vand.u32 4294901760, %v2526_v26 }
 0x67f   :  { %2181 = vmatmul.f32.gmra.mxu2 %v5087_v25  ;;  %v2037_v56 = vpop.f32.mrf.mxu1  ;;  %v5461_v13 = vand.u32 4294901760, %v1075_v34 }
 0x681   :  { %v1615_v11 = vpop.f32.mrf.mxu3  ;;  %2520 = vmatmul.f32.gmra.mxu0 %v2519_v57  ;;  %6942 = vst [vmem:[#allocation29_spill] sm:$0xff] %v5461_v13  ;;  %v5474_v28 = vsub.f32 %v1075_v34, %v5461_v13 }
 0x682   :  { %v1362_v31 = vpop.f32.mrf.mxu2  ;;  %v1616_v48 = vadd.f32 %v1615_v11, %v1354_v37  ;;  %2766 = vmatmul.f32.gmra.mxu1 %v5407_v35  ;;  %v985_v37 = vld [vmem:[%s6769_s2 + $0xb8] sm:$0xff] }
 0x683   :  { %6943 = vst [vmem:[#allocation30_spill] sm:$0xff] %v5474_v28  ;;  %v6830_v9 = vand.u32 4294901760, %v5474_v28 }
 0x684   :  { %v1816_v12 = vadd.f32 %v1815_v42, %v1616_v48  ;;  %v2534_v42 = vsub.f32 %v5456_v0, %v6825_v63 }
 0x686   :  { %v5463_v57 = vadd.f32 %v2031_v39, %v1816_v12  ;;  %2342 = vmatmul.f32.gmra.mxu3 %v5087_v25  ;;  %v1825_v10 = vpop.f32.mrf.mxu0  ;;  %v1078_v25 = vsel %vm1043_vm7, %v985_v37, 0  ;;  %v2535_v12 = vand.u32 4294901760, %v2534_v42 }
 0x687   :  { %2185 = vmatmul.f32.gmra.mxu2 %v5095_v24  ;;  %v2043_v58 = vpop.f32.mrf.mxu1  ;;  %v5479_v35 = vand.u32 4294901760, %v1078_v25 }
 0x689   :  { %v1619_v11 = vpop.f32.mrf.mxu3  ;;  %2528 = vmatmul.f32.gmra.mxu0 %v2527_v61  ;;  %6944 = vst [vmem:[#allocation31_spill] sm:$0xff] %v5479_v35  ;;  %v5492_v37 = vsub.f32 %v1078_v25, %v5479_v35 }
 0x68a   :  { %v1370_v39 = vpop.f32.mrf.mxu2  ;;  %v1620_v26 = vadd.f32 %v1619_v11, %v1362_v31  ;;  %2770 = vmatmul.f32.gmra.mxu1 %v5425_v40  ;;  %v987_v31 = vld [vmem:[%s6769_s2 + $0xc8] sm:$0xff] }
 0x68b   :  { %6945 = vst [vmem:[#allocation32_spill] sm:$0xff] %v5492_v37  ;;  %v6835_v0 = vand.u32 4294901760, %v5492_v37 }
 0x68c   :  { %v1821_v48 = vadd.f32 %v1820_v51, %v1620_v26  ;;  %v2542_v51 = vsub.f32 %v5474_v28, %v6830_v9 }
 0x68e   :  { %v5481_v61 = vadd.f32 %v2037_v56, %v1821_v48  ;;  %2346 = vmatmul.f32.gmra.mxu3 %v5095_v24  ;;  %v1830_v63 = vpop.f32.mrf.mxu0  ;;  %v1081_v24 = vsel %vm1043_vm7, %v987_v31, 0  ;;  %v2543_v48 = vand.u32 4294901760, %v2542_v51 }
 0x68f   :  { %2189 = vmatmul.f32.gmra.mxu2 %v5102_v7  ;;  %v2049_v34 = vpop.f32.mrf.mxu1  ;;  %v5497_v40 = vand.u32 4294901760, %v1081_v24 }
 0x691   :  { %v1623_v11 = vpop.f32.mrf.mxu3  ;;  %2536 = vmatmul.f32.gmra.mxu0 %v2535_v12  ;;  %6946 = vst [vmem:[#allocation33_spill] sm:$0xff] %v5497_v40  ;;  %v5510_v31 = vsub.f32 %v1081_v24, %v5497_v40 }
 0x692   :  { %v1378_v56 = vpop.f32.mrf.mxu2  ;;  %v1624_v42 = vadd.f32 %v1623_v11, %v1370_v39  ;;  %2774 = vmatmul.f32.gmra.mxu1 %v5443_v54  ;;  %v989_v39 = vld [vmem:[%s6769_s2 + $0xd8] sm:$0xff] }
 0x693   :  { %6947 = vst [vmem:[#allocation34_spill] sm:$0xff] %v5510_v31  ;;  %v6840_v28 = vand.u32 4294901760, %v5510_v31 }
 0x694   :  { %v1826_v26 = vadd.f32 %v1825_v10, %v1624_v42  ;;  %v2550_v10 = vsub.f32 %v5492_v37, %v6835_v0 }
 0x696   :  { %v5499_v12 = vadd.f32 %v2043_v58, %v1826_v26  ;;  %2350 = vmatmul.f32.gmra.mxu3 %v5102_v7  ;;  %v1835_v9 = vpop.f32.mrf.mxu0  ;;  %v1084_v7 = vsel %vm1043_vm7, %v989_v39, 0  ;;  %v2551_v26 = vand.u32 4294901760, %v2550_v10 }
 0x697   :  { %2193 = vmatmul.f32.gmra.mxu2 %v5109_v59  ;;  %v2055_v25 = vpop.f32.mrf.mxu1  ;;  %v5515_v54 = vand.u32 4294901760, %v1084_v7 }
 0x699   :  { %v1627_v11 = vpop.f32.mrf.mxu3  ;;  %2544 = vmatmul.f32.gmra.mxu0 %v2543_v48  ;;  %6948 = vst [vmem:[#allocation35_spill] sm:$0xff] %v5515_v54  ;;  %v5528_v39 = vsub.f32 %v1084_v7, %v5515_v54 }
 0x69a   :  { %v1386_v58 = vpop.f32.mrf.mxu2  ;;  %v1628_v51 = vadd.f32 %v1627_v11, %v1378_v56  ;;  %2778 = vmatmul.f32.gmra.mxu1 %v5461_v13  ;;  %v991_v56 = vld [vmem:[%s6769_s2 + $0xe8] sm:$0xff] }
 0x69b   :  { %6949 = vst [vmem:[#allocation36_spill] sm:$0xff] %v5528_v39  ;;  %v6845_v37 = vand.u32 4294901760, %v5528_v39 }
 0x69c   :  { %v1831_v42 = vadd.f32 %v1830_v63, %v1628_v51  ;;  %v2558_v63 = vsub.f32 %v5510_v31, %v6840_v28 }
 0x69e   :  { %v5517_v48 = vadd.f32 %v2049_v34, %v1831_v42  ;;  %2354 = vmatmul.f32.gmra.mxu3 %v5109_v59  ;;  %v1840_v0 = vpop.f32.mrf.mxu0  ;;  %v1087_v59 = vsel %vm1043_vm7, %v991_v56, 0  ;;  %v2559_v42 = vand.u32 4294901760, %v2558_v63 }
 0x69f   :  { %2197 = vmatmul.f32.gmra.mxu2 %v5116_v50  ;;  %v2061_v24 = vpop.f32.mrf.mxu1  ;;  %v5533_v13 = vand.u32 4294901760, %v1087_v59 }
 0x6a1   :  { %v1631_v11 = vpop.f32.mrf.mxu3  ;;  %2552 = vmatmul.f32.gmra.mxu0 %v2551_v26  ;;  %6950 = vst [vmem:[#allocation37_spill] sm:$0xff] %v5533_v13  ;;  %v5546_v56 = vsub.f32 %v1087_v59, %v5533_v13 }
 0x6a2   :  { %v1394_v34 = vpop.f32.mrf.mxu2  ;;  %v1632_v10 = vadd.f32 %v1631_v11, %v1386_v58  ;;  %2782 = vmatmul.f32.gmra.mxu1 %v5479_v35  ;;  %v993_v58 = vld [vmem:[%s6769_s2 + $0xf8] sm:$0xff] }
 0x6a3   :  { %6951 = vst [vmem:[#allocation38_spill] sm:$0xff] %v5546_v56  ;;  %v6850_v31 = vand.u32 4294901760, %v5546_v56 }
 0x6a4   :  { %v1836_v51 = vadd.f32 %v1835_v9, %v1632_v10  ;;  %v2566_v9 = vsub.f32 %v5528_v39, %v6845_v37 }
 0x6a6   :  { %v5535_v26 = vadd.f32 %v2055_v25, %v1836_v51  ;;  %2358 = vmatmul.f32.gmra.mxu3 %v5116_v50  ;;  %v1845_v28 = vpop.f32.mrf.mxu0  ;;  %v1090_v50 = vsel %vm1043_vm7, %v993_v58, 0  ;;  %v2567_v51 = vand.u32 4294901760, %v2566_v9 }
 0x6a7   :  { %2201 = vmatmul.f32.gmra.mxu2 %v5123_v46  ;;  %v2067_v7 = vpop.f32.mrf.mxu1  ;;  %v5551_v35 = vand.u32 4294901760, %v1090_v50 }
 0x6a9   :  { %v1635_v11 = vpop.f32.mrf.mxu3  ;;  %2560 = vmatmul.f32.gmra.mxu0 %v2559_v42  ;;  %6952 = vst [vmem:[#allocation39_spill] sm:$0xff] %v5551_v35  ;;  %v5564_v58 = vsub.f32 %v1090_v50, %v5551_v35 }
 0x6aa   :  { %v1402_v25 = vpop.f32.mrf.mxu2  ;;  %v1636_v63 = vadd.f32 %v1635_v11, %v1394_v34  ;;  %2786 = vmatmul.f32.gmra.mxu1 %v5497_v40  ;;  %v995_v34 = vld [vmem:[%s6769_s2 + $0x108] sm:$0xff] }
 0x6ab   :  { %6953 = vst [vmem:[#allocation40_spill] sm:$0xff] %v5564_v58  ;;  %v6855_v39 = vand.u32 4294901760, %v5564_v58 }
 0x6ac   :  { %v1841_v10 = vadd.f32 %v1840_v0, %v1636_v63  ;;  %v2574_v0 = vsub.f32 %v5546_v56, %v6850_v31 }
 0x6ae   :  { %v5553_v42 = vadd.f32 %v2061_v24, %v1841_v10  ;;  %2362 = vmatmul.f32.gmra.mxu3 %v5123_v46  ;;  %v1850_v37 = vpop.f32.mrf.mxu0  ;;  %v1093_v46 = vsel %vm1043_vm7, %v995_v34, 0  ;;  %v2575_v10 = vand.u32 4294901760, %v2574_v0 }
 0x6af   :  { %2205 = vmatmul.f32.gmra.mxu2 %v5130_v29  ;;  %v2073_v59 = vpop.f32.mrf.mxu1  ;;  %v5569_v40 = vand.u32 4294901760, %v1093_v46 }
 0x6b1   :  { %v1639_v11 = vpop.f32.mrf.mxu3  ;;  %2568 = vmatmul.f32.gmra.mxu0 %v2567_v51  ;;  %v5582_v34 = vsub.f32 %v1093_v46, %v5569_v40 }
 0x6b2   :  { %v1410_v24 = vpop.f32.mrf.mxu2  ;;  %v1640_v9 = vadd.f32 %v1639_v11, %v1402_v25  ;;  %2790 = vmatmul.f32.gmra.mxu1 %v5515_v54  ;;  %v997_v25 = vld [vmem:[%s6769_s2 + $0x118] sm:$0xff] }
 0x6b3   :  { %6954 = vst [vmem:[#allocation41_spill] sm:$0xff] %v5582_v34  ;;  %v6860_v56 = vand.u32 4294901760, %v5582_v34 }
 0x6b4   :  { %v1846_v63 = vadd.f32 %v1845_v28, %v1640_v9  ;;  %v2582_v28 = vsub.f32 %v5564_v58, %v6855_v39 }
 0x6b6   :  { %v5571_v51 = vadd.f32 %v2067_v7, %v1846_v63  ;;  %2366 = vmatmul.f32.gmra.mxu3 %v5130_v29  ;;  %v1855_v31 = vpop.f32.mrf.mxu0  ;;  %v1096_v29 = vsel %vm1043_vm7, %v997_v25, 0  ;;  %v2583_v63 = vand.u32 4294901760, %v2582_v28 }
 0x6b7   :  { %2209 = vmatmul.f32.gmra.mxu2 %v5137_v52  ;;  %v2079_v50 = vpop.f32.mrf.mxu1  ;;  %v5587_v54 = vand.u32 4294901760, %v1096_v29 }
 0x6b9   :  { %v1643_v11 = vpop.f32.mrf.mxu3  ;;  %2576 = vmatmul.f32.gmra.mxu0 %v2575_v10  ;;  %v5600_v25 = vsub.f32 %v1096_v29, %v5587_v54 }
 0x6ba   :  { %v1418_v7 = vpop.f32.mrf.mxu2  ;;  %v1644_v0 = vadd.f32 %v1643_v11, %v1410_v24  ;;  %2794 = vmatmul.f32.gmra.mxu1 %v5533_v13  ;;  %v999_v24 = vld [vmem:[%s6769_s2 + $0x128] sm:$0xff] }
 0x6bb   :  { %6955 = vst [vmem:[#allocation42_spill] sm:$0xff] %v5600_v25  ;;  %v6865_v58 = vand.u32 4294901760, %v5600_v25 }
 0x6bc   :  { %v1851_v9 = vadd.f32 %v1850_v37, %v1644_v0  ;;  %v2590_v37 = vsub.f32 %v5582_v34, %v6860_v56 }
 0x6be   :  { %v5589_v10 = vadd.f32 %v2073_v59, %v1851_v9  ;;  %2370 = vmatmul.f32.gmra.mxu3 %v5137_v52  ;;  %v1860_v39 = vpop.f32.mrf.mxu0  ;;  %v1099_v52 = vsel %vm1043_vm7, %v999_v24, 0  ;;  %v2591_v9 = vand.u32 4294901760, %v2590_v37 }
 0x6bf   :  { %2213 = vmatmul.f32.gmra.mxu2 %v5144_v6  ;;  %v2085_v46 = vpop.f32.mrf.mxu1  ;;  %v5605_v13 = vand.u32 4294901760, %v1099_v52 }
 0x6c1   :  { %v1647_v11 = vpop.f32.mrf.mxu3  ;;  %2584 = vmatmul.f32.gmra.mxu0 %v2583_v63  ;;  %v5618_v24 = vsub.f32 %v1099_v52, %v5605_v13 }
 0x6c2   :  { %v1426_v59 = vpop.f32.mrf.mxu2  ;;  %v1648_v28 = vadd.f32 %v1647_v11, %v1418_v7  ;;  %2798 = vmatmul.f32.gmra.mxu1 %v5551_v35  ;;  %v1001_v7 = vld [vmem:[%s6769_s2 + $0x138] sm:$0xff] }
 0x6c3   :  { %6957 = vst [vmem:[#allocation44_spill] sm:$0xff] %v5618_v24  ;;  %v6868_v35 = vand.u32 4294901760, %v5618_v24 }
 0x6c4   :  { %v1856_v0 = vadd.f32 %v1855_v31, %v1648_v28  ;;  %v2598_v31 = vsub.f32 %v5600_v25, %v6865_v58 }
 0x6c6   :  { %v5607_v63 = vadd.f32 %v2079_v50, %v1856_v0  ;;  %2374 = vmatmul.f32.gmra.mxu3 %v5144_v6  ;;  %v2465_v56 = vpop.f32.mrf.mxu0  ;;  %v1102_v6 = vsel %vm1043_vm7, %v1001_v7, 0  ;;  %v2599_v34 = vand.u32 4294901760, %v2598_v31  ;;  %v1003_v7 = vld [vmem:[%s6769_s2 + $0x148] sm:$0xff] }
 0x6c7   :  { %2217 = vmatmul.f32.gmra.mxu2 %v5151_v43  ;;  %v2739_v29 = vpop.f32.mrf.mxu1 }
 0x6c8   :  { %6956 = vst [vmem:[#allocation43_spill] sm:$0xff] %v5607_v63 }
 0x6c9   :  { %v1651_v11 = vpop.f32.mrf.mxu3  ;;  %2592 = vmatmul.f32.gmra.mxu0 %v2591_v9  ;;  %v5624_v9 = vand.u32 4294901760, %v1102_v6 }
 0x6ca   :  { %v1652_v50 = vadd.f32 %v1651_v11, %v1426_v59  ;;  %v2154_v37 = vpop.f32.mrf.mxu2  ;;  %2802 = vmatmul.f32.gmra.mxu1 %v5569_v40 }
 0x6cb   :  { %v2155_v28 = vadd.f32 %v2154_v37, %v5181_v62  ;;  %v2606_v62 = vsub.f32 %v5618_v24, %v6868_v35 }
 0x6cc   :  { %v1861_v0 = vadd.f32 %v1860_v39, %v1652_v50  ;;  %v5637_v39 = vsub.f32 %v1102_v6, %v5624_v9 }
 0x6ce   :  { %v5626_v63 = vadd.f32 %v2085_v46, %v1861_v0  ;;  %2378 = vmatmul.f32.gmra.mxu3 %v5151_v43  ;;  %v2473_v52 = vpop.f32.mrf.mxu0  ;;  %6958 = vst [vmem:[#allocation45_spill] sm:$0xff] %v5637_v39  ;;  %v1105_v43 = vsel %vm1043_vm7, %v1003_v7, 0  ;;  %v2607_v0 = vand.u32 4294901760, %v2606_v62  ;;  %v6871_v58 = vand.u32 4294901760, %v5637_v39  ;;  %v1005_v7 = vld [vmem:[%s6769_s2 + $0x158] sm:$0xff] }
 0x6cf   :  { %2221 = vmatmul.f32.gmra.mxu2 %v5158_v3  ;;  %v2743_v59 = vpop.f32.mrf.mxu1 }
 0x6d1   :  { %v2315_v11 = vpop.f32.mrf.mxu3  ;;  %2600 = vmatmul.f32.gmra.mxu0 %v2599_v34  ;;  %v5643_v34 = vand.u32 4294901760, %v1105_v43 }
 0x6d2   :  { %v2158_v46 = vpop.f32.mrf.mxu2  ;;  %v2316_v31 = vadd.f32 %v2315_v11, %v2155_v28  ;;  %2806 = vmatmul.f32.gmra.mxu1 %v5587_v54 }
 0x6d3   :  { %v2159_v50 = vadd.f32 %v2158_v46, %v5190_v19  ;;  %v2614_v19 = vsub.f32 %v5637_v39, %v6871_v58 }
 0x6d4   :  { %v2466_v37 = vadd.f32 %v2465_v56, %v2316_v31  ;;  %v5656_v56 = vsub.f32 %v1105_v43, %v5643_v34 }
 0x6d6   :  { %v5645_v25 = vadd.f32 %v2739_v29, %v2466_v37  ;;  %2382 = vmatmul.f32.gmra.mxu3 %v5158_v3  ;;  %v2481_v6 = vpop.f32.mrf.mxu0  ;;  %6959 = vst [vmem:[#allocation46_spill] sm:$0xff] %v5656_v56  ;;  %v1108_v3 = vsel %vm1043_vm7, %v1005_v7, 0  ;;  %v2615_v37 = vand.u32 4294901760, %v2614_v19  ;;  %v6874_v35 = vand.u32 4294901760, %v5656_v56  ;;  %v1007_v7 = vld [vmem:[%s6769_s2 + $0x168] sm:$0xff] }
 0x6d7   :  { %2225 = vmatmul.f32.gmra.mxu2 %v5165_v18  ;;  %v2747_v28 = vpop.f32.mrf.mxu1 }
 0x6d9   :  { %v2319_v11 = vpop.f32.mrf.mxu3  ;;  %2608 = vmatmul.f32.gmra.mxu0 %v2607_v0  ;;  %v5662_v0 = vand.u32 4294901760, %v1108_v3 }
 0x6da   :  { %v2162_v29 = vpop.f32.mrf.mxu2  ;;  %v2320_v62 = vadd.f32 %v2319_v11, %v2159_v50  ;;  %2810 = vmatmul.f32.gmra.mxu1 %v5605_v13 }
 0x6db   :  { %v2163_v46 = vadd.f32 %v2162_v29, %v5199_v16  ;;  %v2622_v16 = vsub.f32 %v5656_v56, %v6874_v35 }
 0x6dc   :  { %v2474_v31 = vadd.f32 %v2473_v52, %v2320_v62  ;;  %v5675_v52 = vsub.f32 %v1108_v3, %v5662_v0 }
 0x6de   :  { %v5664_v24 = vadd.f32 %v2743_v59, %v2474_v31  ;;  %2386 = vmatmul.f32.gmra.mxu3 %v5165_v18  ;;  %v2489_v43 = vpop.f32.mrf.mxu0  ;;  %6960 = vst [vmem:[#allocation47_spill] sm:$0xff] %v5675_v52  ;;  %v1111_v18 = vsel %vm1043_vm7, %v1007_v7, 0  ;;  %v2623_v31 = vand.u32 4294901760, %v2622_v16  ;;  %v6877_v58 = vand.u32 4294901760, %v5675_v52  ;;  %v1009_v7 = vld [vmem:[%s6769_s2 + $0x178] sm:$0xff] }
 0x6df   :  { %2229 = vmatmul.f32.gmra.mxu2 %v5172_v36  ;;  %v2751_v50 = vpop.f32.mrf.mxu1 }
 0x6e1   :  { %v2323_v11 = vpop.f32.mrf.mxu3  ;;  %2616 = vmatmul.f32.gmra.mxu0 %v2615_v37  ;;  %v5681_v37 = vand.u32 4294901760, %v1111_v18 }
 0x6e2   :  { %v2166_v59 = vpop.f32.mrf.mxu2  ;;  %v2324_v19 = vadd.f32 %v2323_v11, %v2163_v46  ;;  %2814 = vmatmul.f32.gmra.mxu1 %v5624_v9 }
 0x6e3   :  { %v2167_v29 = vadd.f32 %v2166_v59, %v5208_v47  ;;  %v2630_v47 = vsub.f32 %v5675_v52, %v6877_v58 }
 0x6e4   :  { %v2482_v62 = vadd.f32 %v2481_v6, %v2324_v19  ;;  %v5694_v6 = vsub.f32 %v1111_v18, %v5681_v37 }
 0x6e6   :  { %v5683_v39 = vadd.f32 %v2747_v28, %v2482_v62  ;;  %2390 = vmatmul.f32.gmra.mxu3 %v5172_v36  ;;  %v2497_v3 = vpop.f32.mrf.mxu0  ;;  %6961 = vst [vmem:[#allocation48_spill] sm:$0xff] %v5694_v6  ;;  %v1114_v36 = vsel %vm1043_vm7, %v1009_v7, 0  ;;  %v2631_v62 = vand.u32 4294901760, %v2630_v47  ;;  %v6880_v35 = vand.u32 4294901760, %v5694_v6  ;;  %v1011_v7 = vld [vmem:[%s6769_s2 + $0x188] sm:$0xff] }
 0x6e7   :  { %2233 = vmatmul.f32.gmra.mxu2 %v5179_v21  ;;  %v2755_v46 = vpop.f32.mrf.mxu1 }
 0x6e9   :  { %v2327_v11 = vpop.f32.mrf.mxu3  ;;  %2624 = vmatmul.f32.gmra.mxu0 %v2623_v31  ;;  %v5700_v31 = vand.u32 4294901760, %v1114_v36 }
 0x6ea   :  { %v2170_v28 = vpop.f32.mrf.mxu2  ;;  %v2328_v16 = vadd.f32 %v2327_v11, %v2167_v29  ;;  %2818 = vmatmul.f32.gmra.mxu1 %v5643_v34 }
 0x6eb   :  { %v2171_v59 = vadd.f32 %v2170_v28, %v5217_v32  ;;  %v2638_v32 = vsub.f32 %v5694_v6, %v6880_v35 }
 0x6ec   :  { %v2490_v19 = vadd.f32 %v2489_v43, %v2328_v16  ;;  %v5713_v43 = vsub.f32 %v1114_v36, %v5700_v31 }
 0x6ee   :  { %v5702_v56 = vadd.f32 %v2751_v50, %v2490_v19  ;;  %2394 = vmatmul.f32.gmra.mxu3 %v5179_v21  ;;  %v2505_v18 = vpop.f32.mrf.mxu0  ;;  %6962 = vst [vmem:[#allocation49_spill] sm:$0xff] %v5713_v43  ;;  %v1117_v21 = vsel %vm1043_vm7, %v1011_v7, 0  ;;  %v2639_v19 = vand.u32 4294901760, %v2638_v32  ;;  %v6883_v58 = vand.u32 4294901760, %v5713_v43  ;;  %v1013_v7 = vld [vmem:[%s6769_s2 + $0x198] sm:$0xff] }
 0x6ef   :  { %2237 = vmatmul.f32.gmra.mxu2 %v5188_v49  ;;  %v2759_v29 = vpop.f32.mrf.mxu1 }
 0x6f1   :  { %v2331_v11 = vpop.f32.mrf.mxu3  ;;  %2632 = vmatmul.f32.gmra.mxu0 %v2631_v62  ;;  %v5719_v62 = vand.u32 4294901760, %v1117_v21 }
 0x6f2   :  { %v2174_v50 = vpop.f32.mrf.mxu2  ;;  %v2332_v47 = vadd.f32 %v2331_v11, %v2171_v59  ;;  %2822 = vmatmul.f32.gmra.mxu1 %v5662_v0 }
 0x6f3   :  { %v2175_v28 = vadd.f32 %v2174_v50, %v5226_v60  ;;  %v2646_v60 = vsub.f32 %v5713_v43, %v6883_v58 }
 0x6f4   :  { %v2498_v16 = vadd.f32 %v2497_v3, %v2332_v47  ;;  %v5732_v3 = vsub.f32 %v1117_v21, %v5719_v62 }
 0x6f6   :  { %v5721_v52 = vadd.f32 %v2755_v46, %v2498_v16  ;;  %2398 = vmatmul.f32.gmra.mxu3 %v5188_v49  ;;  %v2513_v36 = vpop.f32.mrf.mxu0  ;;  %6963 = vst [vmem:[#allocation50_spill] sm:$0xff] %v5732_v3  ;;  %v1120_v49 = vsel %vm1043_vm7, %v1013_v7, 0  ;;  %v2647_v16 = vand.u32 4294901760, %v2646_v60  ;;  %v6886_v35 = vand.u32 4294901760, %v5732_v3  ;;  %v1015_v7 = vld [vmem:[%s6769_s2 + $0x1a8] sm:$0xff] }
 0x6f7   :  { %2241 = vmatmul.f32.gmra.mxu2 %v5197_v41  ;;  %v2763_v59 = vpop.f32.mrf.mxu1 }
 0x6f9   :  { %v2335_v11 = vpop.f32.mrf.mxu3  ;;  %2640 = vmatmul.f32.gmra.mxu0 %v2639_v19  ;;  %v5738_v19 = vand.u32 4294901760, %v1120_v49 }
 0x6fa   :  { %v2178_v46 = vpop.f32.mrf.mxu2  ;;  %v2336_v32 = vadd.f32 %v2335_v11, %v2175_v28  ;;  %2826 = vmatmul.f32.gmra.mxu1 %v5681_v37 }
 0x6fb   :  { %v2179_v50 = vadd.f32 %v2178_v46, %v5235_v15  ;;  %v2654_v15 = vsub.f32 %v5732_v3, %v6886_v35 }
 0x6fc   :  { %v2506_v47 = vadd.f32 %v2505_v18, %v2336_v32  ;;  %v5751_v18 = vsub.f32 %v1120_v49, %v5738_v19 }
 0x6fe   :  { %v5740_v6 = vadd.f32 %v2759_v29, %v2506_v47  ;;  %2402 = vmatmul.f32.gmra.mxu3 %v5197_v41  ;;  %v2521_v21 = vpop.f32.mrf.mxu0  ;;  %6964 = vst [vmem:[#allocation51_spill] sm:$0xff] %v5751_v18  ;;  %v1123_v41 = vsel %vm1043_vm7, %v1015_v7, 0  ;;  %v2655_v47 = vand.u32 4294901760, %v2654_v15  ;;  %v6889_v58 = vand.u32 4294901760, %v5751_v18  ;;  %v1017_v7 = vld [vmem:[%s6769_s2 + $0x1b8] sm:$0xff] }
 0x6ff   :  { %2245 = vmatmul.f32.gmra.mxu2 %v5206_v33  ;;  %v2767_v28 = vpop.f32.mrf.mxu1 }
 0x701   :  { %v2339_v11 = vpop.f32.mrf.mxu3  ;;  %2648 = vmatmul.f32.gmra.mxu0 %v2647_v16  ;;  %v5757_v16 = vand.u32 4294901760, %v1123_v41 }
 0x702   :  { %v2182_v29 = vpop.f32.mrf.mxu2  ;;  %v2340_v60 = vadd.f32 %v2339_v11, %v2179_v50  ;;  %2830 = vmatmul.f32.gmra.mxu1 %v5700_v31 }
 0x703   :  { %v2183_v46 = vadd.f32 %v2182_v29, %v5244_v5  ;;  %6965 = vst [vmem:[#allocation52_spill] sm:$0xff] %v5757_v16  ;;  %v2662_v5 = vsub.f32 %v5751_v18, %v6889_v58 }
 0x704   :  { %v2514_v32 = vadd.f32 %v2513_v36, %v2340_v60  ;;  %v5770_v36 = vsub.f32 %v1123_v41, %v5757_v16 }
 0x706   :  { %v5759_v43 = vadd.f32 %v2763_v59, %v2514_v32  ;;  %2406 = vmatmul.f32.gmra.mxu3 %v5206_v33  ;;  %v2529_v49 = vpop.f32.mrf.mxu0  ;;  %6966 = vst [vmem:[#allocation53_spill] sm:$0xff] %v5770_v36  ;;  %v1126_v33 = vsel %vm1043_vm7, %v1017_v7, 0  ;;  %v2663_v32 = vand.u32 4294901760, %v2662_v5  ;;  %v6892_v35 = vand.u32 4294901760, %v5770_v36  ;;  %v1019_v7 = vld [vmem:[%s6769_s2 + $0x1c8] sm:$0xff] }
 0x707   :  { %2249 = vmatmul.f32.gmra.mxu2 %v5215_v38  ;;  %v2771_v50 = vpop.f32.mrf.mxu1 }
 0x709   :  { %v2343_v11 = vpop.f32.mrf.mxu3  ;;  %2656 = vmatmul.f32.gmra.mxu0 %v2655_v47  ;;  %v5776_v47 = vand.u32 4294901760, %v1126_v33 }
 0x70a   :  { %v2186_v59 = vpop.f32.mrf.mxu2  ;;  %v2344_v15 = vadd.f32 %v2343_v11, %v2183_v46  ;;  %2834 = vmatmul.f32.gmra.mxu1 %v5719_v62 }
 0x70b   :  { %v2187_v29 = vadd.f32 %v2186_v59, %v5253_v4  ;;  %v2670_v4 = vsub.f32 %v5770_v36, %v6892_v35 }
 0x70c   :  { %v2522_v60 = vadd.f32 %v2521_v21, %v2344_v15  ;;  %v5789_v21 = vsub.f32 %v1126_v33, %v5776_v47 }
 0x70e   :  { %v5778_v3 = vadd.f32 %v2767_v28, %v2522_v60  ;;  %2410 = vmatmul.f32.gmra.mxu3 %v5215_v38  ;;  %v2537_v41 = vpop.f32.mrf.mxu0  ;;  %6967 = vst [vmem:[#allocation54_spill] sm:$0xff] %v5789_v21  ;;  %v1129_v38 = vsel %vm1043_vm7, %v1019_v7, 0  ;;  %v2671_v60 = vand.u32 4294901760, %v2670_v4  ;;  %v6895_v58 = vand.u32 4294901760, %v5789_v21  ;;  %v1021_v7 = vld [vmem:[%s6769_s2 + $0x1d8] sm:$0xff] }
 0x70f   :  { %2253 = vmatmul.f32.gmra.mxu2 %v5224_v55  ;;  %v2775_v46 = vpop.f32.mrf.mxu1 }
 0x711   :  { %v2347_v11 = vpop.f32.mrf.mxu3  ;;  %2664 = vmatmul.f32.gmra.mxu0 %v2663_v32  ;;  %v5795_v32 = vand.u32 4294901760, %v1129_v38 }
 0x712   :  { %v2190_v28 = vpop.f32.mrf.mxu2  ;;  %v2348_v5 = vadd.f32 %v2347_v11, %v2187_v29  ;;  %2838 = vmatmul.f32.gmra.mxu1 %v5738_v19 }
 0x713   :  { %v2191_v59 = vadd.f32 %v2190_v28, %v5262_v2  ;;  %v2678_v2 = vsub.f32 %v5789_v21, %v6895_v58  ;;  %v6970_v28 = vld [vmem:[#allocation7_spill] sm:$0xff] }
 0x714   :  { %v2530_v15 = vadd.f32 %v2529_v49, %v2348_v5  ;;  %v5808_v49 = vsub.f32 %v1129_v38, %v5795_v32  ;;  %v6972_v58 = vld [vmem:[#allocation3_spill] sm:$0xff] }
 0x715   :  { %v2679_v35 = vand.u32 4294901760, %v2678_v2 }
 0x716   :  { %v5797_v18 = vadd.f32 %v2771_v50, %v2530_v15  ;;  %2414 = vmatmul.f32.gmra.mxu3 %v5224_v55  ;;  %v2545_v33 = vpop.f32.mrf.mxu0  ;;  %6969 = vst [vmem:[#allocation56_spill] sm:$0xff] %v5808_v49  ;;  %v1132_v55 = vsel %vm1043_vm7, %v1021_v7, 0  ;;  %v1023_v7 = vld [vmem:[%s6769_s2 + $0x1e8] sm:$0xff] }
 0x717   :  { %2257 = vmatmul.f32.gmra.mxu2 %v5233_v23  ;;  %v2779_v29 = vpop.f32.mrf.mxu1 }
 0x718   :  { %6968 = vst [vmem:[#allocation55_spill] sm:$0xff] %v5797_v18  ;;  %v6900_v18 = vand.u32 4294901760, %v5808_v49 }
 0x719   :  { %v2351_v11 = vpop.f32.mrf.mxu3  ;;  %2672 = vmatmul.f32.gmra.mxu0 %v2671_v60  ;;  %v5814_v60 = vand.u32 4294901760, %v1132_v55 }
 0x71a   :  { %v2194_v50 = vpop.f32.mrf.mxu2  ;;  %v2352_v4 = vadd.f32 %v2351_v11, %v2191_v59  ;;  %2842 = vmatmul.f32.gmra.mxu1 %v5757_v16 }
 0x71b   :  { %v2195_v5 = vadd.f32 %v2194_v50, %v6970_v28  ;;  %v5827_v2 = vsub.f32 %v1132_v55, %v5814_v60 }
 0x71c   :  { %v2538_v15 = vadd.f32 %v2537_v41, %v2352_v4  ;;  %v2686_v41 = vsub.f32 %v5808_v49, %v6900_v18  ;;  %v6973_v4 = vld [vmem:[#allocation8_spill] sm:$0xff] }
 0x71d   :  { %v6903_v21 = vand.u32 4294901760, %v5827_v2  ;;  %v6975_v18 = vld [vmem:[#allocation4_spill] sm:$0xff] }
 0x71e   :  { %v5816_v36 = vadd.f32 %v2775_v46, %v2538_v15  ;;  %2418 = vmatmul.f32.gmra.mxu3 %v5233_v23  ;;  %v2553_v38 = vpop.f32.mrf.mxu0  ;;  %v1135_v23 = vsel %vm1043_vm7, %v1023_v7, 0  ;;  %v1025_v7 = vld [vmem:[%s6769_s2 + $0x1f8] sm:$0xff] }
 0x71f   :  { %2261 = vmatmul.f32.gmra.mxu2 %v6972_v58  ;;  %v2783_v59 = vpop.f32.mrf.mxu1 }
 0x720   :  { %6971 = vst [vmem:[#allocation7_spill] sm:$0xff] %v5816_v36  ;;  %v2687_v36 = vand.u32 4294901760, %v2686_v41 }
 0x721   :  { %v2355_v11 = vpop.f32.mrf.mxu3  ;;  %2680 = vmatmul.f32.gmra.mxu0 %v2679_v35  ;;  %v5833_v35 = vand.u32 4294901760, %v1135_v23 }
 0x722   :  { %v2198_v46 = vpop.f32.mrf.mxu2  ;;  %v2356_v50 = vadd.f32 %v2355_v11, %v2195_v5  ;;  %2846 = vmatmul.f32.gmra.mxu1 %v5776_v47 }
 0x723   :  { %v2199_v28 = vadd.f32 %v2198_v46, %v6973_v4  ;;  %v5846_v41 = vsub.f32 %v1135_v23, %v5833_v35 }
 0x724   :  { %v2546_v15 = vadd.f32 %v2545_v33, %v2356_v50  ;;  %v2694_v33 = vsub.f32 %v5827_v2, %v6903_v21  ;;  %v6978_v21 = vld [vmem:[#allocation5_spill] sm:$0xff] }
 0x726   :  { %v5835_v16 = vadd.f32 %v2779_v29, %v2546_v15  ;;  %2422 = vmatmul.f32.gmra.mxu3 %v6972_v58  ;;  %v2561_v55 = vpop.f32.mrf.mxu0  ;;  %v1138_v58 = vsel %vm1043_vm7, %v1025_v7, 0  ;;  %v2695_v15 = vand.u32 4294901760, %v2694_v33 }
 0x727   :  { %2265 = vmatmul.f32.gmra.mxu2 %v6975_v18  ;;  %v2787_v5 = vpop.f32.mrf.mxu1 }
 0x728   :  { %6974 = vst [vmem:[#allocation3_spill] sm:$0xff] %v5835_v16  ;;  %v6904_v16 = vand.u32 4294901760, %v5846_v41 }
 0x729   :  { %v2359_v11 = vpop.f32.mrf.mxu3  ;;  %2688 = vmatmul.f32.gmra.mxu0 %v2687_v36  ;;  %v5852_v36 = vand.u32 4294901760, %v1138_v58 }
 0x72a   :  { %v2202_v29 = vpop.f32.mrf.mxu2  ;;  %v2360_v46 = vadd.f32 %v2359_v11, %v2199_v28  ;;  %2850 = vmatmul.f32.gmra.mxu1 %v5795_v32 }
 0x72b   :  { %v2203_v50 = vadd.f32 %v2202_v29, %v5290_v27  ;;  %6976 = vst [vmem:[#allocation8_spill] sm:$0xff] %v5852_v36  ;;  %v2702_v27 = vsub.f32 %v5846_v41, %v6904_v16 }
 0x72c   :  { %v2554_v4 = vadd.f32 %v2553_v38, %v2360_v46  ;;  %v5862_v38 = vsub.f32 %v1138_v58, %v5852_v36 }
 0x72d   :  { %v2703_v29 = vand.u32 4294901760, %v2702_v27 }
 0x72e   :  { %v5854_v49 = vadd.f32 %v2783_v59, %v2554_v4  ;;  %2426 = vmatmul.f32.gmra.mxu3 %v6975_v18  ;;  %v2569_v23 = vpop.f32.mrf.mxu0  ;;  %v6905_v46 = vand.u32 4294901760, %v5862_v38 }
 0x72f   :  { %2269 = vmatmul.f32.gmra.mxu2 %v6978_v21  ;;  %v2791_v28 = vpop.f32.mrf.mxu1 }
 0x730   :  { %6977 = vst [vmem:[#allocation4_spill] sm:$0xff] %v5854_v49  ;;  %v6979_v49 = vld [vmem:[#allocation6_spill] sm:$0xff] }
 0x731   :  { %v2363_v11 = vpop.f32.mrf.mxu3  ;;  %2696 = vmatmul.f32.gmra.mxu0 %v2695_v15 }
 0x732   :  { %v2206_v7 = vpop.f32.mrf.mxu2  ;;  %v2364_v33 = vadd.f32 %v2363_v11, %v2203_v50  ;;  %2854 = vmatmul.f32.gmra.mxu1 %v5814_v60  ;;  %v2710_v50 = vsub.f32 %v5862_v38, %v6905_v46 }
 0x733   :  { %v2207_v59 = vadd.f32 %v2206_v7, %v5303_v45 }
 0x734   :  { %v2562_v18 = vadd.f32 %v2561_v55, %v2364_v33  ;;  %v2711_v27 = vand.u32 4294901760, %v2710_v50 }
 0x736   :  { %v5867_v4 = vadd.f32 %v2787_v5, %v2562_v18  ;;  %2430 = vmatmul.f32.gmra.mxu3 %v6978_v21  ;;  %v2577_v15 = vpop.f32.mrf.mxu0 }
 0x737   :  { %2273 = vmatmul.f32.gmra.mxu2 %v6979_v49  ;;  %v2795_v16 = vpop.f32.mrf.mxu1 }
 0x739   :  { %v2367_v58 = vpop.f32.mrf.mxu3  ;;  %2704 = vmatmul.f32.gmra.mxu0 %v2703_v29 }
 0x73a   :  { %v2210_v11 = vpop.f32.mrf.mxu2  ;;  %v2368_v45 = vadd.f32 %v2367_v58, %v2207_v59  ;;  %2858 = vmatmul.f32.gmra.mxu1 %v5833_v35 }
 0x73b   :  { %v2211_v55 = vadd.f32 %v2210_v11, %v5319_v22  ;;  %v6981_v11 = vld [vmem:[#allocation9_spill] sm:$0xff] }
 0x73c   :  { %v2570_v5 = vadd.f32 %v2569_v23, %v2368_v45 }
 0x73e   :  { %v5876_v7 = vadd.f32 %v2791_v28, %v2570_v5  ;;  %2434 = vmatmul.f32.gmra.mxu3 %v6979_v49  ;;  %v2585_v21 = vpop.f32.mrf.mxu0  ;;  %v6980_v28 = vld [vmem:[#allocation10_spill] sm:$0xff] }
 0x73f   :  { %2277 = vmatmul.f32.gmra.mxu2 %v5278_v20  ;;  %v2799_v33 = vpop.f32.mrf.mxu1 }
 0x741   :  { %v2371_v18 = vpop.f32.mrf.mxu3  ;;  %2712 = vmatmul.f32.gmra.mxu0 %v2711_v27 }
 0x742   :  { %v2214_v29 = vpop.f32.mrf.mxu2  ;;  %v2372_v46 = vadd.f32 %v2371_v18, %v2211_v55  ;;  %2862 = vmatmul.f32.gmra.mxu1 %v5852_v36 }
 0x743   :  { %v2215_v59 = vadd.f32 %v2214_v29, %v5337_v30  ;;  %v6984_v29 = vld [vmem:[#allocation11_spill] sm:$0xff] }
 0x744   :  { %v2578_v58 = vadd.f32 %v2577_v15, %v2372_v46  ;;  %v6983_v46 = vld [vmem:[#allocation12_spill] sm:$0xff] }
 0x746   :  { %v5882_v22 = vadd.f32 %v2795_v16, %v2578_v58  ;;  %2438 = vmatmul.f32.gmra.mxu3 %v5278_v20  ;;  %v2593_v23 = vpop.f32.mrf.mxu0  ;;  %v6982_v16 = vand.u32 4294901760, %v6980_v28 }
 0x747   :  { %2886 = vmatmul.f32.vlgmr.msrb.gmra.mxu2 %v6980_v28  ;;  %v2803_v49 = vpop.f32.mrf.mxu1 }
 0x749   :  { %v2375_v50 = vpop.f32.mrf.mxu3  ;;  %3275 = vmatmul.f32.vlgmr.msra.gmra.mxu0 %v6981_v11 }
 0x74a   :  { %v2218_v45 = vpop.f32.mrf.mxu2  ;;  %v2376_v5 = vadd.f32 %v2375_v50, %v2215_v59  ;;  %3421 = vmatmul.f32.vlgmr.msra.gmra.mxu1 %v6981_v11  ;;  %v6986_v50 = vld [vmem:[#allocation14_spill] sm:$0xff] }
 0x74b   :  { %v2219_v55 = vadd.f32 %v2218_v45, %v5355_v44 }
 0x74c   :  { %v2586_v27 = vadd.f32 %v2585_v21, %v2376_v5  ;;  %v6987_v5 = vld [vmem:[#allocation13_spill] sm:$0xff] }
 0x74e   :  { %v5889_v30 = vadd.f32 %v2799_v33, %v2586_v27  ;;  %3065 = vmatmul.f32.vlgmr.msrb.gmra.mxu3 %v6982_v16  ;;  %v2601_v20 = vpop.f32.mrf.mxu0  ;;  %v6985_v33 = vand.u32 4294901760, %v6983_v46 }
 0x74f   :  { %2891 = vmatmul.f32.gmra.mxu2 %v6983_v46  ;;  %v2807_v15 = vpop.f32.mrf.mxu1  ;;  %v6989_v46 = vld [vmem:[#allocation16_spill] sm:$0xff] }
 0x751   :  { %v2379_v18 = vpop.f32.mrf.mxu3  ;;  %3279 = vmatmul.f32.gmra.mxu0 %v6984_v29 }
 0x752   :  { %v2222_v58 = vpop.f32.mrf.mxu2  ;;  %v2380_v36 = vadd.f32 %v2379_v18, %v2219_v55  ;;  %3425 = vmatmul.f32.gmra.mxu1 %v6984_v29 }
 0x753   :  { %v2223_v59 = vadd.f32 %v2222_v58, %v5373_v14  ;;  %v6990_v58 = vld [vmem:[#allocation15_spill] sm:$0xff] }
 0x754   :  { %v2594_v44 = vadd.f32 %v2593_v23, %v2380_v36  ;;  %v6988_v23 = vand.u32 4294901760, %v6986_v50 }
 0x756   :  { %v5897_v21 = vadd.f32 %v2803_v49, %v2594_v44  ;;  %3071 = vmatmul.f32.gmra.mxu3 %v6985_v33  ;;  %v2609_v28 = vpop.f32.mrf.mxu0 }
 0x757   :  { %2896 = vmatmul.f32.gmra.mxu2 %v6986_v50  ;;  %v2811_v11 = vpop.f32.mrf.mxu1 }
 0x759   :  { %v2383_v45 = vpop.f32.mrf.mxu3  ;;  %3283 = vmatmul.f32.gmra.mxu0 %v6987_v5 }
 0x75a   :  { %v2226_v27 = vpop.f32.mrf.mxu2  ;;  %v2384_v16 = vadd.f32 %v2383_v45, %v2223_v59  ;;  %3429 = vmatmul.f32.gmra.mxu1 %v6987_v5  ;;  %v6992_v45 = vld [vmem:[#allocation18_spill] sm:$0xff] }
 0x75b   :  { %v2227_v55 = vadd.f32 %v2226_v27, %v5391_v8 }
 0x75c   :  { %v2602_v14 = vadd.f32 %v2601_v20, %v2384_v16  ;;  %v6993_v16 = vld [vmem:[#allocation17_spill] sm:$0xff] }
 0x75e   :  { %v5905_v36 = vadd.f32 %v2807_v15, %v2602_v14  ;;  %3077 = vmatmul.f32.gmra.mxu3 %v6988_v23  ;;  %v2617_v49 = vpop.f32.mrf.mxu0  ;;  %v6991_v15 = vand.u32 4294901760, %v6989_v46 }
 0x75f   :  { %2901 = vmatmul.f32.gmra.mxu2 %v6989_v46  ;;  %v2815_v18 = vpop.f32.mrf.mxu1 }
 0x761   :  { %v2387_v29 = vpop.f32.mrf.mxu3  ;;  %3287 = vmatmul.f32.gmra.mxu0 %v6990_v58 }
 0x762   :  { %v2230_v44 = vpop.f32.mrf.mxu2  ;;  %v2388_v33 = vadd.f32 %v2387_v29, %v2227_v55  ;;  %3433 = vmatmul.f32.gmra.mxu1 %v6990_v58  ;;  %v6995_v29 = vld [vmem:[#allocation20_spill] sm:$0xff] }
 0x763   :  { %v2231_v59 = vadd.f32 %v2230_v44, %v5409_v53 }
 0x764   :  { %v2610_v8 = vadd.f32 %v2609_v28, %v2388_v33  ;;  %v6996_v33 = vld [vmem:[#allocation19_spill] sm:$0xff] }
 0x766   :  { %v5913_v20 = vadd.f32 %v2811_v11, %v2610_v8  ;;  %3083 = vmatmul.f32.gmra.mxu3 %v6991_v15  ;;  %v2625_v50 = vpop.f32.mrf.mxu0  ;;  %v6994_v11 = vand.u32 4294901760, %v6992_v45 }
 0x767   :  { %2906 = vmatmul.f32.gmra.mxu2 %v6992_v45  ;;  %v2819_v5 = vpop.f32.mrf.mxu1 }
 0x769   :  { %v2391_v27 = vpop.f32.mrf.mxu3  ;;  %3291 = vmatmul.f32.gmra.mxu0 %v6993_v16 }
 0x76a   :  { %v2234_v14 = vpop.f32.mrf.mxu2  ;;  %v2392_v23 = vadd.f32 %v2391_v27, %v2231_v59  ;;  %3437 = vmatmul.f32.gmra.mxu1 %v6993_v16  ;;  %v6998_v27 = vld [vmem:[#allocation22_spill] sm:$0xff] }
 0x76b   :  { %v2235_v55 = vadd.f32 %v2234_v14, %v5427_v17 }
 0x76c   :  { %v2618_v53 = vadd.f32 %v2617_v49, %v2392_v23  ;;  %v6999_v23 = vld [vmem:[#allocation21_spill] sm:$0xff] }
 0x76e   :  { %v5921_v28 = vadd.f32 %v2815_v18, %v2618_v53  ;;  %3089 = vmatmul.f32.gmra.mxu3 %v6994_v11  ;;  %v2633_v46 = vpop.f32.mrf.mxu0  ;;  %v6997_v18 = vand.u32 4294901760, %v6995_v29 }
 0x76f   :  { %2911 = vmatmul.f32.gmra.mxu2 %v6995_v29  ;;  %v2823_v58 = vpop.f32.mrf.mxu1 }
 0x771   :  { %v2395_v44 = vpop.f32.mrf.mxu3  ;;  %3295 = vmatmul.f32.gmra.mxu0 %v6996_v33 }
 0x772   :  { %v2238_v8 = vpop.f32.mrf.mxu2  ;;  %v2396_v15 = vadd.f32 %v2395_v44, %v2235_v55  ;;  %3441 = vmatmul.f32.gmra.mxu1 %v6996_v33  ;;  %v7001_v44 = vld [vmem:[#allocation24_spill] sm:$0xff] }
 0x773   :  { %v2239_v59 = vadd.f32 %v2238_v8, %v5445_v1 }
 0x774   :  { %v2626_v17 = vadd.f32 %v2625_v50, %v2396_v15  ;;  %v7002_v15 = vld [vmem:[#allocation23_spill] sm:$0xff] }
 0x776   :  { %v5929_v49 = vadd.f32 %v2819_v5, %v2626_v17  ;;  %3095 = vmatmul.f32.gmra.mxu3 %v6997_v18  ;;  %v2641_v45 = vpop.f32.mrf.mxu0  ;;  %v7000_v5 = vand.u32 4294901760, %v6998_v27 }
 0x777   :  { %2916 = vmatmul.f32.gmra.mxu2 %v6998_v27  ;;  %v2827_v16 = vpop.f32.mrf.mxu1 }
 0x779   :  { %v2399_v14 = vpop.f32.mrf.mxu3  ;;  %3299 = vmatmul.f32.gmra.mxu0 %v6999_v23 }
 0x77a   :  { %v2242_v53 = vpop.f32.mrf.mxu2  ;;  %v2400_v11 = vadd.f32 %v2399_v14, %v2239_v59  ;;  %3445 = vmatmul.f32.gmra.mxu1 %v6999_v23  ;;  %v7004_v14 = vld [vmem:[#allocation26_spill] sm:$0xff] }
 0x77b   :  { %v2243_v55 = vadd.f32 %v2242_v53, %v5463_v57 }
 0x77c   :  { %v2634_v1 = vadd.f32 %v2633_v46, %v2400_v11  ;;  %v7005_v11 = vld [vmem:[#allocation25_spill] sm:$0xff] }
 0x77e   :  { %v5937_v50 = vadd.f32 %v2823_v58, %v2634_v1  ;;  %3101 = vmatmul.f32.gmra.mxu3 %v7000_v5  ;;  %v2649_v29 = vpop.f32.mrf.mxu0  ;;  %v7003_v58 = vand.u32 4294901760, %v7001_v44 }
 0x77f   :  { %2921 = vmatmul.f32.gmra.mxu2 %v7001_v44  ;;  %v2831_v33 = vpop.f32.mrf.mxu1 }
 0x781   :  { %v2403_v8 = vpop.f32.mrf.mxu3  ;;  %3303 = vmatmul.f32.gmra.mxu0 %v7002_v15 }
 0x782   :  { %v2246_v17 = vpop.f32.mrf.mxu2  ;;  %v2404_v18 = vadd.f32 %v2403_v8, %v2243_v55  ;;  %3449 = vmatmul.f32.gmra.mxu1 %v7002_v15  ;;  %v7007_v8 = vld [vmem:[#allocation28_spill] sm:$0xff] }
 0x783   :  { %v2247_v59 = vadd.f32 %v2246_v17, %v5481_v61 }
 0x784   :  { %v2642_v57 = vadd.f32 %v2641_v45, %v2404_v18  ;;  %v7008_v18 = vld [vmem:[#allocation27_spill] sm:$0xff] }
 0x786   :  { %v5945_v46 = vadd.f32 %v2827_v16, %v2642_v57  ;;  %3107 = vmatmul.f32.gmra.mxu3 %v7003_v58  ;;  %v2657_v27 = vpop.f32.mrf.mxu0  ;;  %v7006_v16 = vand.u32 4294901760, %v7004_v14 }
 0x787   :  { %2926 = vmatmul.f32.gmra.mxu2 %v7004_v14  ;;  %v2835_v23 = vpop.f32.mrf.mxu1 }
 0x789   :  { %v2407_v53 = vpop.f32.mrf.mxu3  ;;  %3307 = vmatmul.f32.gmra.mxu0 %v7005_v11 }
 0x78a   :  { %v2250_v1 = vpop.f32.mrf.mxu2  ;;  %v2408_v5 = vadd.f32 %v2407_v53, %v2247_v59  ;;  %3453 = vmatmul.f32.gmra.mxu1 %v7005_v11  ;;  %v7011_v53 = vld [vmem:[#allocation30_spill] sm:$0xff] }
 0x78b   :  { %v2251_v55 = vadd.f32 %v2250_v1, %v5499_v12 }
 0x78c   :  { %v2650_v61 = vadd.f32 %v2649_v29, %v2408_v5  ;;  %v7012_v5 = vld [vmem:[#allocation29_spill] sm:$0xff] }
 0x78e   :  { %v5953_v45 = vadd.f32 %v2831_v33, %v2650_v61  ;;  %3113 = vmatmul.f32.gmra.mxu3 %v7006_v16  ;;  %v2665_v44 = vpop.f32.mrf.mxu0  ;;  %v7010_v33 = vand.u32 4294901760, %v7007_v8 }
 0x78f   :  { %2931 = vmatmul.f32.gmra.mxu2 %v7007_v8  ;;  %v2839_v15 = vpop.f32.mrf.mxu1 }
 0x791   :  { %v2411_v17 = vpop.f32.mrf.mxu3  ;;  %3311 = vmatmul.f32.gmra.mxu0 %v7008_v18 }
 0x792   :  { %v2254_v57 = vpop.f32.mrf.mxu2  ;;  %v2412_v58 = vadd.f32 %v2411_v17, %v2251_v55  ;;  %3457 = vmatmul.f32.gmra.mxu1 %v7008_v18  ;;  %v7015_v17 = vld [vmem:[#allocation32_spill] sm:$0xff] }
 0x793   :  { %v2255_v59 = vadd.f32 %v2254_v57, %v5517_v48 }
 0x794   :  { %v2658_v12 = vadd.f32 %v2657_v27, %v2412_v58  ;;  %v7016_v58 = vld [vmem:[#allocation31_spill] sm:$0xff] }
 0x796   :  { %v5961_v29 = vadd.f32 %v2835_v23, %v2658_v12  ;;  %3119 = vmatmul.f32.gmra.mxu3 %v7010_v33  ;;  %v2673_v14 = vpop.f32.mrf.mxu0  ;;  %v7014_v23 = vand.u32 4294901760, %v7011_v53 }
 0x797   :  { %2936 = vmatmul.f32.gmra.mxu2 %v7011_v53  ;;  %v2843_v11 = vpop.f32.mrf.mxu1 }
 0x798   :  { %7009 = vst [vmem:[#allocation5_spill] sm:$0xff] %v5961_v29 }
 0x799   :  { %v2415_v1 = vpop.f32.mrf.mxu3  ;;  %3315 = vmatmul.f32.gmra.mxu0 %v7012_v5 }
 0x79a   :  { %v2258_v61 = vpop.f32.mrf.mxu2  ;;  %v2416_v16 = vadd.f32 %v2415_v1, %v2255_v59  ;;  %3461 = vmatmul.f32.gmra.mxu1 %v7012_v5  ;;  %v7019_v1 = vld [vmem:[#allocation34_spill] sm:$0xff] }
 0x79b   :  { %v2259_v55 = vadd.f32 %v2258_v61, %v5535_v26 }
 0x79c   :  { %v2666_v48 = vadd.f32 %v2665_v44, %v2416_v16  ;;  %v7020_v16 = vld [vmem:[#allocation33_spill] sm:$0xff] }
 0x79e   :  { %v5969_v27 = vadd.f32 %v2839_v15, %v2666_v48  ;;  %3125 = vmatmul.f32.gmra.mxu3 %v7014_v23  ;;  %v2681_v8 = vpop.f32.mrf.mxu0  ;;  %v7018_v15 = vand.u32 4294901760, %v7015_v17 }
 0x79f   :  { %2941 = vmatmul.f32.gmra.mxu2 %v7015_v17  ;;  %v2847_v18 = vpop.f32.mrf.mxu1 }
 0x7a0   :  { %7013 = vst [vmem:[#allocation6_spill] sm:$0xff] %v5969_v27 }
 0x7a1   :  { %v2419_v57 = vpop.f32.mrf.mxu3  ;;  %3319 = vmatmul.f32.gmra.mxu0 %v7016_v58 }
 0x7a2   :  { %v2262_v12 = vpop.f32.mrf.mxu2  ;;  %v2420_v33 = vadd.f32 %v2419_v57, %v2259_v55  ;;  %3465 = vmatmul.f32.gmra.mxu1 %v7016_v58  ;;  %v7023_v57 = vld [vmem:[#allocation36_spill] sm:$0xff] }
 0x7a3   :  { %v2263_v59 = vadd.f32 %v2262_v12, %v5553_v42 }
 0x7a4   :  { %v2674_v26 = vadd.f32 %v2673_v14, %v2420_v33  ;;  %v7024_v33 = vld [vmem:[#allocation35_spill] sm:$0xff] }
 0x7a6   :  { %v5977_v44 = vadd.f32 %v2843_v11, %v2674_v26  ;;  %3131 = vmatmul.f32.gmra.mxu3 %v7018_v15  ;;  %v2689_v53 = vpop.f32.mrf.mxu0  ;;  %v7022_v11 = vand.u32 4294901760, %v7019_v1 }
 0x7a7   :  { %2946 = vmatmul.f32.gmra.mxu2 %v7019_v1  ;;  %v2851_v5 = vpop.f32.mrf.mxu1 }
 0x7a8   :  { %7017 = vst [vmem:[#allocation10_spill] sm:$0xff] %v5977_v44 }
 0x7a9   :  { %v2423_v61 = vpop.f32.mrf.mxu3  ;;  %3323 = vmatmul.f32.gmra.mxu0 %v7020_v16 }
 0x7aa   :  { %v2266_v48 = vpop.f32.mrf.mxu2  ;;  %v2424_v23 = vadd.f32 %v2423_v61, %v2263_v59  ;;  %3469 = vmatmul.f32.gmra.mxu1 %v7020_v16  ;;  %v7027_v61 = vld [vmem:[#allocation38_spill] sm:$0xff] }
 0x7ab   :  { %v2267_v55 = vadd.f32 %v2266_v48, %v5571_v51 }
 0x7ac   :  { %v2682_v42 = vadd.f32 %v2681_v8, %v2424_v23  ;;  %v7028_v23 = vld [vmem:[#allocation37_spill] sm:$0xff] }
 0x7ae   :  { %v5985_v14 = vadd.f32 %v2847_v18, %v2682_v42  ;;  %3137 = vmatmul.f32.gmra.mxu3 %v7022_v11  ;;  %v2697_v17 = vpop.f32.mrf.mxu0  ;;  %v7026_v18 = vand.u32 4294901760, %v7023_v57 }
 0x7af   :  { %2951 = vmatmul.f32.gmra.mxu2 %v7023_v57  ;;  %v2855_v58 = vpop.f32.mrf.mxu1 }
 0x7b0   :  { %7021 = vst [vmem:[#allocation9_spill] sm:$0xff] %v5985_v14  ;;  %v7067_v14 = vld [vmem:[#allocation3_spill] sm:$0xff] }
 0x7b1   :  { %v2427_v12 = vpop.f32.mrf.mxu3  ;;  %3327 = vmatmul.f32.gmra.mxu0 %v7024_v33 }
 0x7b2   :  { %v2270_v26 = vpop.f32.mrf.mxu2  ;;  %v2428_v15 = vadd.f32 %v2427_v12, %v2267_v55  ;;  %3473 = vmatmul.f32.gmra.mxu1 %v7024_v33  ;;  %v7029_v55 = vld [vmem:[#allocation43_spill] sm:$0xff]  ;;  %v7032_v33 = vld [vmem:[#allocation40_spill] sm:$0xff] }
 0x7b3   :  { %v2271_v59 = vadd.f32 %v2270_v26, %v5589_v10 }
 0x7b4   :  { %v2690_v51 = vadd.f32 %v2689_v53, %v2428_v15 }
 0x7b6   :  { %v5993_v8 = vadd.f32 %v2851_v5, %v2690_v51  ;;  %3143 = vmatmul.f32.gmra.mxu3 %v7026_v18  ;;  %v2705_v1 = vpop.f32.mrf.mxu0  ;;  %v7031_v5 = vand.u32 4294901760, %v7027_v61  ;;  %v7033_v51 = vld [vmem:[#allocation39_spill] sm:$0xff] }
 0x7b7   :  { %2956 = vmatmul.f32.gmra.mxu2 %v7027_v61  ;;  %v2859_v16 = vpop.f32.mrf.mxu1 }
 0x7b8   :  { %7025 = vst [vmem:[#allocation12_spill] sm:$0xff] %v5993_v8 }
 0x7b9   :  { %v2431_v48 = vpop.f32.mrf.mxu3  ;;  %3331 = vmatmul.f32.gmra.mxu0 %v7028_v23 }
 0x7ba   :  { %v2274_v42 = vpop.f32.mrf.mxu2  ;;  %v2432_v11 = vadd.f32 %v2431_v48, %v2271_v59  ;;  %3477 = vmatmul.f32.gmra.mxu1 %v7028_v23  ;;  %v7036_v23 = vld [vmem:[#allocation41_spill] sm:$0xff] }
 0x7bb   :  { %v2275_v12 = vadd.f32 %v2274_v42, %v7029_v55 }
 0x7bc   :  { %v2698_v10 = vadd.f32 %v2697_v17, %v2432_v11 }
 0x7be   :  { %v6001_v53 = vadd.f32 %v2855_v58, %v2698_v10  ;;  %3149 = vmatmul.f32.gmra.mxu3 %v7031_v5  ;;  %v2713_v57 = vpop.f32.mrf.mxu0  ;;  %v7035_v58 = vand.u32 4294901760, %v7032_v33  ;;  %v7039_v5 = vld [vmem:[#allocation42_spill] sm:$0xff] }
 0x7bf   :  { %2961 = vmatmul.f32.gmra.mxu2 %v7032_v33  ;;  %v2863_v26 = vpop.f32.mrf.mxu1 }
 0x7c0   :  { %7030 = vst [vmem:[#allocation11_spill] sm:$0xff] %v6001_v53  ;;  %v7068_v53 = vld [vmem:[#allocation8_spill] sm:$0xff] }
 0x7c1   :  { %v2435_v15 = vpop.f32.mrf.mxu3  ;;  %3335 = vmatmul.f32.gmra.mxu0 %v7033_v51 }
 0x7c2   :  { %v2278_v18 = vpop.f32.mrf.mxu2  ;;  %v2436_v27 = vadd.f32 %v2435_v15, %v2275_v12  ;;  %3481 = vmatmul.f32.gmra.mxu1 %v7033_v51 }
 0x7c3   :  { %v2279_v59 = vadd.f32 %v2278_v18, %v5626_v63 }
 0x7c4   :  { %v2706_v48 = vadd.f32 %v2705_v1, %v2436_v27  ;;  %v7038_v1 = vand.u32 4294901760, %v7036_v23 }
 0x7c6   :  { %v6009_v17 = vadd.f32 %v2859_v16, %v2706_v48  ;;  %3155 = vmatmul.f32.gmra.mxu3 %v7035_v58  ;;  %v3276_v61 = vpop.f32.mrf.mxu0  ;;  %v7041_v48 = vld [vmem:[#allocation44_spill] sm:$0xff] }
 0x7c7   :  { %2966 = vmatmul.f32.gmra.mxu2 %v7036_v23  ;;  %v3422_v42 = vpop.f32.mrf.mxu1 }
 0x7c8   :  { %7034 = vst [vmem:[#allocation14_spill] sm:$0xff] %v6009_v17 }
 0x7c9   :  { %v2439_v11 = vpop.f32.mrf.mxu3  ;;  %3339 = vmatmul.f32.gmra.mxu0 %v5569_v40 }
 0x7ca   :  { %v2440_v55 = vadd.f32 %v2439_v11, %v2279_v59  ;;  %v2887_v10 = vpop.f32.mrf.mxu2  ;;  %3485 = vmatmul.f32.gmra.mxu1 %v5569_v40 }
 0x7cb   :  { %v2888_v12 = vadd.f32 %v2887_v10, %v5645_v25 }
 0x7cc   :  { %v2714_v63 = vadd.f32 %v2713_v57, %v2440_v55 }
 0x7ce   :  { %v6017_v27 = vadd.f32 %v2863_v26, %v2714_v63  ;;  %3161 = vmatmul.f32.gmra.mxu3 %v7038_v1  ;;  %v3280_v16 = vpop.f32.mrf.mxu0  ;;  %v7040_v26 = vand.u32 4294901760, %v7039_v5 }
 0x7cf   :  { %2971 = vmatmul.f32.gmra.mxu2 %v7039_v5  ;;  %v3426_v33 = vpop.f32.mrf.mxu1 }
 0x7d0   :  { %7037 = vst [vmem:[#allocation13_spill] sm:$0xff] %v6017_v27 }
 0x7d1   :  { %v3066_v15 = vpop.f32.mrf.mxu3  ;;  %3343 = vmatmul.f32.gmra.mxu0 %v5587_v54 }
 0x7d2   :  { %v2892_v51 = vpop.f32.mrf.mxu2  ;;  %v3067_v18 = vadd.f32 %v3066_v15, %v2888_v12  ;;  %3489 = vmatmul.f32.gmra.mxu1 %v5587_v54  ;;  %v7043_v12 = vld [vmem:[#allocation45_spill] sm:$0xff] }
 0x7d3   :  { %v2893_v40 = vadd.f32 %v2892_v51, %v5664_v24 }
 0x7d4   :  { %v3277_v25 = vadd.f32 %v3276_v61, %v3067_v18  ;;  %v7045_v18 = vld [vmem:[#allocation46_spill] sm:$0xff] }
 0x7d6   :  { %v6025_v57 = vadd.f32 %v3422_v42, %v3277_v25  ;;  %3167 = vmatmul.f32.gmra.mxu3 %v7040_v26  ;;  %v3284_v59 = vpop.f32.mrf.mxu0  ;;  %v7042_v42 = vand.u32 4294901760, %v7041_v48 }
 0x7d7   :  { %2976 = vmatmul.f32.gmra.mxu2 %v7041_v48  ;;  %v3430_v58 = vpop.f32.mrf.mxu1 }
 0x7d9   :  { %v3072_v23 = vpop.f32.mrf.mxu3  ;;  %3347 = vmatmul.f32.gmra.mxu0 %v5605_v13 }
 0x7da   :  { %v2897_v11 = vpop.f32.mrf.mxu2  ;;  %v3073_v55 = vadd.f32 %v3072_v23, %v2893_v40  ;;  %3493 = vmatmul.f32.gmra.mxu1 %v5605_v13 }
 0x7db   :  { %v2898_v54 = vadd.f32 %v2897_v11, %v5683_v39  ;;  %v7047_v11 = vld [vmem:[#allocation47_spill] sm:$0xff] }
 0x7dc   :  { %v3281_v24 = vadd.f32 %v3280_v16, %v3073_v55 }
 0x7de   :  { %v6033_v61 = vadd.f32 %v3426_v33, %v3281_v24  ;;  %3173 = vmatmul.f32.gmra.mxu3 %v7042_v42  ;;  %v3288_v10 = vpop.f32.mrf.mxu0  ;;  %v7044_v33 = vand.u32 4294901760, %v7043_v12 }
 0x7df   :  { %2981 = vmatmul.f32.gmra.mxu2 %v7043_v12  ;;  %v3434_v63 = vpop.f32.mrf.mxu1  ;;  %v7048_v12 = vand.u32 4294901760, %v7047_v11 }
 0x7e1   :  { %v3078_v1 = vpop.f32.mrf.mxu3  ;;  %3351 = vmatmul.f32.gmra.mxu0 %v5624_v9 }
 0x7e2   :  { %v2902_v5 = vpop.f32.mrf.mxu2  ;;  %v3079_v15 = vadd.f32 %v3078_v1, %v2898_v54  ;;  %3497 = vmatmul.f32.gmra.mxu1 %v5624_v9  ;;  %v7049_v1 = vld [vmem:[#allocation48_spill] sm:$0xff] }
 0x7e3   :  { %v2903_v13 = vadd.f32 %v2902_v5, %v5702_v56 }
 0x7e4   :  { %v3285_v39 = vadd.f32 %v3284_v59, %v3079_v15 }
 0x7e6   :  { %v6041_v16 = vadd.f32 %v3430_v58, %v3285_v39  ;;  %3179 = vmatmul.f32.gmra.mxu3 %v7044_v33  ;;  %v3292_v51 = vpop.f32.mrf.mxu0  ;;  %v7046_v58 = vand.u32 4294901760, %v7045_v18 }
 0x7e7   :  { %2986 = vmatmul.f32.gmra.mxu2 %v7045_v18  ;;  %v3438_v40 = vpop.f32.mrf.mxu1 }
 0x7e9   :  { %v3084_v25 = vpop.f32.mrf.mxu3  ;;  %3355 = vmatmul.f32.gmra.mxu0 %v5643_v34 }
 0x7ea   :  { %v2907_v26 = vpop.f32.mrf.mxu2  ;;  %v3085_v48 = vadd.f32 %v3084_v25, %v2903_v13  ;;  %3501 = vmatmul.f32.gmra.mxu1 %v5643_v34 }
 0x7eb   :  { %v2908_v9 = vadd.f32 %v2907_v26, %v5721_v52 }
 0x7ec   :  { %v3289_v56 = vadd.f32 %v3288_v10, %v3085_v48 }
 0x7ee   :  { %v6049_v59 = vadd.f32 %v3434_v63, %v3289_v56  ;;  %3185 = vmatmul.f32.gmra.mxu3 %v7046_v58  ;;  %v3296_v23 = vpop.f32.mrf.mxu0 }
 0x7ef   :  { %2991 = vmatmul.f32.gmra.mxu2 %v7047_v11  ;;  %v3442_v55 = vpop.f32.mrf.mxu1  ;;  %v7053_v11 = vld [vmem:[#allocation50_spill] sm:$0xff] }
 0x7f1   :  { %v3090_v54 = vpop.f32.mrf.mxu3  ;;  %3359 = vmatmul.f32.gmra.mxu0 %v5662_v0 }
 0x7f2   :  { %v2912_v24 = vpop.f32.mrf.mxu2  ;;  %v3091_v42 = vadd.f32 %v3090_v54, %v2908_v9  ;;  %3505 = vmatmul.f32.gmra.mxu1 %v5662_v0 }
 0x7f3   :  { %v2913_v34 = vadd.f32 %v2912_v24, %v5740_v6 }
 0x7f4   :  { %v3293_v52 = vadd.f32 %v3292_v51, %v3091_v42  ;;  %v7050_v51 = vand.u32 4294901760, %v7049_v1 }
 0x7f6   :  { %v6057_v10 = vadd.f32 %v3438_v40, %v3293_v52  ;;  %3191 = vmatmul.f32.gmra.mxu3 %v7048_v12  ;;  %v3300_v63 = vpop.f32.mrf.mxu0  ;;  %v7051_v40 = vld [vmem:[#allocation49_spill] sm:$0xff]  ;;  %v7055_v12 = vld [vmem:[#allocation51_spill] sm:$0xff] }
 0x7f7   :  { %2996 = vmatmul.f32.gmra.mxu2 %v7049_v1  ;;  %v3446_v5 = vpop.f32.mrf.mxu1  ;;  %v7052_v58 = vand.u32 4294901760, %v7051_v40 }
 0x7f9   :  { %v3096_v15 = vpop.f32.mrf.mxu3  ;;  %3363 = vmatmul.f32.gmra.mxu0 %v5681_v37 }
 0x7fa   :  { %v2917_v13 = vpop.f32.mrf.mxu2  ;;  %v3097_v39 = vadd.f32 %v3096_v15, %v2913_v34  ;;  %3509 = vmatmul.f32.gmra.mxu1 %v5681_v37  ;;  %v7054_v34 = vand.u32 4294901760, %v7053_v11 }
 0x7fb   :  { %v2918_v0 = vadd.f32 %v2917_v13, %v5759_v43  ;;  %v7057_v13 = vld [vmem:[#allocation53_spill] sm:$0xff] }
 0x7fc   :  { %v3297_v6 = vadd.f32 %v3296_v23, %v3097_v39 }
 0x7fe   :  { %v6065_v33 = vadd.f32 %v3442_v55, %v3297_v6  ;;  %3197 = vmatmul.f32.gmra.mxu3 %v7050_v51  ;;  %v3304_v18 = vpop.f32.mrf.mxu0  ;;  %v7058_v6 = vld [vmem:[#allocation52_spill] sm:$0xff] }
 0x7ff   :  { %3001 = vmatmul.f32.gmra.mxu2 %v7051_v40  ;;  %v3450_v25 = vpop.f32.mrf.mxu1 }
 0x801   :  { %v3102_v26 = vpop.f32.mrf.mxu3  ;;  %3367 = vmatmul.f32.gmra.mxu0 %v5700_v31 }
 0x802   :  { %v2922_v48 = vpop.f32.mrf.mxu2  ;;  %v3103_v9 = vadd.f32 %v3102_v26, %v2918_v0  ;;  %3513 = vmatmul.f32.gmra.mxu1 %v5700_v31 }
 0x803   :  { %v2923_v37 = vadd.f32 %v2922_v48, %v5778_v3 }
 0x804   :  { %v3301_v43 = vadd.f32 %v3300_v63, %v3103_v9 }
 0x806   :  { %v6073_v56 = vadd.f32 %v3446_v5, %v3301_v43  ;;  %3203 = vmatmul.f32.gmra.mxu3 %v7052_v58  ;;  %v6077_v23 = vpop.f32.mrf.mxu0  ;;  %v7062_v43 = vld [vmem:[#allocation56_spill] sm:$0xff] }
 0x807   :  { %3006 = vmatmul.f32.gmra.mxu2 %v7053_v11  ;;  %v6080_v55 = vpop.f32.mrf.mxu1 }
 0x809   :  { %v3108_v54 = vpop.f32.mrf.mxu3  ;;  %3371 = vmatmul.f32.gmra.mxu0 %v5719_v62 }
 0x80a   :  { %v6083_v24 = vpop.f32.mrf.mxu2  ;;  %v3109_v31 = vadd.f32 %v3108_v54, %v2923_v37  ;;  %3517 = vmatmul.f32.gmra.mxu1 %v5719_v62  ;;  %v7056_v62 = vand.u32 4294901760, %v7055_v12 }
 0x80c   :  { %v3305_v3 = vadd.f32 %v3304_v18, %v3109_v31  ;;  %v7059_v18 = vand.u32 4294901760, %v7057_v13  ;;  %v7063_v31 = vand.u32 4294901760, %v7062_v43 }
 0x80e   :  { %v6086_v42 = vadd.f32 %v3450_v25, %v3305_v3  ;;  %3209 = vmatmul.f32.gmra.mxu3 %v7054_v34  ;;  %v6090_v52 = vpop.f32.mrf.mxu0 }
 0x80f   :  { %3011 = vmatmul.f32.gmra.mxu2 %v7055_v12  ;;  %v6093_v63 = vpop.f32.mrf.mxu1 }
 0x811   :  { %v6095_v1 = vpop.f32.mrf.mxu3  ;;  %3375 = vmatmul.f32.gmra.mxu0 %v5738_v19 }
 0x812   :  { %v2932_v5 = vpop.f32.mrf.mxu2  ;;  %3521 = vmatmul.f32.gmra.mxu1 %v5738_v19  ;;  %v7060_v19 = vld [vmem:[#allocation54_spill] sm:$0xff] }
 0x813   :  { %v7061_v9 = vand.u32 4294901760, %v7060_v19 }
 0x816   :  { %3215 = vmatmul.f32.gmra.mxu3 %v7056_v62  ;;  %v6101_v15 = vpop.f32.mrf.mxu0  ;;  %v7064_v62 = vand.u32 4294901760, %v5827_v2 }
 0x817   :  { %3016 = vmatmul.f32.gmra.mxu2 %v7057_v13  ;;  %v6104_v39 = vpop.f32.mrf.mxu1 }
 0x819   :  { %v3120_v0 = vpop.f32.mrf.mxu3  ;;  %3379 = vmatmul.f32.gmra.mxu0 %v7058_v6 }
 0x81a   :  { %v2937_v51 = vpop.f32.mrf.mxu2  ;;  %3525 = vmatmul.f32.gmra.mxu1 %v7058_v6 }
 0x81b   :  { %v2938_v8 = vadd.f32 %v2937_v51, %v7067_v14 }
 0x81e   :  { %3221 = vmatmul.f32.gmra.mxu3 %v7059_v18  ;;  %v3320_v40 = vpop.f32.mrf.mxu0 }
 0x81f   :  { %3021 = vmatmul.f32.gmra.mxu2 %v7060_v19  ;;  %v6111_v25 = vpop.f32.mrf.mxu1 }
 0x821   :  { %v3126_v26 = vpop.f32.mrf.mxu3  ;;  %3383 = vmatmul.f32.gmra.mxu0 %v5776_v47 }
 0x822   :  { %v2942_v48 = vpop.f32.mrf.mxu2  ;;  %3529 = vmatmul.f32.gmra.mxu1 %v5776_v47 }
 0x826   :  { %3227 = vmatmul.f32.gmra.mxu3 %v7061_v9  ;;  %v3324_v37 = vpop.f32.mrf.mxu0 }
 0x827   :  { %3026 = vmatmul.f32.gmra.mxu2 %v7062_v43  ;;  %v3470_v58 = vpop.f32.mrf.mxu1 }
 0x829   :  { %v3132_v11 = vpop.f32.mrf.mxu3  ;;  %3387 = vmatmul.f32.gmra.mxu0 %v5795_v32 }
 0x82a   :  { %v2947_v54 = vpop.f32.mrf.mxu2  ;;  %3533 = vmatmul.f32.gmra.mxu1 %v5795_v32 }
 0x82b   :  { %v2948_v9 = vadd.f32 %v2947_v54, %v5867_v4 }
 0x82e   :  { %3233 = vmatmul.f32.gmra.mxu3 %v7063_v31  ;;  %v3328_v3 = vpop.f32.mrf.mxu0 }
 0x82f   :  { %3031 = vmatmul.f32.gmra.mxu2 %v5827_v2  ;;  %v3474_v47 = vpop.f32.mrf.mxu1 }
 0x831   :  { %v3138_v34 = vpop.f32.mrf.mxu3  ;;  %3391 = vmatmul.f32.gmra.mxu0 %v5814_v60 }
 0x832   :  { %v2952_v12 = vpop.f32.mrf.mxu2  ;;  %3537 = vmatmul.f32.gmra.mxu1 %v5814_v60  ;;  %v7065_v60 = vand.u32 4294901760, %v5846_v41  ;;  %v3139_v44 = vadd.f32 %v3138_v34, %v2948_v9  ;;  %v7071_v9 = vand.u32 4294901760, %v5862_v38 }
 0x833   :  { %v2953_v19 = vadd.f32 %v2952_v12, %v5876_v7 }
 0x836   :  { %3239 = vmatmul.f32.gmra.mxu3 %v7064_v62  ;;  %v3332_v13 = vpop.f32.mrf.mxu0  ;;  %v7066_v62 = vld [vmem:[#allocation4_spill] sm:$0xff] }
 0x837   :  { %3036 = vmatmul.f32.gmra.mxu2 %v5846_v41  ;;  %v3478_v32 = vpop.f32.mrf.mxu1  ;;  %v2943_v27 = vadd.f32 %v2942_v48, %v7066_v62  ;;  %v7069_v41 = vld [vmem:[#allocation7_spill] sm:$0xff] }
 0x838   :  { %v7070_v48 = vld [vmem:[#allocation55_spill] sm:$0xff] }
 0x839   :  { %v3144_v6 = vpop.f32.mrf.mxu3  ;;  %3395 = vmatmul.f32.gmra.mxu0 %v5833_v35  ;;  %v3133_v7 = vadd.f32 %v3132_v11, %v2943_v27  ;;  %v2928_v34 = vadd.f32 %v6083_v24, %v7070_v48 }
 0x83a   :  { %v2957_v18 = vpop.f32.mrf.mxu2  ;;  %3541 = vmatmul.f32.gmra.mxu1 %v5833_v35  ;;  %v3145_v43 = vadd.f32 %v3144_v6, %v2953_v19  ;;  %v2933_v6 = vadd.f32 %v2932_v5, %v7069_v41  ;;  %v3127_v19 = vadd.f32 %v3126_v26, %v2938_v8 }
 0x83b   :  { %v2958_v17 = vadd.f32 %v2957_v18, %v5882_v22  ;;  %v3321_v18 = vadd.f32 %v3320_v40, %v3133_v7 }
 0x83c   :  { %v3329_v4 = vadd.f32 %v3328_v3, %v3145_v43  ;;  %v3121_v22 = vadd.f32 %v3120_v0, %v2933_v6 }
 0x83d   :  { %v3467_v0 = vadd.f32 %v6111_v25, %v3321_v18 }
 0x83e   :  { %3245 = vmatmul.f32.gmra.mxu3 %v7065_v60  ;;  %v3336_v2 = vpop.f32.mrf.mxu0  ;;  %v3325_v60 = vadd.f32 %v3324_v37, %v3139_v44  ;;  %v3475_v14 = vadd.f32 %v3474_v47, %v3329_v4  ;;  %v3313_v26 = vadd.f32 %v6090_v52, %v3121_v22  ;;  %v3556_v22 = vmax.f32 %v6086_v42, 0.0 }
 0x83f   :  { %3041 = vmatmul.f32.gmra.mxu2 %v5862_v38  ;;  %v3482_v31 = vpop.f32.mrf.mxu1 }
 0x840   :  { %v3471_v5 = vadd.f32 %v3470_v58, %v3325_v60  ;;  %v3562_v40 = vmax.f32 %v3475_v14, 0.0 }
 0x841   :  { %v3150_v35 = vpop.f32.mrf.mxu3  ;;  %3399 = vmatmul.f32.gmra.mxu0 %v7068_v53 }
 0x842   :  { %v2962_v54 = vpop.f32.mrf.mxu2  ;;  %v3151_v12 = vadd.f32 %v3150_v35, %v2958_v17  ;;  %3545 = vmatmul.f32.gmra.mxu1 %v7068_v53  ;;  %v3115_v17 = vadd.f32 %v6095_v1, %v2928_v34  ;;  %v3317_v53 = vadd.f32 %v6101_v15, %v3127_v19  ;;  %v3561_v15 = vmax.f32 %v3471_v5, 0.0 }
 0x843   :  { %v2963_v44 = vadd.f32 %v2962_v54, %v5889_v30  ;;  %v3459_v30 = vadd.f32 %v6093_v63, %v3313_v26  ;;  %v6156_v52 = vand.u32 4294901760, %v3562_v40  ;;  %v6218_v26 = vand.u32 4294901760, %v3556_v22 }
 0x844   :  { %v3333_v29 = vadd.f32 %v3332_v13, %v3151_v12  ;;  %v3309_v38 = vadd.f32 %v6077_v23, %v3115_v17  ;;  %v3463_v3 = vadd.f32 %v6104_v39, %v3317_v53  ;;  %v3560_v13 = vmax.f32 %v3467_v0, 0.0 }
 0x845   :  { %v6161_v23 = vand.u32 4294901760, %v3561_v15  ;;  %v3558_v7 = vmax.f32 %v3459_v30, 0.0  ;;  %v6171_v12 = vsub.f32 %v3562_v40, %v6156_v52  ;;  %v3555_v17 = vmax.f32 %v6073_v56, 0.0 }
 0x846   :  { %v3479_v51 = vadd.f32 %v3478_v32, %v3333_v29  ;;  %3251 = vmatmul.f32.gmra.mxu3 %v7071_v9  ;;  %v3340_v27 = vpop.f32.mrf.mxu0  ;;  %v3455_v43 = vadd.f32 %v6080_v55, %v3309_v38  ;;  %v3559_v62 = vmax.f32 %v3463_v3, 0.0  ;;  %v6166_v4 = vand.u32 4294901760, %v3560_v13 }
 0x847   :  { %v3486_v11 = vpop.f32.mrf.mxu1  ;;  %v6182_v48 = vsub.f32 %v3561_v15, %v6161_v23  ;;  %v6186_v18 = vand.u32 4294901760, %v3558_v7  ;;  %v3660_v9 = vand.u32 4294901760, %v6171_v12  ;;  %v3553_v3 = vmax.f32 %v6057_v10, 0.0 }
 0x848   :  { %v3563_v8 = vmax.f32 %v3479_v51, 0.0  ;;  %v3557_v55 = vmax.f32 %v3455_v43, 0.0  ;;  %v6173_v41 = vand.u32 4294901760, %v3559_v62  ;;  %v6194_v51 = vsub.f32 %v3560_v13, %v6166_v4 }
 0x849   :  { %v3156_v24 = vpop.f32.mrf.mxu3  ;;  %v6222_v0 = vsub.f32 %v3558_v7, %v6186_v18  ;;  %v3661_v38 = vsub.f32 %v6171_v12, %v3660_v9  ;;  %v3552_v43 = vmax.f32 %v6049_v59, 0.0 }
 0x84a   :  { %v2967_v29 = vpop.f32.mrf.mxu2  ;;  %v3157_v37 = vadd.f32 %v3156_v24, %v2963_v44  ;;  %v6153_v47 = vand.u32 4294901760, %v3563_v8  ;;  %v6200_v42 = vand.u32 4294901760, %v3557_v55  ;;  %v6214_v56 = vsub.f32 %v3559_v62, %v6173_v41 }
 0x84b   :  { %v2968_v1 = vadd.f32 %v2967_v29, %v5897_v21  ;;  %v3666_v44 = vand.u32 4294901760, %v6182_v48  ;;  %v3684_v7 = vand.u32 4294901760, %v6222_v0 }
 0x84c   :  { %v3337_v58 = vadd.f32 %v3336_v2, %v3157_v37  ;;  %v6164_v21 = vsub.f32 %v3563_v8, %v6153_v47  ;;  %v3554_v8 = vmax.f32 %v6065_v33, 0.0  ;;  %v3672_v33 = vand.u32 4294901760, %v6194_v51 }
 0x84d   :  { %v3678_v10 = vand.u32 4294901760, %v6214_v56 }
 0x84e   :  { %v3483_v32 = vadd.f32 %v3482_v31, %v3337_v58  ;;  %v3344_v25 = vpop.f32.mrf.mxu0  ;;  %v3654_v34 = vand.u32 4294901760, %v6164_v21  ;;  %v6236_v58 = vsub.f32 %v3557_v55, %v6200_v42  ;;  %v6244_v62 = vand.u32 4294901760, %v3554_v8 }
 0x84f   :  { %v6159_v35 = vpop.f32.mrf.mxu1  ;;  %v3673_v59 = vsub.f32 %v6194_v51, %v3672_v33 }
 0x850   :  { %v3564_v39 = vmax.f32 %v3483_v32, 0.0  ;;  %v3655_v5 = vsub.f32 %v6164_v21, %v3654_v34  ;;  %v3667_v32 = vsub.f32 %v6182_v48, %v3666_v44 }
 0x851   :  { %v3162_v2 = vpop.f32.mrf.mxu3 }
 0x852   :  { %v6168_v63 = vand.u32 4294901760, %v3564_v39  ;;  %v2972_v54 = vpop.f32.mrf.mxu2  ;;  %v3163_v31 = vadd.f32 %v3162_v2, %v2968_v1  ;;  %v6231_v1 = vand.u32 4294901760, %v3555_v17  ;;  %v3656_v13 = vand.u32 4294901760, %v3655_v5 }
 0x853   :  { %v2973_v6 = vadd.f32 %v2972_v54, %v5905_v36  ;;  %v3551_v54 = vmax.f32 %v6041_v16, 0.0  ;;  %v3668_v55 = vand.u32 4294901760, %v3667_v32  ;;  %v6910_v16 = vand.u32 4294901760, %v6236_v58 }
 0x854   :  { %v6177_v19 = vsub.f32 %v3564_v39, %v6168_v63  ;;  %v3341_v60 = vadd.f32 %v3340_v27, %v3163_v31  ;;  %3598 = vmatpush.msra.mxu2 %v6168_v63  ;;  %3811 = vmatpush.msrb.mxu1 %v6168_v63  ;;  %v3662_v39 = vand.u32 4294901760, %v3661_v38  ;;  %v6262_v31 = vand.u32 4294901760, %v3553_v3 }
 0x855   :  { %v3549_v38 = vmax.f32 %v6025_v57, 0.0  ;;  %v3691_v57 = vsub.f32 %v6236_v58, %v6910_v16 }
 0x856   :  { %v3648_v14 = vand.u32 4294901760, %v6177_v19  ;;  %v6189_v36 = vadd.f32 %v3486_v11, %v3341_v60  ;;  %3600 = vmatpush.msra.mxu2 %v6153_v47  ;;  %3753 = vmatpush.msrb.mxu0 %v6177_v19  ;;  %v6197_v27 = vpop.f32.mrf.mxu0  ;;  %v6273_v60 = vsub.f32 %v3555_v17, %v6231_v1  ;;  %v3674_v17 = vand.u32 4294901760, %v3673_v59 }
 0x857   :  { %3813 = vmatpush.msrb.mxu1 %v6153_v47  ;;  %v6203_v53 = vpop.f32.mrf.mxu1 }
 0x858   :  { %v3649_v11 = vsub.f32 %v6177_v19, %v3648_v14  ;;  %3602 = vmatpush.msra.mxu2 %v6156_v52  ;;  %3756 = vmatpush.msrb.mxu0 %v6164_v21 }
 0x859   :  { %3815 = vmatpush.msrb.mxu1 %v6156_v52  ;;  %v3168_v24 = vpop.f32.mrf.mxu3 }
 0x85a   :  { %v2977_v40 = vpop.f32.mrf.mxu2  ;;  %v3169_v29 = vadd.f32 %v3168_v24, %v2973_v6  ;;  %3604 = vmatpush.msra.mxu2 %v6161_v23  ;;  %3759 = vmatpush.msrb.mxu0 %v6171_v12  ;;  %v3650_v37 = vand.u32 4294901760, %v3649_v11  ;;  %v3679_v6 = vsub.f32 %v6214_v56, %v3678_v10  ;;  %v6277_v11 = vand.u32 4294901760, %v3552_v43 }
 0x85b   :  { %v2978_v15 = vadd.f32 %v2977_v40, %v5913_v20  ;;  %3817 = vmatpush.msrb.mxu1 %v6161_v23  ;;  %v6249_v20 = vsub.f32 %v3556_v22, %v6218_v26  ;;  %v3550_v22 = vmax.f32 %v6033_v61, 0.0  ;;  %v6282_v24 = vsub.f32 %v3554_v8, %v6244_v62 }
 0x85c   :  { %v3345_v30 = vadd.f32 %v3344_v25, %v3169_v29  ;;  %3606 = vmatpush.msra.mxu2 %v6166_v4  ;;  %3651 = vmatpush.msra.mxu3 %v3650_v37  ;;  %v3685_v61 = vsub.f32 %v6222_v0, %v3684_v7  ;;  %v6296_v8 = vsub.f32 %v3553_v3, %v6262_v31  ;;  %v3680_v32 = vand.u32 4294901760, %v3679_v6 }
 0x85d   :  { %3762 = vmatpush.msrb.mxu0 %v6182_v48  ;;  %3819 = vmatpush.msrb.mxu1 %v6166_v4  ;;  %v6908_v37 = vand.u32 4294901760, %v6249_v20  ;;  %v6309_v3 = vsub.f32 %v3552_v43, %v6277_v11  ;;  %v3708_v6 = vand.u32 4294901760, %v6282_v24 }
 0x85e   :  { %v6252_v25 = vadd.f32 %v6159_v35, %v3345_v30  ;;  %3608 = vmatpush.msra.mxu2 %v6173_v41  ;;  %3657 = vmatpush.msra.mxu3 %v3656_v13  ;;  %v6259_v2 = vpop.f32.mrf.mxu0  ;;  %v6290_v30 = vand.u32 4294901760, %v3551_v54  ;;  %v3686_v59 = vand.u32 4294901760, %v3685_v61  ;;  %v6912_v61 = vand.u32 4294901760, %v6296_v8 }
 0x85f   :  { %3765 = vmatpush.msrb.mxu0 %v6194_v51  ;;  %3821 = vmatpush.msrb.mxu1 %v6173_v41  ;;  %v6266_v35 = vpop.f32.mrf.mxu1 }
 0x860   :  { %3610 = vmatpush.msra.mxu2 %v6186_v18  ;;  %3663 = vmatpush.msra.mxu3 %v3662_v39  ;;  %v6909_v39 = vand.u32 4294901760, %v6273_v60 }
 0x861   :  { %3768 = vmatpush.msrb.mxu0 %v6214_v56  ;;  %3823 = vmatpush.msrb.mxu1 %v6186_v18  ;;  %v3174_v5 = vpop.f32.mrf.mxu3 }
 0x862   :  { %v2982_v40 = vpop.f32.mrf.mxu2  ;;  %v3175_v29 = vadd.f32 %v3174_v5, %v2978_v15  ;;  %3612 = vmatpush.msra.mxu2 %v6200_v42  ;;  %3669 = vmatpush.msra.mxu3 %v3668_v55  ;;  %v3697_v55 = vsub.f32 %v6249_v20, %v6908_v37 }
 0x863   :  { %v2983_v13 = vadd.f32 %v2982_v40, %v5921_v28  ;;  %3771 = vmatpush.msrb.mxu0 %v6222_v0  ;;  %3825 = vmatpush.msrb.mxu1 %v6200_v42  ;;  %v6304_v28 = vand.u32 4294901760, %v3550_v22  ;;  %v6319_v40 = vand.u32 4294901760, %v3549_v38  ;;  %v7074_v0 = vand.u32 4294901760, %v6273_v60 }
 0x864   :  { %v3349_v15 = vadd.f32 %v6197_v27, %v3175_v29  ;;  %3614 = vmatpush.msra.mxu2 %v6218_v26  ;;  %3675 = vmatpush.msra.mxu3 %v3674_v17  ;;  %v3703_v29 = vsub.f32 %v6273_v60, %v6909_v39  ;;  %v6330_v17 = vsub.f32 %v3551_v54, %v6290_v30  ;;  %v6911_v39 = vand.u32 4294901760, %v6309_v3 }
 0x865   :  { %3774 = vmatpush.msrb.mxu0 %v6236_v58  ;;  %3827 = vmatpush.msrb.mxu1 %v6218_v26  ;;  %v3709_v54 = vsub.f32 %v6282_v24, %v3708_v6 }
 0x866   :  { %v6312_v27 = vadd.f32 %v6203_v53, %v3349_v15  ;;  %3616 = vmatpush.msra.mxu2 %v6231_v1  ;;  %3681 = vmatpush.msra.mxu3 %v3680_v32  ;;  %v3356_v5 = vpop.f32.mrf.mxu0  ;;  %v3692_v53 = vand.u32 4294901760, %v3691_v57  ;;  %v6336_v32 = vsub.f32 %v3550_v22, %v6304_v28  ;;  %v3698_v57 = vand.u32 4294901760, %v3697_v55 }
 0x867   :  { %3777 = vmatpush.msrb.mxu0 %v6249_v20  ;;  %3829 = vmatpush.msrb.mxu1 %v6231_v1  ;;  %v6323_v43 = vpop.f32.mrf.mxu1  ;;  %v6347_v22 = vsub.f32 %v3549_v38, %v6319_v40  ;;  %v3704_v55 = vand.u32 4294901760, %v3703_v29 }
 0x868   :  { %3618 = vmatpush.msra.mxu2 %v6244_v62  ;;  %3687 = vmatpush.msra.mxu3 %v3686_v59  ;;  %v3732_v38 = vand.u32 4294901760, %v6336_v32 }
 0x869   :  { %3780 = vmatpush.msrb.mxu0 %v6273_v60  ;;  %3831 = vmatpush.msrb.mxu1 %v6244_v62  ;;  %v3180_v15 = vpop.f32.mrf.mxu3  ;;  %v7077_v60 = vand.u32 4294901760, %v6309_v3 }
 0x86a   :  { %v2987_v37 = vpop.f32.mrf.mxu2  ;;  %v3181_v59 = vadd.f32 %v3180_v15, %v2983_v13  ;;  %3620 = vmatpush.msra.mxu2 %v6262_v31  ;;  %3693 = vmatpush.msra.mxu3 %v3692_v53  ;;  %v3715_v53 = vsub.f32 %v6296_v8, %v6912_v61  ;;  %v6913_v15 = vand.u32 4294901760, %v6330_v17 }
 0x86b   :  { %v2988_v16 = vadd.f32 %v2987_v37, %v5929_v49  ;;  %3783 = vmatpush.msrb.mxu0 %v6282_v24  ;;  %3833 = vmatpush.msrb.mxu1 %v6262_v31  ;;  %v3721_v37 = vsub.f32 %v6309_v3, %v6911_v39  ;;  %v7078_v24 = vand.u32 4294901760, %v6330_v17 }
 0x86c   :  { %v3353_v13 = vadd.f32 %v6259_v2, %v3181_v59  ;;  %3622 = vmatpush.msra.mxu2 %v6277_v11  ;;  %3699 = vmatpush.msra.mxu3 %v3698_v57  ;;  %v3710_v2 = vand.u32 4294901760, %v3709_v54  ;;  %v3727_v57 = vsub.f32 %v6330_v17, %v6913_v15  ;;  %v3738_v54 = vand.u32 4294901760, %v6347_v22 }
 0x86d   :  { %3786 = vmatpush.msrb.mxu0 %v6296_v8  ;;  %3835 = vmatpush.msrb.mxu1 %v6277_v11  ;;  %v3722_v61 = vand.u32 4294901760, %v3721_v37 }
 0x86e   :  { %v6358_v49 = vadd.f32 %v6266_v35, %v3353_v13  ;;  %3624 = vmatpush.msra.mxu2 %v6290_v30  ;;  %3705 = vmatpush.msra.mxu3 %v3704_v55  ;;  %v3360_v29 = vpop.f32.mrf.mxu0  ;;  %v3716_v35 = vand.u32 4294901760, %v3715_v53  ;;  %v3733_v53 = vsub.f32 %v6336_v32, %v3732_v38  ;;  %v3739_v37 = vsub.f32 %v6347_v22, %v3738_v54 }
 0x86f   :  { %3789 = vmatpush.msrb.mxu0 %v6309_v3  ;;  %3837 = vmatpush.msrb.mxu1 %v6290_v30  ;;  %v3506_v59 = vpop.f32.mrf.mxu1 }
 0x870   :  { %3626 = vmatpush.msra.mxu2 %v6304_v28  ;;  %3711 = vmatpush.msra.mxu3 %v3710_v2  ;;  %v3740_v19 = vand.u32 4294901760, %v3739_v37 }
 0x871   :  { %3792 = vmatpush.msrb.mxu0 %v6330_v17  ;;  %3839 = vmatpush.msrb.mxu1 %v6304_v28  ;;  %v3186_v13 = vpop.f32.mrf.mxu3 }
 0x872   :  { %v2992_v55 = vpop.f32.mrf.mxu2  ;;  %v3187_v39 = vadd.f32 %v3186_v13, %v2988_v16  ;;  %3628 = vmatpush.msra.mxu2 %v6319_v40  ;;  %3717 = vmatpush.msra.mxu3 %v3716_v35  ;;  %v3728_v16 = vand.u32 4294901760, %v3727_v57 }
 0x873   :  { %v2993_v2 = vadd.f32 %v2992_v55, %v5937_v50  ;;  %3795 = vmatpush.msrb.mxu0 %v6336_v32  ;;  %3841 = vmatpush.msrb.mxu1 %v6319_v40  ;;  %v3734_v50 = vand.u32 4294901760, %v3733_v53 }
 0x874   :  { %v3357_v15 = vadd.f32 %v3356_v5, %v3187_v39  ;;  %3858 = vmatpush.msrb.mxu2 %v3648_v14  ;;  %3723 = vmatpush.msra.mxu3 %v3722_v61 }
 0x875   :  { %3798 = vmatpush.msrb.mxu0 %v6347_v22 }
 0x876   :  { %v6388_v35 = vadd.f32 %v6323_v43, %v3357_v15  ;;  %3862 = vmatpush.msrb.mxu2 %v3654_v34  ;;  %3729 = vmatpush.msra.mxu3 %v3728_v16  ;;  %v3364_v39 = vpop.f32.mrf.mxu0 }
 0x877   :  { %v3510_v5 = vpop.f32.mrf.mxu1 }
 0x878   :  { %3866 = vmatpush.msrb.mxu2 %v3660_v9  ;;  %3735 = vmatpush.msra.mxu3 %v3734_v50  ;;  %v7072_v9 = vand.u32 4294901760, %v6236_v58 }
 0x879   :  { %v3192_v14 = vpop.f32.mrf.mxu3 }
 0x87a   :  { %v2997_v61 = vpop.f32.mrf.mxu2  ;;  %v3193_v57 = vadd.f32 %v3192_v14, %v2993_v2  ;;  %3870 = vmatpush.msrb.mxu2 %v3666_v44  ;;  %3741 = vmatpush.msra.mxu3 %v3740_v19  ;;  %v7073_v44 = vand.u32 4294901760, %v6249_v20 }
 0x87b   :  { %v2998_v43 = vadd.f32 %v2997_v61, %v5945_v46  ;;  %v7079_v61 = vld [vmem:[#allocation11_spill] sm:$0xff] }
 0x87c   :  { %3929 = vmatpush.msrb.mxu3 %v6168_v63  ;;  %v3361_v21 = vadd.f32 %v3360_v29, %v3193_v57  ;;  %3874 = vmatpush.msrb.mxu2 %v3672_v33 }
 0x87e   :  { %3931 = vmatpush.msrb.mxu3 %v6153_v47  ;;  %v6401_v12 = vadd.f32 %v3506_v59, %v3361_v21  ;;  %3878 = vmatpush.msrb.mxu2 %v3678_v10  ;;  %v3368_v34 = vpop.f32.mrf.mxu0  ;;  %v7075_v10 = vand.u32 4294901760, %v6296_v8  ;;  %v7080_v21 = vld [vmem:[#allocation12_spill] sm:$0xff] }
 0x87f   :  { %v3514_v48 = vpop.f32.mrf.mxu1 }
 0x880   :  { %3933 = vmatpush.msrb.mxu3 %v6156_v52  ;;  %3882 = vmatpush.msrb.mxu2 %v3684_v7 }
 0x881   :  { %v3198_v46 = vpop.f32.mrf.mxu3 }
 0x882   :  { %3935 = vmatpush.msrb.mxu3 %v6161_v23  ;;  %v3002_v63 = vpop.f32.mrf.mxu2  ;;  %v3199_v51 = vadd.f32 %v3198_v46, %v2998_v43  ;;  %3886 = vmatpush.msrb.mxu2 %v7072_v9  ;;  %v3585_v43 = vld [vmem:[%s6770_s3 + $0x10] sm:$0xff] }
 0x883   :  { %v3003_v47 = vadd.f32 %v3002_v63, %v5953_v45  ;;  %v6465_v46 = vand.u32 4294901760, %v3585_v43 }
 0x884   :  { %3937 = vmatpush.msrb.mxu3 %v6166_v4  ;;  %v3365_v56 = vadd.f32 %v3364_v39, %v3199_v51  ;;  %3890 = vmatpush.msrb.mxu2 %v7073_v44  ;;  %v7081_v51 = vld [vmem:[#allocation9_spill] sm:$0xff] }
 0x886   :  { %3939 = vmatpush.msrb.mxu3 %v6173_v41  ;;  %v6416_v52 = vadd.f32 %v3510_v5, %v3365_v56  ;;  %3894 = vmatpush.msrb.mxu2 %v7074_v0  ;;  %v3372_v23 = vpop.f32.mrf.mxu0  ;;  %v7076_v41 = vld [vmem:[#allocation5_spill] sm:$0xff]  ;;  %v7082_v56 = vld [vmem:[#allocation14_spill] sm:$0xff]  ;;  %v3638_v0 = vsub.f32 %v3585_v43, %v6465_v46 }
 0x887   :  { %v3518_v33 = vpop.f32.mrf.mxu1 }
 0x888   :  { %3941 = vmatpush.msrb.mxu3 %v6186_v18  ;;  %3898 = vmatpush.msrb.mxu2 %v3708_v6 }
 0x889   :  { %v3204_v45 = vpop.f32.mrf.mxu3 }
 0x88a   :  { %3943 = vmatpush.msrb.mxu3 %v6200_v42  ;;  %v3007_v4 = vpop.f32.mrf.mxu2  ;;  %v3205_v58 = vadd.f32 %v3204_v45, %v3003_v47  ;;  %3902 = vmatpush.msrb.mxu2 %v7075_v10 }
 0x88b   :  { %v3008_v20 = vadd.f32 %v3007_v4, %v7076_v41 }
 0x88c   :  { %3945 = vmatpush.msrb.mxu3 %v6218_v26  ;;  %v3369_v7 = vadd.f32 %v3368_v34, %v3205_v58  ;;  %3906 = vmatpush.msrb.mxu2 %v7077_v60 }
 0x88e   :  { %3947 = vmatpush.msrb.mxu3 %v6231_v1  ;;  %v6431_v18 = vadd.f32 %v3514_v48, %v3369_v7  ;;  %3910 = vmatpush.msrb.mxu2 %v7078_v24  ;;  %v6435_v42 = vpop.f32.mrf.mxu0  ;;  %v7084_v7 = vld [vmem:[#allocation6_spill] sm:$0xff] }
 0x88f   :  { %v6438_v8 = vpop.f32.mrf.mxu1 }
 0x890   :  { %3949 = vmatpush.msrb.mxu3 %v6244_v62  ;;  %3914 = vmatpush.msrb.mxu2 %v3732_v38 }
 0x891   :  { %v3210_v26 = vpop.f32.mrf.mxu3 }
 0x892   :  { %3951 = vmatpush.msrb.mxu3 %v6262_v31  ;;  %v3012_v3 = vpop.f32.mrf.mxu2  ;;  %v3211_v6 = vadd.f32 %v3210_v26, %v3008_v20  ;;  %3918 = vmatpush.msrb.mxu2 %v3738_v54  ;;  %v3639_v20 = vand.u32 4294901760, %v3638_v0 }
 0x893   :  { %v3013_v60 = vadd.f32 %v3012_v3, %v7084_v7 }
 0x894   :  { %3953 = vmatpush.msrb.mxu3 %v6277_v11  ;;  %v3373_v1 = vadd.f32 %v3372_v23, %v3211_v6  ;;  %v7083_v23 = vld [vmem:[#allocation10_spill] sm:$0xff] }
 0x896   :  { %3955 = vmatpush.msrb.mxu3 %v6290_v30  ;;  %v6447_v17 = vadd.f32 %v3518_v33, %v3373_v1  ;;  %v3380_v62 = vpop.f32.mrf.mxu0  ;;  %v3583_v30 = vld [vmem:[%s6770_s3] sm:$0xff]  ;;  %v3640_v1 = vsub.f32 %v3638_v0, %v3639_v20 }
 0x897   :  { %v6451_v15 = vpop.f32.mrf.mxu1 }
 0x898   :  { %3957 = vmatpush.msrb.mxu3 %v6304_v28  ;;  %v6456_v28 = vand.u32 4294901760, %v3583_v30 }
 0x899   :  { %v3216_v32 = vpop.f32.mrf.mxu3 }
 0x89a   :  { %3959 = vmatpush.msrb.mxu3 %v6319_v40  ;;  %v3017_v31 = vpop.f32.mrf.mxu2  ;;  %v3630_v53 = vsub.f32 %v3583_v30, %v6456_v28 }
 0x89b   :  { %3743 = vmatmul.f32.vlgmr.msra.gmra.mxu3 %v6456_v28  ;;  %v3018_v33 = vadd.f32 %v3017_v31, %v7083_v23  ;;  %v3641_v31 = vand.u32 4294901760, %v3640_v1 }
 0x89c   :  { %v3631_v16 = vand.u32 4294901760, %v3630_v53  ;;  %3801 = vmatmul.f32.vlgmr.msrb.gmra.mxu0 %v3630_v53 }
 0x89e   :  { %v3384_v29 = vpop.f32.mrf.mxu0  ;;  %v3632_v37 = vsub.f32 %v3630_v53, %v3631_v16  ;;  %3845 = vmatmul.f32.vlgmr.msrb.gmra.mxu1 %v3631_v16 }
 0x89f   :  { %v3530_v59 = vpop.f32.mrf.mxu1 }
 0x8a0   :  { %v3633_v39 = vand.u32 4294901760, %v3632_v37 }
 0x8a1   :  { %v3222_v38 = vpop.f32.mrf.mxu3 }
 0x8a2   :  { %v3022_v22 = vpop.f32.mrf.mxu2  ;;  %3634 = vmatmul.f32.vlgmr.msra.gmra.mxu2 %v3633_v39  ;;  %v3223_v24 = vadd.f32 %v3222_v38, %v3018_v33 }
 0x8a3   :  { %v3023_v9 = vadd.f32 %v3022_v22, %v7081_v51  ;;  %3747 = vmatmul.f32.gmra.mxu3 %v6465_v46  ;;  %v3217_v22 = vadd.f32 %v3216_v32, %v3013_v60 }
 0x8a4   :  { %3806 = vmatmul.f32.gmra.mxu0 %v3638_v0  ;;  %v3572_v0 = vmax.f32 %v6431_v18, 0.0 }
 0x8a6   :  { %v3388_v13 = vpop.f32.mrf.mxu0  ;;  %3851 = vmatmul.f32.gmra.mxu1 %v3639_v20  ;;  %v3570_v20 = vmax.f32 %v6401_v12, 0.0  ;;  %v6535_v7 = vand.u32 4294901760, %v3572_v0 }
 0x8a7   :  { %v3534_v55 = vpop.f32.mrf.mxu1 }
 0x8a9   :  { %v3228_v54 = vpop.f32.mrf.mxu3 }
 0x8aa   :  { %v3027_v11 = vpop.f32.mrf.mxu2  ;;  %v3229_v58 = vadd.f32 %v3228_v54, %v3023_v9  ;;  %v7085_v54 = vld [vmem:[#allocation13_spill] sm:$0xff]  ;;  %3642 = vmatmul.f32.gmra.mxu2 %v3641_v31  ;;  %v3573_v9 = vmax.f32 %v6447_v17, 0.0 }
 0x8ab   :  { %v3028_v34 = vadd.f32 %v3027_v11, %v7080_v21  ;;  %3961 = vmatmul.f32.vlgmr.msrb.gmra.mxu3 %v6456_v28 }
 0x8ac   :  { %v3385_v30 = vadd.f32 %v3384_v29, %v3229_v58  ;;  %v6519_v58 = vand.u32 4294901760, %v3573_v9 }
 0x8ae   :  { %v3392_v50 = vpop.f32.mrf.mxu0  ;;  %v3531_v39 = vadd.f32 %v3530_v59, %v3385_v30 }
 0x8af   :  { %v3538_v5 = vpop.f32.mrf.mxu1 }
 0x8b1   :  { %v3234_v40 = vpop.f32.mrf.mxu3 }
 0x8b2   :  { %v3032_v2 = vpop.f32.mrf.mxu2  ;;  %v3235_v47 = vadd.f32 %v3234_v40, %v3028_v34  ;;  %3920 = vmatmul.f32.vlgmr.msrb.gmra.mxu2 %v6456_v28 }
 0x8b3   :  { %v3033_v57 = vadd.f32 %v3032_v2, %v7079_v61  ;;  %v3381_v2 = vadd.f32 %v3380_v62, %v3223_v24  ;;  %3965 = vmatmul.f32.gmra.mxu3 %v6465_v46 }
 0x8b4   :  { %v3389_v26 = vadd.f32 %v3388_v13, %v3235_v47  ;;  %v3377_v13 = vadd.f32 %v6435_v42, %v3217_v22 }
 0x8b5   :  { %v3527_v29 = vadd.f32 %v6451_v15, %v3381_v2 }
 0x8b6   :  { %v3396_v63 = vpop.f32.mrf.mxu0  ;;  %v3535_v16 = vadd.f32 %v3534_v55, %v3389_v26  ;;  %v3523_v55 = vadd.f32 %v6438_v8, %v3377_v13 }
 0x8b7   :  { %v3542_v4 = vpop.f32.mrf.mxu1  ;;  %v3575_v34 = vmax.f32 %v3527_v29, 0.0 }
 0x8b8   :  { %v3574_v15 = vmax.f32 %v3523_v55, 0.0 }
 0x8b9   :  { %v3240_v19 = vpop.f32.mrf.mxu3  ;;  %v6497_v47 = vand.u32 4294901760, %v3575_v34 }
 0x8ba   :  { %v3037_v14 = vpop.f32.mrf.mxu2  ;;  %v3241_v48 = vadd.f32 %v3240_v19, %v3033_v57  ;;  %v3576_v57 = vmax.f32 %v3531_v39, 0.0  ;;  %v6509_v23 = vand.u32 4294901760, %v3574_v15  ;;  %3924 = vmatmul.f32.gmra.mxu2 %v6465_v46  ;;  %v6553_v46 = vsub.f32 %v3573_v9, %v6519_v58 }
 0x8bb   :  { %v3038_v44 = vadd.f32 %v3037_v14, %v7082_v56  ;;  %v6523_v18 = vsub.f32 %v3575_v34, %v6497_v47 }
 0x8bc   :  { %v3393_v10 = vadd.f32 %v3392_v50, %v3241_v48  ;;  %v6540_v60 = vsub.f32 %v3574_v15, %v6509_v23  ;;  %v4062_v13 = vand.u32 4294901760, %v6553_v46 }
 0x8bd   :  { %v4050_v30 = vand.u32 4294901760, %v6523_v18 }
 0x8be   :  { %v3539_v53 = vadd.f32 %v3538_v5, %v3393_v10  ;;  %v3400_v38 = vpop.f32.mrf.mxu0  ;;  %v3577_v5 = vmax.f32 %v3535_v16, 0.0  ;;  %v4056_v16 = vand.u32 4294901760, %v6540_v60 }
 0x8bf   :  { %v3546_v14 = vpop.f32.mrf.mxu1 }
 0x8c0   :  { %v3578_v19 = vmax.f32 %v3539_v53, 0.0  ;;  %v6482_v48 = vand.u32 4294901760, %v3577_v5  ;;  %v3568_v53 = vmax.f32 %v6358_v49, 0.0  ;;  %v3584_v49 = vld [vmem:[%s6770_s3 + $0x8] sm:$0xff]  ;;  %v4057_v29 = vsub.f32 %v6540_v60, %v4056_v16 }
 0x8c1   :  { %v3246_v45 = vpop.f32.mrf.mxu3 }
 0x8c2   :  { %v3247_v41 = vadd.f32 %v3246_v45, %v3038_v44  ;;  %v3042_v11 = vpop.f32.mrf.mxu2  ;;  %v6480_v43 = vand.u32 4294901760, %v3578_v19  ;;  %v6500_v56 = vsub.f32 %v3577_v5, %v6482_v48  ;;  %v6590_v39 = vand.u32 4294901760, %v3568_v53 }
 0x8c3   :  { %v3043_v37 = vadd.f32 %v3042_v11, %v7085_v54  ;;  %v3567_v54 = vmax.f32 %v6312_v27, 0.0  ;;  %v3566_v27 = vmax.f32 %v6252_v25, 0.0  ;;  %v3565_v5 = vmax.f32 %v6189_v36, 0.0 }
 0x8c4   :  { %v3397_v6 = vadd.f32 %v3396_v63, %v3247_v41  ;;  %v6489_v63 = vand.u32 4294901760, %v3576_v57  ;;  %v6492_v8 = vsub.f32 %v3578_v19, %v6480_v43  ;;  %v6594_v19 = vand.u32 4294901760, %v3584_v49 }
 0x8c5   :  { %v6617_v36 = vand.u32 4294901760, %v3566_v27  ;;  %v6625_v15 = vsub.f32 %v3568_v53, %v6590_v39  ;;  %v4058_v9 = vand.u32 4294901760, %v4057_v29 }
 0x8c6   :  { %v3543_v40 = vadd.f32 %v3542_v4, %v3397_v6  ;;  %v6512_v17 = vsub.f32 %v3576_v57, %v6489_v63  ;;  %v4032_v45 = vand.u32 4294901760, %v6492_v8  ;;  %v3571_v4 = vmax.f32 %v6416_v52, 0.0 }
 0x8c7   :  { %v4038_v52 = vand.u32 4294901760, %v6500_v56  ;;  %v3569_v6 = vmax.f32 %v6388_v35, 0.0  ;;  %v6561_v35 = vand.u32 4294901760, %v3570_v20  ;;  %v6653_v53 = vsub.f32 %v3566_v27, %v6617_v36 }
 0x8c8   :  { %v3579_v50 = vmax.f32 %v3543_v40, 0.0  ;;  %v4033_v26 = vsub.f32 %v6492_v8, %v4032_v45  ;;  %v4044_v12 = vand.u32 4294901760, %v6512_v17  ;;  %v6549_v1 = vand.u32 4294901760, %v3571_v4 }
 0x8c9   :  { %v3252_v3 = vpop.f32.mrf.mxu3  ;;  %v4039_v11 = vsub.f32 %v6500_v56, %v4038_v52  ;;  %v6566_v40 = vsub.f32 %v3572_v0, %v6535_v7 }
 0x8ca   :  { %v3253_v32 = vadd.f32 %v3252_v3, %v3043_v37  ;;  %v6477_v61 = vand.u32 4294901760, %v3579_v50  ;;  %v4034_v31 = vand.u32 4294901760, %v4033_v26  ;;  %v4045_v2 = vsub.f32 %v6512_v17, %v4044_v12 }
 0x8cb   :  { %v6577_v37 = vand.u32 4294901760, %v3569_v6  ;;  %v4040_v3 = vand.u32 4294901760, %v4039_v11  ;;  %v4068_v25 = vand.u32 4294901760, %v6566_v40 }
 0x8cc   :  { %v3401_v62 = vadd.f32 %v3400_v38, %v3253_v32  ;;  %v6485_v42 = vsub.f32 %v3579_v50, %v6477_v61  ;;  %v6582_v50 = vsub.f32 %v3571_v4, %v6549_v1  ;;  %v4051_v38 = vsub.f32 %v6523_v18, %v4050_v30 }
 0x8cd   :  { %v6597_v32 = vsub.f32 %v3570_v20, %v6561_v35  ;;  %v6610_v55 = vsub.f32 %v3569_v6, %v6577_v37  ;;  %v4069_v0 = vsub.f32 %v6566_v40, %v4068_v25 }
 0x8ce   :  { %v3547_v21 = vadd.f32 %v3546_v14, %v3401_v62  ;;  %v4026_v28 = vand.u32 4294901760, %v6485_v42  ;;  %v4046_v14 = vand.u32 4294901760, %v4045_v2  ;;  %v6605_v62 = vand.u32 4294901760, %v3567_v54 }
 0x8cf   :  { %v4052_v57 = vand.u32 4294901760, %v4051_v38  ;;  %v4074_v34 = vand.u32 4294901760, %v6582_v50  ;;  %v4080_v4 = vand.u32 4294901760, %v6597_v32  ;;  %v4086_v6 = vand.u32 4294901760, %v6610_v55 }
 0x8d0   :  { %v3580_v59 = vmax.f32 %v3547_v21, 0.0  ;;  %v4027_v41 = vsub.f32 %v6485_v42, %v4026_v28  ;;  %v4063_v21 = vsub.f32 %v6553_v46, %v4062_v13  ;;  %v6640_v20 = vsub.f32 %v3567_v54, %v6605_v62 }
 0x8d1   :  { %v4075_v26 = vsub.f32 %v6582_v50, %v4074_v34  ;;  %v4081_v2 = vsub.f32 %v6597_v32, %v4080_v4  ;;  %v4087_v38 = vsub.f32 %v6610_v55, %v4086_v6 }
 0x8d2   :  { %v6494_v51 = vand.u32 4294901760, %v3580_v59  ;;  %v4028_v22 = vand.u32 4294901760, %v4027_v41  ;;  %v6635_v41 = vand.u32 4294901760, %v3565_v5  ;;  %v4098_v27 = vand.u32 4294901760, %v6640_v20 }
 0x8d4   :  { %v6503_v44 = vsub.f32 %v3580_v59, %v6494_v51  ;;  %3970 = vmatpush.msra.mxu0 %v6494_v51  ;;  %4183 = vmatpush.msra.mxu3 %v6494_v51  ;;  %v6622_v59 = vsub.f32 %v3584_v49, %v6594_v19  ;;  %v4092_v49 = vand.u32 4294901760, %v6625_v15  ;;  %v6663_v54 = vsub.f32 %v3565_v5, %v6635_v41 }
 0x8d5   :  { %v4082_v5 = vand.u32 4294901760, %v4081_v2 }
 0x8d6   :  { %v4020_v33 = vand.u32 4294901760, %v6503_v44  ;;  %3972 = vmatpush.msra.mxu0 %v6477_v61  ;;  %4125 = vmatpush.msra.mxu2 %v6503_v44 }
 0x8d7   :  { %4185 = vmatpush.msra.mxu3 %v6477_v61 }
 0x8d8   :  { %v4021_v10 = vsub.f32 %v6503_v44, %v4020_v33  ;;  %3974 = vmatpush.msra.mxu0 %v6480_v43  ;;  %4128 = vmatpush.msra.mxu2 %v6485_v42  ;;  %v3581_v44 = vld [vmem:[%s6767_s0] sm:$0xff]  ;;  %v3582_v42 = vld [vmem:[%s6767_s0 + $0x8] sm:$0xff] }
 0x8d9   :  { %4187 = vmatpush.msra.mxu3 %v6480_v43 }
 0x8da   :  { %3976 = vmatpush.msra.mxu0 %v6482_v48  ;;  %4131 = vmatpush.msra.mxu2 %v6492_v8  ;;  %v4022_v24 = vand.u32 4294901760, %v4021_v10  ;;  %v3586_v10 = vld [vmem:[%s6770_s3 + $0x18] sm:$0xff] }
 0x8db   :  { %4189 = vmatpush.msra.mxu3 %v6482_v48  ;;  %v6650_v11 = vand.u32 4294901760, %v3586_v10 }
 0x8dc   :  { %3978 = vmatpush.msra.mxu0 %v6489_v63  ;;  %4023 = vmatpush.msra.mxu1 %v4022_v24  ;;  %v4064_v24 = vand.u32 4294901760, %v4063_v21  ;;  %v4104_v21 = vand.u32 4294901760, %v6653_v53 }
 0x8dd   :  { %4134 = vmatpush.msra.mxu2 %v6500_v56  ;;  %4191 = vmatpush.msra.mxu3 %v6489_v63  ;;  %v4010_v29 = vsub.f32 %v3586_v10, %v6650_v11  ;;  %v4110_v10 = vand.u32 4294901760, %v6663_v54 }
 0x8de   :  { %3980 = vmatpush.msra.mxu0 %v6497_v47  ;;  %4029 = vmatpush.msra.mxu1 %v4028_v22  ;;  %v4003_v22 = vand.u32 4294901760, %v6622_v59  ;;  %v4105_v2 = vsub.f32 %v6653_v53, %v4104_v21 }
 0x8df   :  { %4137 = vmatpush.msra.mxu2 %v6512_v17  ;;  %4193 = vmatpush.msra.mxu3 %v6497_v47 }
 0x8e0   :  { %3982 = vmatpush.msra.mxu0 %v6509_v23  ;;  %4035 = vmatpush.msra.mxu1 %v4034_v31  ;;  %v4070_v31 = vand.u32 4294901760, %v4069_v0  ;;  %v4099_v0 = vsub.f32 %v6640_v20, %v4098_v27 }
 0x8e1   :  { %4140 = vmatpush.msra.mxu2 %v6523_v18  ;;  %4195 = vmatpush.msra.mxu3 %v6509_v23 }
 0x8e2   :  { %3984 = vmatpush.msra.mxu0 %v6519_v58  ;;  %4041 = vmatpush.msra.mxu1 %v4040_v3  ;;  %v4076_v3 = vand.u32 4294901760, %v4075_v26  ;;  %v4011_v26 = vand.u32 4294901760, %v4010_v29 }
 0x8e3   :  { %4143 = vmatpush.msra.mxu2 %v6540_v60  ;;  %4197 = vmatpush.msra.mxu3 %v6519_v58 }
 0x8e4   :  { %3986 = vmatpush.msra.mxu0 %v6535_v7  ;;  %4047 = vmatpush.msra.mxu1 %v4046_v14  ;;  %v4004_v14 = vsub.f32 %v6622_v59, %v4003_v22 }
 0x8e5   :  { %4146 = vmatpush.msra.mxu2 %v6553_v46  ;;  %4199 = vmatpush.msra.mxu3 %v6535_v7 }
 0x8e6   :  { %3988 = vmatpush.msra.mxu0 %v6549_v1  ;;  %4053 = vmatpush.msra.mxu1 %v4052_v57  ;;  %v4093_v57 = vsub.f32 %v6625_v15, %v4092_v49 }
 0x8e7   :  { %4149 = vmatpush.msra.mxu2 %v6566_v40  ;;  %4201 = vmatpush.msra.mxu3 %v6549_v1 }
 0x8e8   :  { %3990 = vmatpush.msra.mxu0 %v6561_v35  ;;  %4059 = vmatpush.msra.mxu1 %v4058_v9  ;;  %v4088_v9 = vand.u32 4294901760, %v4087_v38  ;;  %v4111_v38 = vsub.f32 %v6663_v54, %v4110_v10 }
 0x8e9   :  { %4152 = vmatpush.msra.mxu2 %v6582_v50  ;;  %4203 = vmatpush.msra.mxu3 %v6561_v35 }
 0x8ea   :  { %3992 = vmatpush.msra.mxu0 %v6577_v37  ;;  %4065 = vmatpush.msra.mxu1 %v4064_v24  ;;  %v4005_v24 = vand.u32 4294901760, %v4004_v14  ;;  %v4012_v14 = vsub.f32 %v4010_v29, %v4011_v26 }
 0x8eb   :  { %4155 = vmatpush.msra.mxu2 %v6597_v32  ;;  %4205 = vmatpush.msra.mxu3 %v6577_v37 }
 0x8ec   :  { %3994 = vmatpush.msra.mxu0 %v6590_v39  ;;  %4071 = vmatpush.msra.mxu1 %v4070_v31  ;;  %v4094_v31 = vand.u32 4294901760, %v4093_v57  ;;  %v4112_v57 = vand.u32 4294901760, %v4111_v38 }
 0x8ed   :  { %4158 = vmatpush.msra.mxu2 %v6610_v55  ;;  %4207 = vmatpush.msra.mxu3 %v6590_v39 }
 0x8ee   :  { %3996 = vmatpush.msra.mxu0 %v6605_v62  ;;  %4077 = vmatpush.msra.mxu1 %v4076_v3  ;;  %v4100_v3 = vand.u32 4294901760, %v4099_v0 }
 0x8ef   :  { %4161 = vmatpush.msra.mxu2 %v6625_v15  ;;  %4209 = vmatpush.msra.mxu3 %v6605_v62 }
 0x8f0   :  { %3998 = vmatpush.msra.mxu0 %v6617_v36  ;;  %4083 = vmatpush.msra.mxu1 %v4082_v5  ;;  %v4106_v5 = vand.u32 4294901760, %v4105_v2 }
 0x8f1   :  { %4164 = vmatpush.msra.mxu2 %v6640_v20  ;;  %4211 = vmatpush.msra.mxu3 %v6617_v36 }
 0x8f2   :  { %4000 = vmatpush.msra.mxu0 %v6635_v41  ;;  %4089 = vmatpush.msra.mxu1 %v4088_v9  ;;  %v4013_v9 = vand.u32 4294901760, %v4012_v14 }
 0x8f3   :  { %4167 = vmatpush.msra.mxu2 %v6653_v53  ;;  %4213 = vmatpush.msra.mxu3 %v6635_v41 }
 0x8f4   :  { %4230 = vmatpush.msrb.mxu0 %v4020_v33  ;;  %4095 = vmatpush.msra.mxu1 %v4094_v31  ;;  %v4403_v33 = vmov 3  }
 0x8f5   :  { %4170 = vmatpush.msra.mxu2 %v6663_v54  ;;  %4006 = vmatmul.f32.vlgmr.msra.gmra.mxu0 %v4005_v24 }
 0x8f6   :  { %4234 = vmatpush.msrb.mxu0 %v4026_v28  ;;  %4101 = vmatpush.msra.mxu1 %v4100_v3 }
 0x8f7   :  { %4377 = vset.pattern.permute.xlu1 %v4403_v33  ;;  %4173 = vmatmul.f32.vlgmr.msra.gmra.mxu2 %v6622_v59 }
 0x8f8   :  { %4238 = vmatpush.msrb.mxu0 %v4032_v45  ;;  %4107 = vmatpush.msra.mxu1 %v4106_v5 }
 0x8f9   :  { %3589 = vperm.xlu1 %4377, %v3581_v44   ;;  %4217 = vmatmul.f32.vlgmr.msra.gmra.mxu3 %v4003_v22 }
 0x8fa   :  { %4242 = vmatpush.msrb.mxu0 %v4038_v52  ;;  %4113 = vmatpush.msra.mxu1 %v4112_v57 }
 0x8fb   :  { %4378 = vset.pattern.permute.xlu2 %v4403_v33  ;;  %4115 = vmatmul.f32.vlgmr.msra.gmra.mxu1 %v6594_v19 }
 0x8fc   :  { %4301 = vmatpush.msrb.mxu1 %v6494_v51  ;;  %4246 = vmatpush.msrb.mxu0 %v4044_v12 }
 0x8fd   :  { %4014 = vmatmul.f32.gmra.mxu0 %v4013_v9  ;;  %4379 = vset.pattern.permute.xlu0 %v4403_v33 }
 0x8fe   :  { %4303 = vmatpush.msrb.mxu1 %v6477_v61  ;;  %4250 = vmatpush.msrb.mxu0 %v4050_v30 }
 0x8ff   :  { %4178 = vmatmul.f32.gmra.mxu2 %v4010_v29  ;;  %3594 = vperm.xlu2 %4378, %v3582_v42  }
 0x900   :  { %4305 = vmatpush.msrb.mxu1 %v6480_v43  ;;  %4254 = vmatpush.msrb.mxu0 %v4056_v16 }
 0x901   :  { %4223 = vmatmul.f32.gmra.mxu3 %v4011_v26 }
 0x902   :  { %4307 = vmatpush.msrb.mxu1 %v6482_v48  ;;  %4258 = vmatpush.msrb.mxu0 %v4062_v13 }
 0x903   :  { %4119 = vmatmul.f32.gmra.mxu1 %v6650_v11 }
 0x904   :  { %4309 = vmatpush.msrb.mxu1 %v6489_v63  ;;  %4262 = vmatpush.msrb.mxu0 %v4068_v25 }
 0x906   :  { %4311 = vmatpush.msrb.mxu1 %v6497_v47  ;;  %4266 = vmatpush.msrb.mxu0 %v4074_v34 }
 0x908   :  { %4313 = vmatpush.msrb.mxu1 %v6509_v23  ;;  %4270 = vmatpush.msrb.mxu0 %v4080_v4 }
 0x90a   :  { %4315 = vmatpush.msrb.mxu1 %v6519_v58  ;;  %4274 = vmatpush.msrb.mxu0 %v4086_v6 }
 0x90c   :  { %4317 = vmatpush.msrb.mxu1 %v6535_v7  ;;  %4278 = vmatpush.msrb.mxu0 %v4092_v49 }
 0x90e   :  { %4319 = vmatpush.msrb.mxu1 %v6549_v1  ;;  %4282 = vmatpush.msrb.mxu0 %v4098_v27 }
 0x910   :  { %4321 = vmatpush.msrb.mxu1 %v6561_v35  ;;  %4286 = vmatpush.msrb.mxu0 %v4104_v21 }
 0x912   :  { %4323 = vmatpush.msrb.mxu1 %v6577_v37  ;;  %4290 = vmatpush.msrb.mxu0 %v4110_v10 }
 0x913   :  { %4292 = vmatmul.f32.vlgmr.msrb.gmra.mxu0 %v6594_v19 }
 0x914   :  { %4325 = vmatpush.msrb.mxu1 %v6590_v39 }
 0x916   :  { %4327 = vmatpush.msrb.mxu1 %v6605_v62 }
 0x918   :  { %4329 = vmatpush.msrb.mxu1 %v6617_v36 }
 0x919   :  { %v3802_v48 = vpop.f32.mrf.mxu0 }
 0x91a   :  { %4331 = vmatpush.msrb.mxu1 %v6635_v41 }
 0x91b   :  { %4333 = vmatmul.f32.vlgmr.msrb.gmra.mxu1 %v6594_v19  ;;  %4296 = vmatmul.f32.gmra.mxu0 %v6650_v11  ;;  %v3846_v47 = vpop.f32.mrf.mxu1 }
 0x91e   :  { %v3744_v43 = vpop.f32.mrf.mxu3 }
 0x921   :  { %v3807_v23 = vpop.f32.mrf.mxu0 }
 0x923   :  { %4337 = vmatmul.f32.gmra.mxu1 %v6650_v11  ;;  %v3852_v52 = vpop.f32.mrf.mxu1 }
 0x925   :  { %v3635_v61 = vpop.f32.mrf.mxu2 }
 0x926   :  { %v3748_v56 = vpop.f32.mrf.mxu3 }
 0x92d   :  { %v3643_v63 = vpop.f32.mrf.mxu2 }
 0x92e   :  { %v3962_v7 = vpop.f32.mrf.mxu3 }
 0x935   :  { %v3921_v45 = vpop.f32.mrf.mxu2 }
 0x936   :  { %v3966_v50 = vpop.f32.mrf.mxu3 }
 0x93d   :  { %v3925_v35 = vpop.f32.mrf.mxu2 }
 0x959   :  { %v3595_v17 = vpop.permute.xlu2 %3594 }
 0x95a   :  { %v3644_v18 = vadd.f32 %v3643_v63, %v3595_v17 }
 0x95c   :  { %v3749_v12 = vadd.f32 %v3748_v56, %v3644_v18 }
 0x95e   :  { %v3808_v30 = vadd.f32 %v3807_v23, %v3749_v12 }
 0x960   :  { %v3853_v16 = vadd.f32 %v3852_v52, %v3808_v30 }
 0x962   :  { %v3926_v39 = vadd.f32 %v3925_v35, %v3853_v16 }
 0x964   :  { %v3967_v62 = vadd.f32 %v3966_v50, %v3926_v39 }
 0x96b   :  { %v3590_v8 = vpop.permute.xlu1 %3589 }
 0x96c   :  { %v3636_v51 = vadd.f32 %v3635_v61, %v3590_v8 }
 0x96e   :  { %v3745_v28 = vadd.f32 %v3744_v43, %v3636_v51 }
 0x970   :  { %v3803_v58 = vadd.f32 %v3802_v48, %v3745_v28 }
 0x972   :  { %v3847_v60 = vadd.f32 %v3846_v47, %v3803_v58  ;;  %v4007_v1 = vpop.f32.mrf.mxu0 }
 0x974   :  { %v3922_v46 = vadd.f32 %v3921_v45, %v3847_v60 }
 0x976   :  { %v3963_v40 = vadd.f32 %v3962_v7, %v3922_v46 }
 0x978   :  { %v4116_v37 = vpop.f32.mrf.mxu1  ;;  %v4008_v13 = vadd.f32 %v4007_v1, %v3963_v40 }
 0x97a   :  { %v4015_v19 = vpop.f32.mrf.mxu0  ;;  %v4174_v32 = vpop.f32.mrf.mxu2  ;;  %v4117_v25 = vadd.f32 %v4116_v37, %v4008_v13 }
 0x97b   :  { %v4016_v36 = vadd.f32 %v4015_v19, %v3967_v62 }
 0x97c   :  { %v4218_v34 = vpop.f32.mrf.mxu3  ;;  %v4175_v59 = vadd.f32 %v4174_v32, %v4117_v25 }
 0x97e   :  { %v4219_v41 = vadd.f32 %v4218_v34, %v4175_v59 }
 0x980   :  { %v4120_v55 = vpop.f32.mrf.mxu1 }
 0x981   :  { %v4121_v4 = vadd.f32 %v4120_v55, %v4016_v36 }
 0x982   :  { %v4179_v20 = vpop.f32.mrf.mxu2 }
 0x983   :  { %v4180_v53 = vadd.f32 %v4179_v20, %v4121_v4 }
 0x984   :  { %v4224_v49 = vpop.f32.mrf.mxu3 }
 0x985   :  { %v4225_v27 = vadd.f32 %v4224_v49, %v4180_v53 }
 0x990   :  { %v4293_v15 = vpop.f32.mrf.mxu0 }
 0x991   :  { %v4294_v6 = vadd.f32 %v4293_v15, %v4219_v41 }
 0x998   :  { %v4334_v22 = vpop.f32.mrf.mxu1  ;;  %v4297_v54 = vpop.f32.mrf.mxu0 }
 0x999   :  { %v4335_v11 = vadd.f32 %v4334_v22, %v4294_v6  ;;  %v4298_v29 = vadd.f32 %v4297_v54, %v4225_v27 }
 0x99b   :  { %4380 = vtanh.f32 %v4335_v11 }
 0x9a0   :  { %v4338_v21 = vpop.f32.mrf.mxu1 }
 0x9a1   :  { %v4381_v0 = vpop.eup %4380  ;;  %v4339_v10 = vadd.f32 %v4338_v21, %v4298_v29 }
 0x9a2   :  { %4343 = vst.msk [vmem:[%s6771_s4] sm:$0xff] %vm895_vm1, %v4381_v0 }
 0x9a3   :  { %4382 = vtanh.f32 %v4339_v10 }
 0x9a9   :  { %v4383_v24 = vpop.eup %4382 }
 0x9aa   :  { %4344 = vst.msk [vmem:[%s6771_s4 + $0x8] sm:$0xff] %vm895_vm1, %v4383_v24 }

</bundles_post_ra>
